<compile_context>
chip_gen: v5e
topology: v5e:2x2
jax: 0.10.0
libtpu: 0.0.40
codegen_flags: <defaults>
</compile_context>

<pallas_src>
import functools

import jax
import jax.numpy as jnp
from jax.experimental import pallas as pl
from jax.experimental.pallas import tpu as pltpu


# ----------------------------------------------------------------------------
# Padding / tiling helpers (shared by weight prep and the matmul wrapper)
# ----------------------------------------------------------------------------
def _round_up(x, m):
    return (x + m - 1) // m * m


def _pad_dim(dim, align, single_cap, tile):
    """Return (padded_dim, tile) for one matmul dimension."""
    p = _round_up(dim, align)
    if p <= single_cap:
        return p, p
    return _round_up(dim, tile), tile


_M_ALIGN, _M_CAP, _M_TILE = 8, 256, 256       # rows (sublane): safe on v5e/v6e/v7x
_K_ALIGN, _K_CAP, _K_TILE = 128, 2048, 512    # contraction dim
_N_ALIGN, _N_CAP, _N_TILE = 128, 512, 512     # output channels (lane-dense)

_VMEM_LIMIT = 32 * 1024 * 1024


# ----------------------------------------------------------------------------
# Pallas kernel #1: tiled, K-accumulated  out = act(A @ B + bias)
#   A: (tm, tk) bf16   B: (tk, tn) bf16   bias: (1, tn) f32
#   grid = (M tiles, N tiles, K tiles), K innermost ("arbitrary")
# ----------------------------------------------------------------------------
def _mm_bias_act_kernel(a_ref, b_ref, bias_ref, o_ref, acc_ref, *, act):
    k = pl.program_id(2)

    @pl.when(k == 0)
    def _():
        acc_ref[...] = jnp.zeros_like(acc_ref)

    acc_ref[...] += jnp.dot(a_ref[...], b_ref[...],
                            preferred_element_type=jnp.float32)

    @pl.when(k == pl.num_programs(2) - 1)
    def _():
        r = acc_ref[...] + bias_ref[...]
        if act == "relu":
            r = jnp.maximum(r, 0.0)
        elif act == "leaky_relu":
            r = jnp.where(r > 0.0, r, 0.01 * r)
        o_ref[...] = r.astype(o_ref.dtype)


def matmul_bias_act(a, layer, act, out_dtype=jnp.float32):
    """act(a @ wmat + bias) with pre-padded weights. Returns PADDED (Mp, Np)."""
    wmat, bias = layer["wmat"], layer["bias"]
    M, K = a.shape
    Kp, Np = wmat.shape
    Mp, tm = _pad_dim(M, _M_ALIGN, _M_CAP, _M_TILE)
    tk = Kp if Kp <= _K_CAP else _K_TILE
    tn = Np if Np <= _N_CAP else _N_TILE

    a = a.astype(jnp.bfloat16)
    if (Mp, Kp) != (M, K):
        a = jnp.pad(a, ((0, Mp - M), (0, Kp - K)))

    grid = (Mp // tm, Np // tn, Kp // tk)
    out = pl.pallas_call(
        functools.partial(_mm_bias_act_kernel, act=act),
        out_shape=jax.ShapeDtypeStruct((Mp, Np), out_dtype),
        grid=grid,
        in_specs=[
            pl.BlockSpec((tm, tk), lambda i, j, k: (i, k)),   # A tile
            pl.BlockSpec((tk, tn), lambda i, j, k: (k, j)),   # B tile
            pl.BlockSpec((1, tn), lambda i, j, k: (0, j)),    # bias tile
        ],
        out_specs=pl.BlockSpec((tm, tn), lambda i, j, k: (i, j)),
        scratch_shapes=[pltpu.VMEM((tm, tn), jnp.float32)],
        compiler_params=pltpu.CompilerParams(
            dimension_semantics=("parallel", "parallel", "arbitrary"),
            vmem_limit_bytes=_VMEM_LIMIT,
        ),
    )(a, wmat, bias)
    return out


# ----------------------------------------------------------------------------
# Pallas kernel #2: fused tiny-MLP chain (all weights resident in VMEM)
# ----------------------------------------------------------------------------
def _mlp_chain_kernel(*refs, acts):
    x_ref = refs[0]
    o_ref = refs[-1]
    h = x_ref[...]
    for i, act in enumerate(acts):
        w = refs[1 + 2 * i][...]
        b = refs[2 + 2 * i][...]
        h = jnp.dot(h.astype(jnp.bfloat16), w,
                    preferred_element_type=jnp.float32) + b
        if act == "relu":
            h = jnp.maximum(h, 0.0)
        elif act == "leaky_relu":
            h = jnp.where(h > 0.0, h, 0.01 * h)
    o_ref[...] = h.astype(o_ref.dtype)


def mlp_chain(x, layers, acts, out_real):
    """Apply a chain of pre-padded linear layers; returns UNPADDED (M, out_real)."""
    M, K0 = x.shape
    Kp0 = layers[0]["wmat"].shape[0]
    Np_last = layers[-1]["wmat"].shape[1]
    Mp = max(8, _round_up(M, 8))

    total_w_bytes = sum(int(l["wmat"].size) for l in layers) * 2
    if total_w_bytes > 8 * 1024 * 1024:
        # Very wide layers: fall back to the tiled matmul kernel per layer.
        h = x
        for l, a in zip(layers, acts):
            h = matmul_bias_act(h, l, a, jnp.float32)
        return h[:M, :out_real]

    xp = jnp.pad(x, ((0, Mp - M), (0, Kp0 - K0)))
    args = [xp]
    for l in layers:
        args += [l["wmat"], l["bias"]]
    out = pl.pallas_call(
        functools.partial(_mlp_chain_kernel, acts=tuple(acts)),
        out_shape=jax.ShapeDtypeStruct((Mp, Np_last), jnp.float32),
        compiler_params=pltpu.CompilerParams(vmem_limit_bytes=_VMEM_LIMIT),
    )(*args)
    return out[:M, :out_real]


# ----------------------------------------------------------------------------
# im2col (NHWC, channels-last -> channels on the lane dim) and conv wrappers
# ----------------------------------------------------------------------------
def _im2col_nhwc(x, kh, kw, stride, pt, pb, pleft, pright):
    B, H, W, C = x.shape
    xp = jnp.pad(x, ((0, 0), (pt, pb), (pleft, pright), (0, 0)))
    Ho = (H + pt + pb - kh) // stride + 1
    Wo = (W + pleft + pright - kw) // stride + 1
    cols = []
    for i in range(kh):
        for j in range(kw):
            cols.append(xp[:, i:i + stride * Ho:stride, j:j + stride * Wo:stride, :])
    a = jnp.stack(cols, axis=3)                       # (B, Ho, Wo, kh*kw, C)
    return a.reshape(B * Ho * Wo, kh * kw * C), Ho, Wo


def conv2d_packed(x, layer, act, out_dtype=jnp.bfloat16):
    """Ordinary conv (also covers stride-1 ConvTranspose via pre-flipped weights)."""
    kh, kw, stride, pt, pb, pleft, pright = layer["geom"]
    a, Ho, Wo = _im2col_nhwc(x, kh, kw, stride, pt, pb, pleft, pright)
    out = matmul_bias_act(a, layer, act, out_dtype)
    B = x.shape[0]
    N = layer["n_real"]
    return out[:B * Ho * Wo, :N].reshape(B, Ho, Wo, N)


def conv_transpose2d_s2_packed(x, layer, act, out_dtype=jnp.bfloat16):
    """ConvTranspose2d(k=3, s=2, p=1, op=1) via exact 4-phase decomposition:
    one matmul over a 2x2 window, output columns = 4 stride phases x Cout."""
    B, H, W, _ = x.shape
    a, _, _ = _im2col_nhwc(x, 2, 2, 1, 0, 1, 0, 1)    # (B*H*W, 4*Cin)
    out = matmul_bias_act(a, layer, act, out_dtype)
    Cout = layer["n_real"] // 4
    out = out[:B * H * W, :4 * Cout].reshape(B, H, W, 2, 2, Cout)
    out = out.transpose(0, 1, 3, 2, 4, 5).reshape(B, 2 * H, 2 * W, Cout)
    return out


# ----------------------------------------------------------------------------
# Weight preparation: transpose / flip / pad / cast ONCE at init
# ----------------------------------------------------------------------------
def _prep_matmul(wmat, bias):
    K, N = wmat.shape
    Kp, _ = _pad_dim(K, _K_ALIGN, _K_CAP, _K_TILE)
    Np, _ = _pad_dim(N, _N_ALIGN, _N_CAP, _N_TILE)
    wp = jnp.zeros((Kp, Np), jnp.float32).at[:K, :N].set(wmat.astype(jnp.float32))
    bp = jnp.zeros((1, Np), jnp.float32).at[0, :N].set(bias.astype(jnp.float32))
    return dict(wmat=wp.astype(jnp.bfloat16), bias=bp, k_real=K, n_real=N)


def prep_conv(w, b, stride, padding):
    # PyTorch Conv2d weight (Cout, Cin, kh, kw) -> (kh*kw*Cin, Cout)
    Cout, Cin, kh, kw = w.shape
    wmat = w.transpose(2, 3, 1, 0).reshape(kh * kw * Cin, Cout)
    layer = _prep_matmul(wmat, b)
    layer["geom"] = (kh, kw, stride, padding, padding, padding, padding)
    return layer


def prep_convT_s1(w, b, padding):
    # PyTorch ConvTranspose2d weight (Cin, Cout, kh, kw), stride 1 ->
    # ordinary correlation with flipped kernel and padding kh-1-padding.
    Cin, Cout, kh, kw = w.shape
    wf = jnp.flip(w, (2, 3)).transpose(2, 3, 0, 1)    # (kh, kw, Cin, Cout)
    layer = _prep_matmul(wf.reshape(kh * kw * Cin, Cout), b)
    p = kh - 1 - padding
    layer["geom"] = (kh, kw, 1, p, p, p, p)
    return layer


def prep_convT_s2(w, b):
    # ConvTranspose2d(k=3, s=2, p=1, op=1): exact phase decomposition.
    # y[2i+r, 2j+s] only touches x[i..i+1, j..j+1]; pack the 4 phases into one
    # (4*Cin, 4*Cout) matmul (lane-dense output, no zero-dilated FLOPs).
    Cin, Cout, kh, kw = w.shape
    wf = jnp.flip(w, (2, 3)).transpose(2, 3, 0, 1)    # (ky, kx, Cin, Cout)
    Wc = jnp.zeros((2, 2, Cin, 2, 2, Cout), jnp.float32)  # (dy,dx,cin, r,s,cout)
    Wc = Wc.at[0, 0, :, 0, 0, :].set(wf[1, 1])
    Wc = Wc.at[0, 0, :, 0, 1, :].set(wf[1, 0])
    Wc = Wc.at[0, 1, :, 0, 1, :].set(wf[1, 2])
    Wc = Wc.at[0, 0, :, 1, 0, :].set(wf[0, 1])
    Wc = Wc.at[1, 0, :, 1, 0, :].set(wf[2, 1])
    Wc = Wc.at[0, 0, :, 1, 1, :].set(wf[0, 0])
    Wc = Wc.at[0, 1, :, 1, 1, :].set(wf[0, 2])
    Wc = Wc.at[1, 0, :, 1, 1, :].set(wf[2, 0])
    Wc = Wc.at[1, 1, :, 1, 1, :].set(wf[2, 2])
    wmat = Wc.reshape(4 * Cin, 4 * Cout)
    bias = jnp.tile(b, 4)
    return _prep_matmul(wmat, bias)


def prep_linear(w, b):
    # PyTorch Linear weight (out, in) -> (in, out)
    return _prep_matmul(w.T, b)


# ----------------------------------------------------------------------------
# Deterministic parameter init (synthetic weights, PyTorch-style uniform)
# ----------------------------------------------------------------------------
def _init_wb(key, w_shape, fan_in, bias_len):
    kw, kb = jax.random.split(key)
    bound = 1.0 / jnp.sqrt(jnp.float32(fan_in))
    w = jax.random.uniform(kw, w_shape, jnp.float32, -bound, bound)
    b = jax.random.uniform(kb, (bias_len,), jnp.float32, -bound, bound)
    return w, b


def _init_conv(key, cout, cin, k=3):
    return _init_wb(key, (cout, cin, k, k), cin * k * k, cout)


def _init_convT(key, cin, cout, k=3):
    return _init_wb(key, (cin, cout, k, k), cout * k * k, cout)


def _init_linear(key, out_f, in_f):
    return _init_wb(key, (out_f, in_f), in_f, out_f)


# ----------------------------------------------------------------------------
# The Net module in JAX
# ----------------------------------------------------------------------------
class ConvVaeNet:
    def __init__(self, num_layers, img_dim, in_chan, act_func, latent_vector_size, key):
        assert act_func in ("ReLU", "LeakyReLU")
        assert img_dim % 2 ** num_layers >= 0
        self.act = "relu" if act_func == "ReLU" else "leaky_relu"
        self.num_layers = num_layers
        keys = iter(jax.random.split(key, 8 + 4 * num_layers))

        # ---- encoder convs (down_conv) ----
        self.enc = []
        ic, oc = in_chan, 2 ** 5
        for _ in range(num_layers):
            w1, b1 = _init_conv(next(keys), oc, ic)
            w2, b2 = _init_conv(next(keys), 2 * oc, oc)
            self.enc.append((prep_conv(w1, b1, 1, 1), prep_conv(w2, b2, 2, 1)))
            ic = oc * 2
            oc = oc * 4
        feat = oc // 2 * (img_dim // 2 ** num_layers) ** 2
        lv = latent_vector_size
        self.feat, self.lv = feat, lv

        # ---- encoder MLP: fc1 -> ReLU -> fc2 -> ReLU -> [mu | logvar] ----
        w, b = _init_linear(next(keys), lv * 4, feat)
        fc1 = prep_linear(w, b)
        w, b = _init_linear(next(keys), lv * 2, lv * 4)
        fc2 = prep_linear(w, b)
        wmu, bmu = _init_linear(next(keys), lv, lv * 2)
        wlg, blg = _init_linear(next(keys), lv, lv * 2)
        heads = prep_linear(jnp.concatenate([wmu, wlg], 0),
                            jnp.concatenate([bmu, blg], 0))
        self.enc_mlp = [fc1, fc2, heads]
        self.enc_mlp_acts = ["relu", "relu", "none"]

        # ---- decoder MLP ----
        w, b = _init_linear(next(keys), lv * 4, lv)
        dfc1 = prep_linear(w, b)
        w, b = _init_linear(next(keys), feat, lv * 4)
        dfc2 = prep_linear(w, b)
        self.dec_mlp = [dfc1, dfc2]
        self.dec_mlp_acts = ["relu", "relu"]
        self.unflat = (oc // 2, img_dim // 2 ** num_layers, img_dim // 2 ** num_layers)

        # ---- decoder convs (up_conv) ----
        self.dec = []
        oc2 = oc
        for _ in range(num_layers):
            w1, b1 = _init_convT(next(keys), oc2 // 2, oc2 // 4)
            w2, b2 = _init_convT(next(keys), oc2 // 4, oc2 // 8)
            self.dec.append((prep_convT_s1(w1, b1, 1), prep_convT_s2(w2, b2)))
            oc2 //= 4
        wfin, bfin = _init_convT(next(keys), oc2 // 2, in_chan)
        self.final = prep_convT_s1(wfin, bfin, 1)

    # activations stay NHWC internally; module boundary is NCHW
    def encode(self, x_nhwc):
        h = x_nhwc
        for l1, l2 in self.enc:
            h = conv2d_packed(h, l1, self.act)           # 3x3 s1 p1
            h = conv2d_packed(h, l2, self.act)           # 3x3 s2 p1
        B = h.shape[0]
        h = h.transpose(0, 3, 1, 2).reshape(B, -1)       # Flatten in NCHW order
        out = mlp_chain(h, self.enc_mlp, self.enc_mlp_acts, 2 * self.lv)
        return out[:, :self.lv], out[:, self.lv:]

    def reparameterize(self, mu, logvar, key):
        std = jnp.exp(0.5 * logvar)
        eps = jax.random.normal(key, std.shape, std.dtype)
        return mu + std * eps

    def decode(self, z):
        h = mlp_chain(z, self.dec_mlp, self.dec_mlp_acts, self.feat)
        C, H, W = self.unflat
        B = h.shape[0]
        h = h.reshape(B, C, H, W).transpose(0, 2, 3, 1)  # Unflatten -> NHWC
        for t1, t2 in self.dec:
            h = conv2d_packed(h, t1, self.act)           # ConvT 3x3 s1 p1
            h = conv_transpose2d_s2_packed(h, t2, self.act)  # ConvT 3x3 s2 p1 op1
        return conv2d_packed(h, self.final, "none", out_dtype=jnp.float32)

    def __call__(self, x_nchw, key):
        x = x_nchw.transpose(0, 2, 3, 1)                 # NCHW -> NHWC (once)
        mu, logvar = self.encode(x)
        z = self.reparameterize(mu, logvar, key)
        recon = self.decode(z).transpose(0, 3, 1, 2)     # NHWC -> NCHW (once)
        return recon, mu, logvar


# ----------------------------------------------------------------------------
if __name__ == "__main__":
    key = jax.random.PRNGKey(0)
    k_param, k_x, k_eps = jax.random.split(key, 3)

    B, IN_CHAN, IMG, LAYERS, LATENT = 2, 4, 16, 1, 8
    net = ConvVaeNet(num_layers=LAYERS, img_dim=IMG, in_chan=IN_CHAN,
                     act_func="ReLU", latent_vector_size=LATENT, key=k_param)

    x = jax.random.normal(k_x, (B, IN_CHAN, IMG, IMG), jnp.float32)

    forward = jax.jit(net.__call__)
    recon, mu, logvar = forward(x, k_eps)
    jax.block_until_ready((recon, mu, logvar))

    assert recon.shape == (B, IN_CHAN, IMG, IMG)
    assert mu.shape == (B, LATENT) and logvar.shape == (B, LATENT)
    assert bool(jnp.all(jnp.isfinite(recon)))
    print("KERNEL_OK")
</pallas_src>

<mosaic_0001>
module attributes {stable_mosaic.version = 11 : i64} {
  func.func @_mm_bias_act_kernel(%arg0: i32, %arg1: i32, %arg2: i32, %arg3: memref<256x128xbf16, #tpu.memory_space<vmem>>, %arg4: memref<128x128xbf16, #tpu.memory_space<vmem>>, %arg5: memref<1x128xf32, #tpu.memory_space<vmem>>, %arg6: memref<256x128xbf16, #tpu.memory_space<vmem>>, %arg7: memref<256x128xf32, #tpu.memory_space<vmem>>) attributes {dimension_semantics = [#tpu.dimension_semantics<parallel>, #tpu.dimension_semantics<parallel>, #tpu.dimension_semantics<arbitrary>], iteration_bounds = array<i64: 2, 1, 1>, scalar_prefetch = 0 : i64, scratch_operands = 1 : i64, tpu.core_type = #tpu.core_type<tc>, window_params = [{transform_indices = @transform_0, window_bounds = array<i64: 256, 128>}, {transform_indices = @transform_1, window_bounds = array<i64: 128, 128>}, {transform_indices = @transform_2, window_bounds = array<i64: 1, 128>}, {transform_indices = @transform_3, window_bounds = array<i64: 256, 128>}]} {
    %c0_i32 = arith.constant 0 : i32
    %0 = arith.cmpi eq, %arg2, %c0_i32 : i32
    %1 = arith.extui %0 : i1 to i32
    %c0_i32_0 = arith.constant 0 : i32
    %2 = arith.cmpi ne, %1, %c0_i32_0 : i32
    scf.if %2 {
      %cst_10 = arith.constant 0.000000e+00 : f32
      %12 = vector.broadcast %cst_10 : f32 to vector<256x128xf32>
      %c0_11 = arith.constant 0 : index
      %c0_12 = arith.constant 0 : index
      %13 = vector.load %arg7[%c0_11, %c0_12] : memref<256x128xf32, #tpu.memory_space<vmem>>, vector<256x128xf32>
      tpu.vector_store %arg7[%c0_11, %c0_12], %12 {strides = array<i32>} : memref<256x128xf32, #tpu.memory_space<vmem>>, vector<256x128xf32>,
    } else {
    }
    %c0 = arith.constant 0 : index
    %c0_1 = arith.constant 0 : index
    %3 = vector.load %arg7[%c0, %c0_1] : memref<256x128xf32, #tpu.memory_space<vmem>>, vector<256x128xf32>
    %c0_2 = arith.constant 0 : index
    %c0_3 = arith.constant 0 : index
    %4 = vector.load %arg3[%c0_2, %c0_3] : memref<256x128xbf16, #tpu.memory_space<vmem>>, vector<256x128xbf16>
    %c0_4 = arith.constant 0 : index
    %c0_5 = arith.constant 0 : index
    %5 = vector.load %arg4[%c0_4, %c0_5] : memref<128x128xbf16, #tpu.memory_space<vmem>>, vector<128x128xbf16>
    %cst = arith.constant dense<0.000000e+00> : vector<256x128xf32>
    %6 = tpu.matmul %4, %5, %cst {dimension_numbers = #tpu.dot_dimension_numbers<[1], [0], [0], [1], [0, 0, 1, 1], [], []>} : vector<256x128xbf16>, vector<128x128xbf16>, vector<256x128xf32> -> vector<256x128xf32>
    %7 = arith.addf %3, %6 : vector<256x128xf32>
    %c0_6 = arith.constant 0 : index
    %c0_7 = arith.constant 0 : index
    %8 = vector.load %arg7[%c0_6, %c0_7] : memref<256x128xf32, #tpu.memory_space<vmem>>, vector<256x128xf32>
    tpu.vector_store %arg7[%c0_6, %c0_7], %7 {strides = array<i32>} : memref<256x128xf32, #tpu.memory_space<vmem>>, vector<256x128xf32>,
    %c0_i32_8 = arith.constant 0 : i32
    %9 = arith.cmpi eq, %arg2, %c0_i32_8 : i32
    %10 = arith.extui %9 : i1 to i32
    %c0_i32_9 = arith.constant 0 : i32
    %11 = arith.cmpi ne, %10, %c0_i32_9 : i32
    scf.if %11 {
      %c0_10 = arith.constant 0 : index
      %c0_11 = arith.constant 0 : index
      %12 = vector.load %arg7[%c0_10, %c0_11] : memref<256x128xf32, #tpu.memory_space<vmem>>, vector<256x128xf32>
      %c0_12 = arith.constant 0 : index
      %c0_13 = arith.constant 0 : index
      %13 = vector.load %arg5[%c0_12, %c0_13] : memref<1x128xf32, #tpu.memory_space<vmem>>, vector<1x128xf32>
      %14 = vector.broadcast %13 : vector<1x128xf32> to vector<256x128xf32>
      %15 = arith.addf %12, %14 : vector<256x128xf32>
      %cst_14 = arith.constant 0.000000e+00 : f32
      %16 = vector.broadcast %cst_14 : f32 to vector<256x128xf32>
      %17 = arith.maximumf %15, %16 : vector<256x128xf32>
      %18 = arith.truncf %17 : vector<256x128xf32> to vector<256x128xbf16>
      %c0_15 = arith.constant 0 : index
      %c0_16 = arith.constant 0 : index
      %19 = vector.load %arg6[%c0_15, %c0_16] : memref<256x128xbf16, #tpu.memory_space<vmem>>, vector<256x128xbf16>
      tpu.vector_store %arg6[%c0_15, %c0_16], %18 {strides = array<i32>} : memref<256x128xbf16, #tpu.memory_space<vmem>>, vector<256x128xbf16>,
    } else {
    }
    return
  }
  func.func @transform_0(%arg0: i32, %arg1: i32, %arg2: i32) -> (i32, i32) {
    %c0_i32 = arith.constant 0 : i32
    return %arg0, %arg2 : i32, i32
  }
  func.func @transform_1(%arg0: i32, %arg1: i32, %arg2: i32) -> (i32, i32) {
    %c0_i32 = arith.constant 0 : i32
    return %arg2, %arg1 : i32, i32
  }
  func.func @transform_2(%arg0: i32, %arg1: i32, %arg2: i32) -> (i32, i32) {
    %c0_i32 = arith.constant 0 : i32
    %c0_i32_0 = arith.constant 0 : i32
    return %c0_i32, %arg1 : i32, i32
  }
  func.func @transform_3(%arg0: i32, %arg1: i32, %arg2: i32) -> (i32, i32) {
    %c0_i32 = arith.constant 0 : i32
    return %arg0, %arg1 : i32, i32
  }
}

module attributes {stable_mosaic.version = 11 : i64} {
  func.func @_mm_bias_act_kernel(%arg0: i32, %arg1: i32, %arg2: i32, %arg3: memref<128x384xbf16, #tpu.memory_space<vmem>>, %arg4: memref<384x128xbf16, #tpu.memory_space<vmem>>, %arg5: memref<1x128xf32, #tpu.memory_space<vmem>>, %arg6: memref<128x128xbf16, #tpu.memory_space<vmem>>, %arg7: memref<128x128xf32, #tpu.memory_space<vmem>>) attributes {dimension_semantics = [#tpu.dimension_semantics<parallel>, #tpu.dimension_semantics<parallel>, #tpu.dimension_semantics<arbitrary>], iteration_bounds = array<i64: 1, 1, 1>, scalar_prefetch = 0 : i64, scratch_operands = 1 : i64, tpu.core_type = #tpu.core_type<tc>, window_params = [{transform_indices = @transform_0, window_bounds = array<i64: 128, 384>}, {transform_indices = @transform_1, window_bounds = array<i64: 384, 128>}, {transform_indices = @transform_2, window_bounds = array<i64: 1, 128>}, {transform_indices = @transform_3, window_bounds = array<i64: 128, 128>}]} {
    %c0_i32 = arith.constant 0 : i32
    %0 = arith.cmpi eq, %arg2, %c0_i32 : i32
    %1 = arith.extui %0 : i1 to i32
    %c0_i32_0 = arith.constant 0 : i32
    %2 = arith.cmpi ne, %1, %c0_i32_0 : i32
    scf.if %2 {
      %cst_10 = arith.constant 0.000000e+00 : f32
      %12 = vector.broadcast %cst_10 : f32 to vector<128x128xf32>
      %c0_11 = arith.constant 0 : index
      %c0_12 = arith.constant 0 : index
      %13 = vector.load %arg7[%c0_11, %c0_12] : memref<128x128xf32, #tpu.memory_space<vmem>>, vector<128x128xf32>
      tpu.vector_store %arg7[%c0_11, %c0_12], %12 {strides = array<i32>} : memref<128x128xf32, #tpu.memory_space<vmem>>, vector<128x128xf32>,
    } else {
    }
    %c0 = arith.constant 0 : index
    %c0_1 = arith.constant 0 : index
    %3 = vector.load %arg7[%c0, %c0_1] : memref<128x128xf32, #tpu.memory_space<vmem>>, vector<128x128xf32>
    %c0_2 = arith.constant 0 : index
    %c0_3 = arith.constant 0 : index
    %4 = vector.load %arg3[%c0_2, %c0_3] : memref<128x384xbf16, #tpu.memory_space<vmem>>, vector<128x384xbf16>
    %c0_4 = arith.constant 0 : index
    %c0_5 = arith.constant 0 : index
    %5 = vector.load %arg4[%c0_4, %c0_5] : memref<384x128xbf16, #tpu.memory_space<vmem>>, vector<384x128xbf16>
    %cst = arith.constant dense<0.000000e+00> : vector<128x128xf32>
    %6 = tpu.matmul %4, %5, %cst {dimension_numbers = #tpu.dot_dimension_numbers<[1], [0], [0], [1], [0, 0, 1, 1], [], []>} : vector<128x384xbf16>, vector<384x128xbf16>, vector<128x128xf32> -> vector<128x128xf32>
    %7 = arith.addf %3, %6 : vector<128x128xf32>
    %c0_6 = arith.constant 0 : index
    %c0_7 = arith.constant 0 : index
    %8 = vector.load %arg7[%c0_6, %c0_7] : memref<128x128xf32, #tpu.memory_space<vmem>>, vector<128x128xf32>
    tpu.vector_store %arg7[%c0_6, %c0_7], %7 {strides = array<i32>} : memref<128x128xf32, #tpu.memory_space<vmem>>, vector<128x128xf32>,
    %c0_i32_8 = arith.constant 0 : i32
    %9 = arith.cmpi eq, %arg2, %c0_i32_8 : i32
    %10 = arith.extui %9 : i1 to i32
    %c0_i32_9 = arith.constant 0 : i32
    %11 = arith.cmpi ne, %10, %c0_i32_9 : i32
    scf.if %11 {
      %c0_10 = arith.constant 0 : index
      %c0_11 = arith.constant 0 : index
      %12 = vector.load %arg7[%c0_10, %c0_11] : memref<128x128xf32, #tpu.memory_space<vmem>>, vector<128x128xf32>
      %c0_12 = arith.constant 0 : index
      %c0_13 = arith.constant 0 : index
      %13 = vector.load %arg5[%c0_12, %c0_13] : memref<1x128xf32, #tpu.memory_space<vmem>>, vector<1x128xf32>
      %14 = vector.broadcast %13 : vector<1x128xf32> to vector<128x128xf32>
      %15 = arith.addf %12, %14 : vector<128x128xf32>
      %cst_14 = arith.constant 0.000000e+00 : f32
      %16 = vector.broadcast %cst_14 : f32 to vector<128x128xf32>
      %17 = arith.maximumf %15, %16 : vector<128x128xf32>
      %18 = arith.truncf %17 : vector<128x128xf32> to vector<128x128xbf16>
      %c0_15 = arith.constant 0 : index
      %c0_16 = arith.constant 0 : index
      %19 = vector.load %arg6[%c0_15, %c0_16] : memref<128x128xbf16, #tpu.memory_space<vmem>>, vector<128x128xbf16>
      tpu.vector_store %arg6[%c0_15, %c0_16], %18 {strides = array<i32>} : memref<128x128xbf16, #tpu.memory_space<vmem>>, vector<128x128xbf16>,
    } else {
    }
    return
  }
  func.func @transform_0(%arg0: i32, %arg1: i32, %arg2: i32) -> (i32, i32) {
    %c0_i32 = arith.constant 0 : i32
    return %arg0, %arg2 : i32, i32
  }
  func.func @transform_1(%arg0: i32, %arg1: i32, %arg2: i32) -> (i32, i32) {
    %c0_i32 = arith.constant 0 : i32
    return %arg2, %arg1 : i32, i32
  }
  func.func @transform_2(%arg0: i32, %arg1: i32, %arg2: i32) -> (i32, i32) {
    %c0_i32 = arith.constant 0 : i32
    %c0_i32_0 = arith.constant 0 : i32
    return %c0_i32, %arg1 : i32, i32
  }
  func.func @transform_3(%arg0: i32, %arg1: i32, %arg2: i32) -> (i32, i32) {
    %c0_i32 = arith.constant 0 : i32
    return %arg0, %arg1 : i32, i32
  }
}

module attributes {stable_mosaic.version = 11 : i64} {
  func.func @_mlp_chain_kernel(%arg0: memref<8x128xf32, #tpu.memory_space<vmem>>, %arg1: memref<128x128xbf16, #tpu.memory_space<vmem>>, %arg2: memref<1x128xf32, #tpu.memory_space<vmem>>, %arg3: memref<128x4096xbf16, #tpu.memory_space<vmem>>, %arg4: memref<1x4096xf32, #tpu.memory_space<vmem>>, %arg5: memref<8x4096xf32, #tpu.memory_space<vmem>>) attributes {dimension_semantics = [], scalar_prefetch = 0 : i64, scratch_operands = 0 : i64, tpu.core_type = #tpu.core_type<tc>} {
    %c0 = arith.constant 0 : index
    %c0_0 = arith.constant 0 : index
    %0 = vector.load %arg0[%c0, %c0_0] : memref<8x128xf32, #tpu.memory_space<vmem>>, vector<8x128xf32>
    %c0_1 = arith.constant 0 : index
    %c0_2 = arith.constant 0 : index
    %1 = vector.load %arg1[%c0_1, %c0_2] : memref<128x128xbf16, #tpu.memory_space<vmem>>, vector<128x128xbf16>
    %c0_3 = arith.constant 0 : index
    %c0_4 = arith.constant 0 : index
    %2 = vector.load %arg2[%c0_3, %c0_4] : memref<1x128xf32, #tpu.memory_space<vmem>>, vector<1x128xf32>
    %3 = arith.truncf %0 : vector<8x128xf32> to vector<8x128xbf16>
    %cst = arith.constant dense<0.000000e+00> : vector<8x128xf32>
    %4 = tpu.matmul %3, %1, %cst {dimension_numbers = #tpu.dot_dimension_numbers<[1], [0], [0], [1], [0, 0, 1, 1], [], []>} : vector<8x128xbf16>, vector<128x128xbf16>, vector<8x128xf32> -> vector<8x128xf32>
    %5 = vector.broadcast %2 : vector<1x128xf32> to vector<8x128xf32>
    %6 = arith.addf %4, %5 : vector<8x128xf32>
    %cst_5 = arith.constant 0.000000e+00 : f32
    %7 = vector.broadcast %cst_5 : f32 to vector<8x128xf32>
    %8 = arith.maximumf %6, %7 : vector<8x128xf32>
    %c0_6 = arith.constant 0 : index
    %c0_7 = arith.constant 0 : index
    %9 = vector.load %arg3[%c0_6, %c0_7] : memref<128x4096xbf16, #tpu.memory_space<vmem>>, vector<128x4096xbf16>
    %c0_8 = arith.constant 0 : index
    %c0_9 = arith.constant 0 : index
    %10 = vector.load %arg4[%c0_8, %c0_9] : memref<1x4096xf32, #tpu.memory_space<vmem>>, vector<1x4096xf32>
    %11 = arith.truncf %8 : vector<8x128xf32> to vector<8x128xbf16>
    %cst_10 = arith.constant dense<0.000000e+00> : vector<8x4096xf32>
    %12 = tpu.matmul %11, %9, %cst_10 {dimension_numbers = #tpu.dot_dimension_numbers<[1], [0], [0], [1], [0, 0, 1, 1], [], []>} : vector<8x128xbf16>, vector<128x4096xbf16>, vector<8x4096xf32> -> vector<8x4096xf32>
    %13 = vector.broadcast %10 : vector<1x4096xf32> to vector<8x4096xf32>
    %14 = arith.addf %12, %13 : vector<8x4096xf32>
    %cst_11 = arith.constant 0.000000e+00 : f32
    %15 = vector.broadcast %cst_11 : f32 to vector<8x4096xf32>
    %16 = arith.maximumf %14, %15 : vector<8x4096xf32>
    %c0_12 = arith.constant 0 : index
    %c0_13 = arith.constant 0 : index
    %17 = vector.load %arg5[%c0_12, %c0_13] : memref<8x4096xf32, #tpu.memory_space<vmem>>, vector<8x4096xf32>
    tpu.vector_store %arg5[%c0_12, %c0_13], %16 {strides = array<i32>} : memref<8x4096xf32, #tpu.memory_space<vmem>>, vector<8x4096xf32>,
    return
  }
}

module attributes {stable_mosaic.version = 11 : i64} {
  func.func @_mlp_chain_kernel(%arg0: memref<8x4096xbf16, #tpu.memory_space<vmem>>, %arg1: memref<4096x128xbf16, #tpu.memory_space<vmem>>, %arg2: memref<1x128xf32, #tpu.memory_space<vmem>>, %arg3: memref<128x128xbf16, #tpu.memory_space<vmem>>, %arg4: memref<1x128xf32, #tpu.memory_space<vmem>>, %arg5: memref<128x128xbf16, #tpu.memory_space<vmem>>, %arg6: memref<1x128xf32, #tpu.memory_space<vmem>>, %arg7: memref<8x128xf32, #tpu.memory_space<vmem>>) attributes {dimension_semantics = [], scalar_prefetch = 0 : i64, scratch_operands = 0 : i64, tpu.core_type = #tpu.core_type<tc>} {
    %c0 = arith.constant 0 : index
    %c0_0 = arith.constant 0 : index
    %0 = vector.load %arg0[%c0, %c0_0] : memref<8x4096xbf16, #tpu.memory_space<vmem>>, vector<8x4096xbf16>
    %c0_1 = arith.constant 0 : index
    %c0_2 = arith.constant 0 : index
    %1 = vector.load %arg1[%c0_1, %c0_2] : memref<4096x128xbf16, #tpu.memory_space<vmem>>, vector<4096x128xbf16>
    %c0_3 = arith.constant 0 : index
    %c0_4 = arith.constant 0 : index
    %2 = vector.load %arg2[%c0_3, %c0_4] : memref<1x128xf32, #tpu.memory_space<vmem>>, vector<1x128xf32>
    %cst = arith.constant dense<0.000000e+00> : vector<8x128xf32>
    %3 = tpu.matmul %0, %1, %cst {dimension_numbers = #tpu.dot_dimension_numbers<[1], [0], [0], [1], [0, 0, 1, 1], [], []>} : vector<8x4096xbf16>, vector<4096x128xbf16>, vector<8x128xf32> -> vector<8x128xf32>
    %4 = vector.broadcast %2 : vector<1x128xf32> to vector<8x128xf32>
    %5 = arith.addf %3, %4 : vector<8x128xf32>
    %cst_5 = arith.constant 0.000000e+00 : f32
    %6 = vector.broadcast %cst_5 : f32 to vector<8x128xf32>
    %7 = arith.maximumf %5, %6 : vector<8x128xf32>
    %c0_6 = arith.constant 0 : index
    %c0_7 = arith.constant 0 : index
    %8 = vector.load %arg3[%c0_6, %c0_7] : memref<128x128xbf16, #tpu.memory_space<vmem>>, vector<128x128xbf16>
    %c0_8 = arith.constant 0 : index
    %c0_9 = arith.constant 0 : index
    %9 = vector.load %arg4[%c0_8, %c0_9] : memref<1x128xf32, #tpu.memory_space<vmem>>, vector<1x128xf32>
    %10 = arith.truncf %7 : vector<8x128xf32> to vector<8x128xbf16>
    %cst_10 = arith.constant dense<0.000000e+00> : vector<8x128xf32>
    %11 = tpu.matmul %10, %8, %cst_10 {dimension_numbers = #tpu.dot_dimension_numbers<[1], [0], [0], [1], [0, 0, 1, 1], [], []>} : vector<8x128xbf16>, vector<128x128xbf16>, vector<8x128xf32> -> vector<8x128xf32>
    %12 = vector.broadcast %9 : vector<1x128xf32> to vector<8x128xf32>
    %13 = arith.addf %11, %12 : vector<8x128xf32>
    %cst_11 = arith.constant 0.000000e+00 : f32
    %14 = vector.broadcast %cst_11 : f32 to vector<8x128xf32>
    %15 = arith.maximumf %13, %14 : vector<8x128xf32>
    %c0_12 = arith.constant 0 : index
    %c0_13 = arith.constant 0 : index
    %16 = vector.load %arg5[%c0_12, %c0_13] : memref<128x128xbf16, #tpu.memory_space<vmem>>, vector<128x128xbf16>
    %c0_14 = arith.constant 0 : index
    %c0_15 = arith.constant 0 : index
    %17 = vector.load %arg6[%c0_14, %c0_15] : memref<1x128xf32, #tpu.memory_space<vmem>>, vector<1x128xf32>
    %18 = arith.truncf %15 : vector<8x128xf32> to vector<8x128xbf16>
    %cst_16 = arith.constant dense<0.000000e+00> : vector<8x128xf32>
    %19 = tpu.matmul %18, %16, %cst_16 {dimension_numbers = #tpu.dot_dimension_numbers<[1], [0], [0], [1], [0, 0, 1, 1], [], []>} : vector<8x128xbf16>, vector<128x128xbf16>, vector<8x128xf32> -> vector<8x128xf32>
    %20 = vector.broadcast %17 : vector<1x128xf32> to vector<8x128xf32>
    %21 = arith.addf %19, %20 : vector<8x128xf32>
    %c0_17 = arith.constant 0 : index
    %c0_18 = arith.constant 0 : index
    %22 = vector.load %arg7[%c0_17, %c0_18] : memref<8x128xf32, #tpu.memory_space<vmem>>, vector<8x128xf32>
    tpu.vector_store %arg7[%c0_17, %c0_18], %21 {strides = array<i32>} : memref<8x128xf32, #tpu.memory_space<vmem>>, vector<8x128xf32>,
    return
  }
}

module attributes {stable_mosaic.version = 11 : i64} {
  func.func @_mm_bias_act_kernel(%arg0: i32, %arg1: i32, %arg2: i32, %arg3: memref<128x640xbf16, #tpu.memory_space<vmem>>, %arg4: memref<640x128xbf16, #tpu.memory_space<vmem>>, %arg5: memref<1x128xf32, #tpu.memory_space<vmem>>, %arg6: memref<128x128xbf16, #tpu.memory_space<vmem>>, %arg7: memref<128x128xf32, #tpu.memory_space<vmem>>) attributes {dimension_semantics = [#tpu.dimension_semantics<parallel>, #tpu.dimension_semantics<parallel>, #tpu.dimension_semantics<arbitrary>], iteration_bounds = array<i64: 1, 1, 1>, scalar_prefetch = 0 : i64, scratch_operands = 1 : i64, tpu.core_type = #tpu.core_type<tc>, window_params = [{transform_indices = @transform_0, window_bounds = array<i64: 128, 640>}, {transform_indices = @transform_1, window_bounds = array<i64: 640, 128>}, {transform_indices = @transform_2, window_bounds = array<i64: 1, 128>}, {transform_indices = @transform_3, window_bounds = array<i64: 128, 128>}]} {
    %c0_i32 = arith.constant 0 : i32
    %0 = arith.cmpi eq, %arg2, %c0_i32 : i32
    %1 = arith.extui %0 : i1 to i32
    %c0_i32_0 = arith.constant 0 : i32
    %2 = arith.cmpi ne, %1, %c0_i32_0 : i32
    scf.if %2 {
      %cst_10 = arith.constant 0.000000e+00 : f32
      %12 = vector.broadcast %cst_10 : f32 to vector<128x128xf32>
      %c0_11 = arith.constant 0 : index
      %c0_12 = arith.constant 0 : index
      %13 = vector.load %arg7[%c0_11, %c0_12] : memref<128x128xf32, #tpu.memory_space<vmem>>, vector<128x128xf32>
      tpu.vector_store %arg7[%c0_11, %c0_12], %12 {strides = array<i32>} : memref<128x128xf32, #tpu.memory_space<vmem>>, vector<128x128xf32>,
    } else {
    }
    %c0 = arith.constant 0 : index
    %c0_1 = arith.constant 0 : index
    %3 = vector.load %arg7[%c0, %c0_1] : memref<128x128xf32, #tpu.memory_space<vmem>>, vector<128x128xf32>
    %c0_2 = arith.constant 0 : index
    %c0_3 = arith.constant 0 : index
    %4 = vector.load %arg3[%c0_2, %c0_3] : memref<128x640xbf16, #tpu.memory_space<vmem>>, vector<128x640xbf16>
    %c0_4 = arith.constant 0 : index
    %c0_5 = arith.constant 0 : index
    %5 = vector.load %arg4[%c0_4, %c0_5] : memref<640x128xbf16, #tpu.memory_space<vmem>>, vector<640x128xbf16>
    %cst = arith.constant dense<0.000000e+00> : vector<128x128xf32>
    %6 = tpu.matmul %4, %5, %cst {dimension_numbers = #tpu.dot_dimension_numbers<[1], [0], [0], [1], [0, 0, 1, 1], [], []>} : vector<128x640xbf16>, vector<640x128xbf16>, vector<128x128xf32> -> vector<128x128xf32>
    %7 = arith.addf %3, %6 : vector<128x128xf32>
    %c0_6 = arith.constant 0 : index
    %c0_7 = arith.constant 0 : index
    %8 = vector.load %arg7[%c0_6, %c0_7] : memref<128x128xf32, #tpu.memory_space<vmem>>, vector<128x128xf32>
    tpu.vector_store %arg7[%c0_6, %c0_7], %7 {strides = array<i32>} : memref<128x128xf32, #tpu.memory_space<vmem>>, vector<128x128xf32>,
    %c0_i32_8 = arith.constant 0 : i32
    %9 = arith.cmpi eq, %arg2, %c0_i32_8 : i32
    %10 = arith.extui %9 : i1 to i32
    %c0_i32_9 = arith.constant 0 : i32
    %11 = arith.cmpi ne, %10, %c0_i32_9 : i32
    scf.if %11 {
      %c0_10 = arith.constant 0 : index
      %c0_11 = arith.constant 0 : index
      %12 = vector.load %arg7[%c0_10, %c0_11] : memref<128x128xf32, #tpu.memory_space<vmem>>, vector<128x128xf32>
      %c0_12 = arith.constant 0 : index
      %c0_13 = arith.constant 0 : index
      %13 = vector.load %arg5[%c0_12, %c0_13] : memref<1x128xf32, #tpu.memory_space<vmem>>, vector<1x128xf32>
      %14 = vector.broadcast %13 : vector<1x128xf32> to vector<128x128xf32>
      %15 = arith.addf %12, %14 : vector<128x128xf32>
      %cst_14 = arith.constant 0.000000e+00 : f32
      %16 = vector.broadcast %cst_14 : f32 to vector<128x128xf32>
      %17 = arith.maximumf %15, %16 : vector<128x128xf32>
      %18 = arith.truncf %17 : vector<128x128xf32> to vector<128x128xbf16>
      %c0_15 = arith.constant 0 : index
      %c0_16 = arith.constant 0 : index
      %19 = vector.load %arg6[%c0_15, %c0_16] : memref<128x128xbf16, #tpu.memory_space<vmem>>, vector<128x128xbf16>
      tpu.vector_store %arg6[%c0_15, %c0_16], %18 {strides = array<i32>} : memref<128x128xbf16, #tpu.memory_space<vmem>>, vector<128x128xbf16>,
    } else {
    }
    return
  }
  func.func @transform_0(%arg0: i32, %arg1: i32, %arg2: i32) -> (i32, i32) {
    %c0_i32 = arith.constant 0 : i32
    return %arg0, %arg2 : i32, i32
  }
  func.func @transform_1(%arg0: i32, %arg1: i32, %arg2: i32) -> (i32, i32) {
    %c0_i32 = arith.constant 0 : i32
    return %arg2, %arg1 : i32, i32
  }
  func.func @transform_2(%arg0: i32, %arg1: i32, %arg2: i32) -> (i32, i32) {
    %c0_i32 = arith.constant 0 : i32
    %c0_i32_0 = arith.constant 0 : i32
    return %c0_i32, %arg1 : i32, i32
  }
  func.func @transform_3(%arg0: i32, %arg1: i32, %arg2: i32) -> (i32, i32) {
    %c0_i32 = arith.constant 0 : i32
    return %arg0, %arg1 : i32, i32
  }
}

module attributes {stable_mosaic.version = 11 : i64} {
  func.func @_mm_bias_act_kernel(%arg0: i32, %arg1: i32, %arg2: i32, %arg3: memref<128x128xbf16, #tpu.memory_space<vmem>>, %arg4: memref<128x128xbf16, #tpu.memory_space<vmem>>, %arg5: memref<1x128xf32, #tpu.memory_space<vmem>>, %arg6: memref<128x128xbf16, #tpu.memory_space<vmem>>, %arg7: memref<128x128xf32, #tpu.memory_space<vmem>>) attributes {dimension_semantics = [#tpu.dimension_semantics<parallel>, #tpu.dimension_semantics<parallel>, #tpu.dimension_semantics<arbitrary>], iteration_bounds = array<i64: 1, 1, 1>, scalar_prefetch = 0 : i64, scratch_operands = 1 : i64, tpu.core_type = #tpu.core_type<tc>, window_params = [{transform_indices = @transform_0, window_bounds = array<i64: 128, 128>}, {transform_indices = @transform_1, window_bounds = array<i64: 128, 128>}, {transform_indices = @transform_2, window_bounds = array<i64: 1, 128>}, {transform_indices = @transform_3, window_bounds = array<i64: 128, 128>}]} {
    %c0_i32 = arith.constant 0 : i32
    %0 = arith.cmpi eq, %arg2, %c0_i32 : i32
    %1 = arith.extui %0 : i1 to i32
    %c0_i32_0 = arith.constant 0 : i32
    %2 = arith.cmpi ne, %1, %c0_i32_0 : i32
    scf.if %2 {
      %cst_10 = arith.constant 0.000000e+00 : f32
      %12 = vector.broadcast %cst_10 : f32 to vector<128x128xf32>
      %c0_11 = arith.constant 0 : index
      %c0_12 = arith.constant 0 : index
      %13 = vector.load %arg7[%c0_11, %c0_12] : memref<128x128xf32, #tpu.memory_space<vmem>>, vector<128x128xf32>
      tpu.vector_store %arg7[%c0_11, %c0_12], %12 {strides = array<i32>} : memref<128x128xf32, #tpu.memory_space<vmem>>, vector<128x128xf32>,
    } else {
    }
    %c0 = arith.constant 0 : index
    %c0_1 = arith.constant 0 : index
    %3 = vector.load %arg7[%c0, %c0_1] : memref<128x128xf32, #tpu.memory_space<vmem>>, vector<128x128xf32>
    %c0_2 = arith.constant 0 : index
    %c0_3 = arith.constant 0 : index
    %4 = vector.load %arg3[%c0_2, %c0_3] : memref<128x128xbf16, #tpu.memory_space<vmem>>, vector<128x128xbf16>
    %c0_4 = arith.constant 0 : index
    %c0_5 = arith.constant 0 : index
    %5 = vector.load %arg4[%c0_4, %c0_5] : memref<128x128xbf16, #tpu.memory_space<vmem>>, vector<128x128xbf16>
    %cst = arith.constant dense<0.000000e+00> : vector<128x128xf32>
    %6 = tpu.matmul %4, %5, %cst {dimension_numbers = #tpu.dot_dimension_numbers<[1], [0], [0], [1], [0, 0, 1, 1], [], []>} : vector<128x128xbf16>, vector<128x128xbf16>, vector<128x128xf32> -> vector<128x128xf32>
    %7 = arith.addf %3, %6 : vector<128x128xf32>
    %c0_6 = arith.constant 0 : index
    %c0_7 = arith.constant 0 : index
    %8 = vector.load %arg7[%c0_6, %c0_7] : memref<128x128xf32, #tpu.memory_space<vmem>>, vector<128x128xf32>
    tpu.vector_store %arg7[%c0_6, %c0_7], %7 {strides = array<i32>} : memref<128x128xf32, #tpu.memory_space<vmem>>, vector<128x128xf32>,
    %c0_i32_8 = arith.constant 0 : i32
    %9 = arith.cmpi eq, %arg2, %c0_i32_8 : i32
    %10 = arith.extui %9 : i1 to i32
    %c0_i32_9 = arith.constant 0 : i32
    %11 = arith.cmpi ne, %10, %c0_i32_9 : i32
    scf.if %11 {
      %c0_10 = arith.constant 0 : index
      %c0_11 = arith.constant 0 : index
      %12 = vector.load %arg7[%c0_10, %c0_11] : memref<128x128xf32, #tpu.memory_space<vmem>>, vector<128x128xf32>
      %c0_12 = arith.constant 0 : index
      %c0_13 = arith.constant 0 : index
      %13 = vector.load %arg5[%c0_12, %c0_13] : memref<1x128xf32, #tpu.memory_space<vmem>>, vector<1x128xf32>
      %14 = vector.broadcast %13 : vector<1x128xf32> to vector<128x128xf32>
      %15 = arith.addf %12, %14 : vector<128x128xf32>
      %cst_14 = arith.constant 0.000000e+00 : f32
      %16 = vector.broadcast %cst_14 : f32 to vector<128x128xf32>
      %17 = arith.maximumf %15, %16 : vector<128x128xf32>
      %18 = arith.truncf %17 : vector<128x128xf32> to vector<128x128xbf16>
      %c0_15 = arith.constant 0 : index
      %c0_16 = arith.constant 0 : index
      %19 = vector.load %arg6[%c0_15, %c0_16] : memref<128x128xbf16, #tpu.memory_space<vmem>>, vector<128x128xbf16>
      tpu.vector_store %arg6[%c0_15, %c0_16], %18 {strides = array<i32>} : memref<128x128xbf16, #tpu.memory_space<vmem>>, vector<128x128xbf16>,
    } else {
    }
    return
  }
  func.func @transform_0(%arg0: i32, %arg1: i32, %arg2: i32) -> (i32, i32) {
    %c0_i32 = arith.constant 0 : i32
    return %arg0, %arg2 : i32, i32
  }
  func.func @transform_1(%arg0: i32, %arg1: i32, %arg2: i32) -> (i32, i32) {
    %c0_i32 = arith.constant 0 : i32
    return %arg2, %arg1 : i32, i32
  }
  func.func @transform_2(%arg0: i32, %arg1: i32, %arg2: i32) -> (i32, i32) {
    %c0_i32 = arith.constant 0 : i32
    %c0_i32_0 = arith.constant 0 : i32
    return %c0_i32, %arg1 : i32, i32
  }
  func.func @transform_3(%arg0: i32, %arg1: i32, %arg2: i32) -> (i32, i32) {
    %c0_i32 = arith.constant 0 : i32
    return %arg0, %arg1 : i32, i32
  }
}

module attributes {stable_mosaic.version = 11 : i64} {
  func.func @_mm_bias_act_kernel(%arg0: i32, %arg1: i32, %arg2: i32, %arg3: memref<256x256xbf16, #tpu.memory_space<vmem>>, %arg4: memref<256x128xbf16, #tpu.memory_space<vmem>>, %arg5: memref<1x128xf32, #tpu.memory_space<vmem>>, %arg6: memref<256x128xf32, #tpu.memory_space<vmem>>, %arg7: memref<256x128xf32, #tpu.memory_space<vmem>>) attributes {dimension_semantics = [#tpu.dimension_semantics<parallel>, #tpu.dimension_semantics<parallel>, #tpu.dimension_semantics<arbitrary>], iteration_bounds = array<i64: 2, 1, 1>, scalar_prefetch = 0 : i64, scratch_operands = 1 : i64, tpu.core_type = #tpu.core_type<tc>, window_params = [{transform_indices = @transform_0, window_bounds = array<i64: 256, 256>}, {transform_indices = @transform_1, window_bounds = array<i64: 256, 128>}, {transform_indices = @transform_2, window_bounds = array<i64: 1, 128>}, {transform_indices = @transform_3, window_bounds = array<i64: 256, 128>}]} {
    %c0_i32 = arith.constant 0 : i32
    %0 = arith.cmpi eq, %arg2, %c0_i32 : i32
    %1 = arith.extui %0 : i1 to i32
    %c0_i32_0 = arith.constant 0 : i32
    %2 = arith.cmpi ne, %1, %c0_i32_0 : i32
    scf.if %2 {
      %cst_10 = arith.constant 0.000000e+00 : f32
      %12 = vector.broadcast %cst_10 : f32 to vector<256x128xf32>
      %c0_11 = arith.constant 0 : index
      %c0_12 = arith.constant 0 : index
      %13 = vector.load %arg7[%c0_11, %c0_12] : memref<256x128xf32, #tpu.memory_space<vmem>>, vector<256x128xf32>
      tpu.vector_store %arg7[%c0_11, %c0_12], %12 {strides = array<i32>} : memref<256x128xf32, #tpu.memory_space<vmem>>, vector<256x128xf32>,
    } else {
    }
    %c0 = arith.constant 0 : index
    %c0_1 = arith.constant 0 : index
    %3 = vector.load %arg7[%c0, %c0_1] : memref<256x128xf32, #tpu.memory_space<vmem>>, vector<256x128xf32>
    %c0_2 = arith.constant 0 : index
    %c0_3 = arith.constant 0 : index
    %4 = vector.load %arg3[%c0_2, %c0_3] : memref<256x256xbf16, #tpu.memory_space<vmem>>, vector<256x256xbf16>
    %c0_4 = arith.constant 0 : index
    %c0_5 = arith.constant 0 : index
    %5 = vector.load %arg4[%c0_4, %c0_5] : memref<256x128xbf16, #tpu.memory_space<vmem>>, vector<256x128xbf16>
    %cst = arith.constant dense<0.000000e+00> : vector<256x128xf32>
    %6 = tpu.matmul %4, %5, %cst {dimension_numbers = #tpu.dot_dimension_numbers<[1], [0], [0], [1], [0, 0, 1, 1], [], []>} : vector<256x256xbf16>, vector<256x128xbf16>, vector<256x128xf32> -> vector<256x128xf32>
    %7 = arith.addf %3, %6 : vector<256x128xf32>
    %c0_6 = arith.constant 0 : index
    %c0_7 = arith.constant 0 : index
    %8 = vector.load %arg7[%c0_6, %c0_7] : memref<256x128xf32, #tpu.memory_space<vmem>>, vector<256x128xf32>
    tpu.vector_store %arg7[%c0_6, %c0_7], %7 {strides = array<i32>} : memref<256x128xf32, #tpu.memory_space<vmem>>, vector<256x128xf32>,
    %c0_i32_8 = arith.constant 0 : i32
    %9 = arith.cmpi eq, %arg2, %c0_i32_8 : i32
    %10 = arith.extui %9 : i1 to i32
    %c0_i32_9 = arith.constant 0 : i32
    %11 = arith.cmpi ne, %10, %c0_i32_9 : i32
    scf.if %11 {
      %c0_10 = arith.constant 0 : index
      %c0_11 = arith.constant 0 : index
      %12 = vector.load %arg7[%c0_10, %c0_11] : memref<256x128xf32, #tpu.memory_space<vmem>>, vector<256x128xf32>
      %c0_12 = arith.constant 0 : index
      %c0_13 = arith.constant 0 : index
      %13 = vector.load %arg5[%c0_12, %c0_13] : memref<1x128xf32, #tpu.memory_space<vmem>>, vector<1x128xf32>
      %14 = vector.broadcast %13 : vector<1x128xf32> to vector<256x128xf32>
      %15 = arith.addf %12, %14 : vector<256x128xf32>
      %c0_14 = arith.constant 0 : index
      %c0_15 = arith.constant 0 : index
      %16 = vector.load %arg6[%c0_14, %c0_15] : memref<256x128xf32, #tpu.memory_space<vmem>>, vector<256x128xf32>
      tpu.vector_store %arg6[%c0_14, %c0_15], %15 {strides = array<i32>} : memref<256x128xf32, #tpu.memory_space<vmem>>, vector<256x128xf32>,
    } else {
    }
    return
  }
  func.func @transform_0(%arg0: i32, %arg1: i32, %arg2: i32) -> (i32, i32) {
    %c0_i32 = arith.constant 0 : i32
    return %arg0, %arg2 : i32, i32
  }
  func.func @transform_1(%arg0: i32, %arg1: i32, %arg2: i32) -> (i32, i32) {
    %c0_i32 = arith.constant 0 : i32
    return %arg2, %arg1 : i32, i32
  }
  func.func @transform_2(%arg0: i32, %arg1: i32, %arg2: i32) -> (i32, i32) {
    %c0_i32 = arith.constant 0 : i32
    %c0_i32_0 = arith.constant 0 : i32
    return %c0_i32, %arg1 : i32, i32
  }
  func.func @transform_3(%arg0: i32, %arg1: i32, %arg2: i32) -> (i32, i32) {
    %c0_i32 = arith.constant 0 : i32
    return %arg0, %arg1 : i32, i32
  }
}

</mosaic_0001>

<bundles_post_ra>
// kernel: a_call__.7
= control target key start
LH: loop header
LB: loop body
LE: loop exit
PB: predicated region body
PF: predicated region fallthrough
CT: control target
= control target key end

     0   :  { %s1271_s12 = smov 0   ;;  %s1273_s13 = smov 0   ;;  %s1411_s0 = inlined_call_operand.vmem [shape: bf16[512,128], index: 0, kind: input, shape index: {}]   ;;  %s1412_s1 = inlined_call_operand.vmem [shape: bf16[128,128], index: 1, kind: input, shape index: {}]   ;;  %s1413_s2 = inlined_call_operand.vmem [shape: f32[1,128], index: 2, kind: input, shape index: {}]   ;;  %s1414_s3 = inlined_call_operand.vmem [shape: bf16[512,128], index: 3, kind: output, shape index: {}]  }
   0x1   :  { %s1275_s14 = smov 0  }
   0x2 LB: > { %s32_s15 = sadd.s32 1, %s1245_s13  ;;  %p956_p0 = scmp.ge.s32.totalorder %s1249_s14, 1  ;;  %s1249_s14 = sphi %s1275_s14, %s13_s14   ;;  %s1245_s13 = sphi %s1273_s13, %s1416_s13   ;;  %s1241_s12 = sphi %s1271_s12, %s1415_s12  }
   0x3   : > { %p34_p1 = scmp.ge.s32.totalorder %s32_s15, 2  ;;  %p188_p2 = scmp.lt.s32.totalorder %s1249_s14, 3 }
   0x5   : > { %s1418_s15 = smov (%p34_p1, %s32_s15), 0  ;;  %p189_p3 = pnand %p956_p0, %p188_p2 }
   0x6   : > { %s957_s24 = sshll.u32 (!%p189_p3), %s1241_s12, 5 }
   0x7   : > { %192 = sbr.rel (%p189_p3) target bundleno = 241 (0xf1), region = 32  ;;  %p230_p4 = scmp.lt.s32.totalorder (!%p189_p3), %s957_s24, 63 }
   0xc   : > { %v1082_v0 = vld [vmem:[%s1412_s1 + $0x38] sm:$0xff]  ;;  %v1081_v1 = vld [vmem:[%s1412_s1 + $0x30] sm:$0xff]  ;;  %v1080_v2 = vld [vmem:[%s1412_s1 + $0x28] sm:$0xff]  ;;  %s1420_s24 = smov (!%p230_p4, %s957_s24), 63 }
   0xd   : > { %519 = vmatpush.bf16.msra.mxu0 %v1082_v0  ;;  %1178 = vmatpush.bf16.msra.mxu1 %v1082_v0  ;;  %v1079_v3 = vld [vmem:[%s1412_s1 + $0x20] sm:$0xff]  ;;  %v1078_v4 = vld [vmem:[%s1412_s1 + $0x18] sm:$0xff]  ;;  %v1077_v5 = vld [vmem:[%s1412_s1 + $0x10] sm:$0xff]  ;;  %s958_s4 = sshll.u32 %s1420_s24, 2 }
   0xe   : > { %1179 = vmatpush.bf16.msra.mxu2 %v1082_v0  ;;  %1180 = vmatpush.bf16.msra.mxu3 %v1082_v0  ;;  %v1076_v6 = vld [vmem:[%s1412_s1 + $0x8] sm:$0xff]  ;;  %v1075_v7 = vld [vmem:[%s1412_s1] sm:$0xff]  ;;  %s1324_s9 = scalar_lea.vmem %s1411_s0, %s958_s4  ;;  %s1356_s17 = scalar_lea.vmem %s1414_s3, %s958_s4 }
   0xf   : > { %v1059_v8 = vld [vmem:[%s1324_s9] sm:$0xff]  ;;  %v1060_v12 = vld [vmem:[%s1324_s9 + $0x8] sm:$0xff]  ;;  %v1061_v16 = vld [vmem:[%s1324_s9 + $0x10] sm:$0xff] }
  0x10   : > { %v1063_v9 = vld [vmem:[%s1324_s9 + $0x20] sm:$0xff]  ;;  %v1064_v13 = vld [vmem:[%s1324_s9 + $0x28] sm:$0xff]  ;;  %v1065_v17 = vld [vmem:[%s1324_s9 + $0x30] sm:$0xff] }
  0x11   : > { %520 = vmatpush.bf16.msra.mxu0 %v1081_v1  ;;  %1181 = vmatpush.bf16.msra.mxu1 %v1081_v1  ;;  %v1067_v10 = vld [vmem:[%s1324_s9 + $0x40] sm:$0xff]  ;;  %v1068_v14 = vld [vmem:[%s1324_s9 + $0x48] sm:$0xff]  ;;  %v1069_v18 = vld [vmem:[%s1324_s9 + $0x50] sm:$0xff] }
  0x12   : > { %1182 = vmatpush.bf16.msra.mxu2 %v1081_v1  ;;  %1183 = vmatpush.bf16.msra.mxu3 %v1081_v1  ;;  %v1071_v11 = vld [vmem:[%s1324_s9 + $0x60] sm:$0xff]  ;;  %v1072_v15 = vld [vmem:[%s1324_s9 + $0x68] sm:$0xff]  ;;  %v1073_v19 = vld [vmem:[%s1324_s9 + $0x70] sm:$0xff] }
  0x13   : > { %v1062_v20 = vld [vmem:[%s1324_s9 + $0x18] sm:$0xff]  ;;  %v1345_v26 = vld [vmem:[%s1413_s2] ss:$0 sm:$0xff] }
  0x14   : > { %v1066_v21 = vld [vmem:[%s1324_s9 + $0x38] sm:$0xff] }
  0x15   : > { %521 = vmatpush.bf16.msra.mxu0 %v1080_v2  ;;  %1184 = vmatpush.bf16.msra.mxu1 %v1080_v2  ;;  %v1070_v22 = vld [vmem:[%s1324_s9 + $0x58] sm:$0xff] }
  0x16   : > { %1185 = vmatpush.bf16.msra.mxu2 %v1080_v2  ;;  %1186 = vmatpush.bf16.msra.mxu3 %v1080_v2  ;;  %v1074_v23 = vld [vmem:[%s1324_s9 + $0x78] sm:$0xff] }
  0x19   : > { %522 = vmatpush.bf16.msra.mxu0 %v1079_v3  ;;  %1187 = vmatpush.bf16.msra.mxu1 %v1079_v3 }
  0x1a   : > { %1188 = vmatpush.bf16.msra.mxu2 %v1079_v3  ;;  %1189 = vmatpush.bf16.msra.mxu3 %v1079_v3 }
  0x1d   : > { %523 = vmatpush.bf16.msra.mxu0 %v1078_v4  ;;  %1190 = vmatpush.bf16.msra.mxu1 %v1078_v4 }
  0x1e   : > { %1191 = vmatpush.bf16.msra.mxu2 %v1078_v4  ;;  %1192 = vmatpush.bf16.msra.mxu3 %v1078_v4 }
  0x21   : > { %524 = vmatpush.bf16.msra.mxu0 %v1077_v5  ;;  %1193 = vmatpush.bf16.msra.mxu1 %v1077_v5 }
  0x22   : > { %1194 = vmatpush.bf16.msra.mxu2 %v1077_v5  ;;  %1195 = vmatpush.bf16.msra.mxu3 %v1077_v5 }
  0x25   : > { %525 = vmatpush.bf16.msra.mxu0 %v1076_v6  ;;  %1196 = vmatpush.bf16.msra.mxu1 %v1076_v6 }
  0x26   : > { %1197 = vmatpush.bf16.msra.mxu2 %v1076_v6  ;;  %1198 = vmatpush.bf16.msra.mxu3 %v1076_v6 }
  0x29   : > { %526 = vmatpush.bf16.msra.mxu0 %v1075_v7  ;;  %1199 = vmatpush.bf16.msra.mxu1 %v1075_v7 }
  0x2a   : > { %1200 = vmatpush.bf16.msra.mxu2 %v1075_v7  ;;  %1201 = vmatpush.bf16.msra.mxu3 %v1075_v7 }
  0x2c   : > { %527 = vmatmul.bf16.vlgmr.msra.gmra.mxu0 %v1059_v8  ;;  %547 = vmatmul.bf16.vlgmr.msra.gmra.mxu1 %v1063_v9 }
  0x2d   : > { %567 = vmatmul.bf16.vlgmr.msra.gmra.mxu2 %v1067_v10  ;;  %587 = vmatmul.bf16.vlgmr.msra.gmra.mxu3 %v1071_v11 }
  0x3c   : > { %532 = vmatmul.bf16.gmra.mxu0 %v1060_v12  ;;  %552 = vmatmul.bf16.gmra.mxu1 %v1064_v13 }
  0x3d   : > { %572 = vmatmul.bf16.gmra.mxu2 %v1068_v14  ;;  %592 = vmatmul.bf16.gmra.mxu3 %v1072_v15 }
  0x4c   : > { %537 = vmatmul.bf16.gmra.mxu0 %v1061_v16  ;;  %557 = vmatmul.bf16.gmra.mxu1 %v1065_v17 }
  0x4d   : > { %577 = vmatmul.bf16.gmra.mxu2 %v1069_v18  ;;  %597 = vmatmul.bf16.gmra.mxu3 %v1073_v19 }
  0x5c   : > { %542 = vmatmul.bf16.gmra.mxu0 %v1062_v20  ;;  %562 = vmatmul.bf16.gmra.mxu1 %v1066_v21 }
  0x5d   : > { %582 = vmatmul.bf16.gmra.mxu2 %v1070_v22  ;;  %602 = vmatmul.bf16.gmra.mxu3 %v1074_v23 }
  0xa9   : > { %v528_v24 = vpop.f32.mrf.mxu0  ;;  %v548_v25 = vpop.f32.mrf.mxu1 }
  0xaa   : > { %v711_v27 = vadd.f32 %v1345_v26, %v528_v24  ;;  %v719_v28 = vadd.f32 %v1345_v26, %v548_v25 }
  0xac   : > { %v743_v35 = vmax.f32 %v711_v27, 0.0  ;;  %v751_v36 = vmax.f32 %v719_v28, 0.0 }
  0xb0   : > { %v568_v29 = vpop.f32.mrf.mxu2  ;;  %v588_v30 = vpop.f32.mrf.mxu3 }
  0xb1   : > { %v530_v31 = vpop.f32.mrf.mxu0  ;;  %v550_v32 = vpop.f32.mrf.mxu1  ;;  %v727_v41 = vadd.f32 %v1345_v26, %v568_v29  ;;  %v735_v42 = vadd.f32 %v1345_v26, %v588_v30 }
  0xb2   : > { %v712_v33 = vadd.f32 %v1345_v26, %v530_v31  ;;  %v720_v34 = vadd.f32 %v1345_v26, %v550_v32 }
  0xb3   : > { %v759_v49 = vmax.f32 %v727_v41, 0.0  ;;  %v767_v50 = vmax.f32 %v735_v42, 0.0 }
  0xb4   : > { %v744_v37 = vmax.f32 %v712_v33, 0.0  ;;  %v752_v38 = vmax.f32 %v720_v34, 0.0 }
  0xb6   : > { %v1086_v39 = vpack.c.bf16 %v744_v37, %v743_v35  ;;  %v1106_v40 = vpack.c.bf16 %v752_v38, %v751_v36 }
  0xb8   : > { %1087 = vst [vmem:[%s1356_s17] sm:$0xff] %v1086_v39   ;;  %v570_v43 = vpop.f32.mrf.mxu2  ;;  %v590_v44 = vpop.f32.mrf.mxu3 }
  0xb9   : > { %1166 = vst [vmem:[%s1356_s17 + $0x20] sm:$0xff] %v1106_v40   ;;  %v728_v45 = vadd.f32 %v1345_v26, %v570_v43  ;;  %v736_v46 = vadd.f32 %v1345_v26, %v590_v44  ;;  %v533_v47 = vpop.f32.mrf.mxu0  ;;  %v553_v48 = vpop.f32.mrf.mxu1 }
  0xba   : > { %v713_v55 = vadd.f32 %v1345_v26, %v533_v47  ;;  %v721_v56 = vadd.f32 %v1345_v26, %v553_v48 }
  0xbb   : > { %v760_v51 = vmax.f32 %v728_v45, 0.0  ;;  %v768_v52 = vmax.f32 %v736_v46, 0.0 }
  0xbc   : > { %v745_v63 = vmax.f32 %v713_v55, 0.0  ;;  %v753_v0 = vmax.f32 %v721_v56, 0.0 }
  0xbd   : > { %v1126_v53 = vpack.c.bf16 %v760_v51, %v759_v49  ;;  %v1146_v54 = vpack.c.bf16 %v768_v52, %v767_v50 }
  0xbf   : > { %1170 = vst [vmem:[%s1356_s17 + $0x40] sm:$0xff] %v1126_v53  }
  0xc0   : > { %1174 = vst [vmem:[%s1356_s17 + $0x60] sm:$0xff] %v1146_v54   ;;  %v573_v57 = vpop.f32.mrf.mxu2  ;;  %v593_v58 = vpop.f32.mrf.mxu3 }
  0xc1   : > { %v535_v59 = vpop.f32.mrf.mxu0  ;;  %v555_v60 = vpop.f32.mrf.mxu1  ;;  %v729_v5 = vadd.f32 %v1345_v26, %v573_v57  ;;  %v737_v6 = vadd.f32 %v1345_v26, %v593_v58 }
  0xc2   : > { %v714_v61 = vadd.f32 %v1345_v26, %v535_v59  ;;  %v722_v62 = vadd.f32 %v1345_v26, %v555_v60 }
  0xc3   : > { %v761_v13 = vmax.f32 %v729_v5, 0.0  ;;  %v769_v14 = vmax.f32 %v737_v6, 0.0 }
  0xc4   : > { %v746_v1 = vmax.f32 %v714_v61, 0.0  ;;  %v754_v2 = vmax.f32 %v722_v62, 0.0 }
  0xc6   : > { %v1091_v3 = vpack.c.bf16 %v746_v1, %v745_v63  ;;  %v1111_v4 = vpack.c.bf16 %v754_v2, %v753_v0 }
  0xc8   : > { %1163 = vst [vmem:[%s1356_s17 + $0x8] sm:$0xff] %v1091_v3   ;;  %v575_v7 = vpop.f32.mrf.mxu2  ;;  %v595_v8 = vpop.f32.mrf.mxu3 }
  0xc9   : > { %1167 = vst [vmem:[%s1356_s17 + $0x28] sm:$0xff] %v1111_v4   ;;  %v730_v9 = vadd.f32 %v1345_v26, %v575_v7  ;;  %v738_v10 = vadd.f32 %v1345_v26, %v595_v8  ;;  %v538_v11 = vpop.f32.mrf.mxu0  ;;  %v558_v12 = vpop.f32.mrf.mxu1 }
  0xca   : > { %v715_v19 = vadd.f32 %v1345_v26, %v538_v11  ;;  %v723_v20 = vadd.f32 %v1345_v26, %v558_v12 }
  0xcb   : > { %v762_v15 = vmax.f32 %v730_v9, 0.0  ;;  %v770_v16 = vmax.f32 %v738_v10, 0.0 }
  0xcc   : > { %v747_v28 = vmax.f32 %v715_v19, 0.0  ;;  %v755_v29 = vmax.f32 %v723_v20, 0.0 }
  0xcd   : > { %v1131_v17 = vpack.c.bf16 %v762_v15, %v761_v13  ;;  %v1151_v18 = vpack.c.bf16 %v770_v16, %v769_v14 }
  0xcf   : > { %1171 = vst [vmem:[%s1356_s17 + $0x48] sm:$0xff] %v1131_v17  }
  0xd0   : > { %1175 = vst [vmem:[%s1356_s17 + $0x68] sm:$0xff] %v1151_v18   ;;  %v578_v21 = vpop.f32.mrf.mxu2  ;;  %v598_v22 = vpop.f32.mrf.mxu3 }
  0xd1   : > { %v540_v23 = vpop.f32.mrf.mxu0  ;;  %v560_v24 = vpop.f32.mrf.mxu1  ;;  %v731_v34 = vadd.f32 %v1345_v26, %v578_v21  ;;  %v739_v35 = vadd.f32 %v1345_v26, %v598_v22 }
  0xd2   : > { %v716_v25 = vadd.f32 %v1345_v26, %v540_v23  ;;  %v724_v27 = vadd.f32 %v1345_v26, %v560_v24 }
  0xd3   : > { %v763_v42 = vmax.f32 %v731_v34, 0.0  ;;  %v771_v43 = vmax.f32 %v739_v35, 0.0 }
  0xd4   : > { %v748_v30 = vmax.f32 %v716_v25, 0.0  ;;  %v756_v31 = vmax.f32 %v724_v27, 0.0 }
  0xd6   : > { %v1096_v32 = vpack.c.bf16 %v748_v30, %v747_v28  ;;  %v1116_v33 = vpack.c.bf16 %v756_v31, %v755_v29 }
  0xd8   : > { %1164 = vst [vmem:[%s1356_s17 + $0x10] sm:$0xff] %v1096_v32   ;;  %v580_v36 = vpop.f32.mrf.mxu2  ;;  %v600_v37 = vpop.f32.mrf.mxu3 }
  0xd9   : > { %1168 = vst [vmem:[%s1356_s17 + $0x30] sm:$0xff] %v1116_v33   ;;  %v732_v38 = vadd.f32 %v1345_v26, %v580_v36  ;;  %v740_v39 = vadd.f32 %v1345_v26, %v600_v37  ;;  %v543_v40 = vpop.f32.mrf.mxu0  ;;  %v563_v41 = vpop.f32.mrf.mxu1 }
  0xda   : > { %v717_v48 = vadd.f32 %v1345_v26, %v543_v40  ;;  %v725_v49 = vadd.f32 %v1345_v26, %v563_v41 }
  0xdb   : > { %v764_v44 = vmax.f32 %v732_v38, 0.0  ;;  %v772_v45 = vmax.f32 %v740_v39, 0.0 }
  0xdc   : > { %v749_v56 = vmax.f32 %v717_v48, 0.0  ;;  %v757_v57 = vmax.f32 %v725_v49, 0.0 }
  0xdd   : > { %v1136_v46 = vpack.c.bf16 %v764_v44, %v763_v42  ;;  %v1156_v47 = vpack.c.bf16 %v772_v45, %v771_v43 }
  0xdf   : > { %1172 = vst [vmem:[%s1356_s17 + $0x50] sm:$0xff] %v1136_v46  }
  0xe0   : > { %1176 = vst [vmem:[%s1356_s17 + $0x70] sm:$0xff] %v1156_v47   ;;  %v583_v50 = vpop.f32.mrf.mxu2  ;;  %v603_v51 = vpop.f32.mrf.mxu3 }
  0xe1   : > { %v545_v52 = vpop.f32.mrf.mxu0  ;;  %v565_v53 = vpop.f32.mrf.mxu1  ;;  %v733_v62 = vadd.f32 %v1345_v26, %v583_v50  ;;  %v741_v63 = vadd.f32 %v1345_v26, %v603_v51 }
  0xe2   : > { %v718_v54 = vadd.f32 %v1345_v26, %v545_v52  ;;  %v726_v55 = vadd.f32 %v1345_v26, %v565_v53 }
  0xe3   : > { %v765_v4 = vmax.f32 %v733_v62, 0.0  ;;  %v773_v5 = vmax.f32 %v741_v63, 0.0 }
  0xe4   : > { %v750_v58 = vmax.f32 %v718_v54, 0.0  ;;  %v758_v59 = vmax.f32 %v726_v55, 0.0 }
  0xe6   : > { %v1101_v60 = vpack.c.bf16 %v750_v58, %v749_v56  ;;  %v1121_v61 = vpack.c.bf16 %v758_v59, %v757_v57 }
  0xe8   : > { %1165 = vst [vmem:[%s1356_s17 + $0x18] sm:$0xff] %v1101_v60   ;;  %v585_v0 = vpop.f32.mrf.mxu2  ;;  %v605_v1 = vpop.f32.mrf.mxu3 }
  0xe9   : > { %1169 = vst [vmem:[%s1356_s17 + $0x38] sm:$0xff] %v1121_v61   ;;  %v734_v2 = vadd.f32 %v1345_v26, %v585_v0  ;;  %v742_v3 = vadd.f32 %v1345_v26, %v605_v1 }
  0xeb   : > { %v766_v6 = vmax.f32 %v734_v2, 0.0  ;;  %v774_v7 = vmax.f32 %v742_v3, 0.0 }
  0xed   : > { %v1141_v8 = vpack.c.bf16 %v766_v6, %v765_v4  ;;  %v1161_v9 = vpack.c.bf16 %v774_v7, %v773_v5 }
  0xef   : > { %1173 = vst [vmem:[%s1356_s17 + $0x58] sm:$0xff] %v1141_v8  }
  0xf0   : > { %1177 = vst [vmem:[%s1356_s17 + $0x78] sm:$0xff] %v1161_v9  }
  0xf1 PF: > { %s13_s14 = sadd.s32 1, %s1249_s14   ;;  %s1415_s12 = smov %s1245_s13 }
  0xf2   : > { %p10_p5 = scmp.ge.s32.totalorder %s13_s14, 4   ;;  %s1416_s13 = smov %s1418_s15 }
  0xf4   :  { %12 = sbr.rel (!%p10_p5) target bundleno = 2 (0x2), region = 76 }

// kernel: a_call__.8
= control target key start
LH: loop header
LB: loop body
LE: loop exit
PB: predicated region body
PF: predicated region fallthrough
CT: control target
= control target key end

     0   :  { %s1317_s1 = inlined_call_operand.vmem [shape: bf16[384,128], index: 1, kind: input, shape index: {}]   ;;  %s1318_s0 = inlined_call_operand.vmem [shape: bf16[128,384], index: 0, kind: input, shape index: {}]   ;;  %s1319_s2 = inlined_call_operand.vmem [shape: f32[1,128], index: 2, kind: input, shape index: {}]   ;;  %s1320_s3 = inlined_call_operand.vmem [shape: bf16[128,128], index: 3, kind: output, shape index: {}]  }
   0x1   :  { %v895_v0 = vld [vmem:[%s1317_s1 + $0x38] sm:$0xff]  ;;  %v894_v3 = vld [vmem:[%s1317_s1 + $0x30] sm:$0xff]  ;;  %v893_v6 = vld [vmem:[%s1317_s1 + $0x28] sm:$0xff] }
   0x2   :  { %v1010_v1 = vld [vmem:[%s1317_s1 + $0x78] sm:$0xff]  ;;  %402 = vmatpush.bf16.msra.mxu0 %v895_v0  ;;  %959 = vmatpush.bf16.msra.mxu3 %v895_v0  ;;  %v1025_v4 = vld [vmem:[%s1317_s1 + $0x70] sm:$0xff]  ;;  %v901_v7 = vld [vmem:[%s1317_s1 + $0x68] sm:$0xff] }
   0x3   :  { %v1015_v2 = vld [vmem:[%s1317_s1 + $0xb8] sm:$0xff]  ;;  %451 = vmatpush.bf16.msra.mxu1 %v1010_v1  ;;  %v1030_v5 = vld [vmem:[%s1317_s1 + $0xb0] sm:$0xff]  ;;  %v1043_v8 = vld [vmem:[%s1317_s1 + $0xa8] sm:$0xff] }
   0x4   :  { %500 = vmatpush.bf16.msra.mxu2 %v1015_v2  ;;  %v892_v9 = vld [vmem:[%s1317_s1 + $0x20] sm:$0xff]  ;;  %v891_v12 = vld [vmem:[%s1317_s1 + $0x18] sm:$0xff]  ;;  %v890_v15 = vld [vmem:[%s1317_s1 + $0x10] sm:$0xff] }
   0x5   :  { %v900_v10 = vld [vmem:[%s1317_s1 + $0x60] sm:$0xff]  ;;  %v899_v13 = vld [vmem:[%s1317_s1 + $0x58] sm:$0xff]  ;;  %v898_v16 = vld [vmem:[%s1317_s1 + $0x50] sm:$0xff] }
   0x6   :  { %403 = vmatpush.bf16.msra.mxu0 %v894_v3  ;;  %960 = vmatpush.bf16.msra.mxu3 %v894_v3  ;;  %v1055_v11 = vld [vmem:[%s1317_s1 + $0xa0] sm:$0xff]  ;;  %v1067_v14 = vld [vmem:[%s1317_s1 + $0x98] sm:$0xff]  ;;  %v1079_v17 = vld [vmem:[%s1317_s1 + $0x90] sm:$0xff] }
   0x7   :  { %452 = vmatpush.bf16.msra.mxu1 %v1025_v4  ;;  %v889_v18 = vld [vmem:[%s1317_s1 + $0x8] sm:$0xff]  ;;  %v888_v21 = vld [vmem:[%s1317_s1] sm:$0xff]  ;;  %v746_v26 = vld [vmem:[%s1318_s0 + $0x90] sm:$0xf] }
   0x8   :  { %501 = vmatpush.bf16.msra.mxu2 %v1030_v5  ;;  %v897_v19 = vld [vmem:[%s1317_s1 + $0x48] sm:$0xff]  ;;  %v896_v22 = vld [vmem:[%s1317_s1 + $0x40] sm:$0xff]  ;;  %v883_v27 = vld [vmem:[%s1318_s0 + $0x98] sm:$0xf0] }
   0x9   :  { %v1091_v20 = vld [vmem:[%s1317_s1 + $0x88] sm:$0xff]  ;;  %v1102_v23 = vld [vmem:[%s1317_s1 + $0x80] sm:$0xff]  ;;  %v676_v29 = vld [vmem:[%s1318_s0 + $0xc] sm:$0xf0]  ;;  %v747_v33 = vor.u32 %v883_v27, %v746_v26 }
   0xa   :  { %404 = vmatpush.bf16.msra.mxu0 %v893_v6  ;;  %961 = vmatpush.bf16.msra.mxu3 %v893_v6  ;;  %v674_v24 = vld [vmem:[%s1318_s0] sm:$0xf]  ;;  %v865_v25 = vld [vmem:[%s1318_s0 + $0x8] sm:$0xf0]  ;;  %v864_v28 = vld [vmem:[%s1318_s0 + $0x4] sm:$0xf] }
   0xb   :  { %453 = vmatpush.bf16.msra.mxu1 %v901_v7  ;;  %v682_v30 = vld [vmem:[%s1318_s0 + $0x8] sm:$0xf]  ;;  %v866_v31 = vld [vmem:[%s1318_s0 + $0x10] sm:$0xf0]  ;;  %v675_v32 = vor.u32 %v865_v25, %v674_v24  ;;  %v679_v34 = vor.u32 %v864_v28, %v676_v29  ;;  %v686_v36 = vld [vmem:[%s1318_s0 + $0x18] sm:$0xf] }
   0xc   :  { %502 = vmatpush.bf16.msra.mxu2 %v1043_v8  ;;  %v683_v35 = vor.u32 %v866_v31, %v682_v30  ;;  %v868_v37 = vld [vmem:[%s1318_s0 + $0x20] sm:$0xf0]  ;;  %v758_v38 = vld [vmem:[%s1318_s0 + $0xa8] sm:$0xf]  ;;  %v886_v39 = vld [vmem:[%s1318_s0 + $0xb0] sm:$0xf0] }
   0xd   :  { %v867_v40 = vld [vmem:[%s1318_s0 + $0x1c] sm:$0xf]  ;;  %v688_v41 = vld [vmem:[%s1318_s0 + $0x24] sm:$0xf0]  ;;  %v694_v42 = vld [vmem:[%s1318_s0 + $0x20] sm:$0xf]  ;;  %v687_v44 = vor.u32 %v868_v37, %v686_v36  ;;  %v759_v45 = vor.u32 %v886_v39, %v758_v38 }
   0xe   :  { %405 = vmatpush.bf16.msra.mxu0 %v892_v9  ;;  %962 = vmatpush.bf16.msra.mxu3 %v892_v9  ;;  %v869_v43 = vld [vmem:[%s1318_s0 + $0x28] sm:$0xf0]  ;;  %v691_v46 = vor.u32 %v867_v40, %v688_v41  ;;  %v698_v48 = vld [vmem:[%s1318_s0 + $0x30] sm:$0xf]  ;;  %v871_v49 = vld [vmem:[%s1318_s0 + $0x38] sm:$0xf0] }
   0xf   :  { %454 = vmatpush.bf16.msra.mxu1 %v900_v10  ;;  %v695_v47 = vor.u32 %v869_v43, %v694_v42  ;;  %v870_v50 = vld [vmem:[%s1318_s0 + $0x34] sm:$0xf]  ;;  %v748_v52 = vld [vmem:[%s1318_s0 + $0x9c] sm:$0xf0]  ;;  %v706_v54 = vld [vmem:[%s1318_s0 + $0x38] sm:$0xf]  ;;  %v699_v56 = vor.u32 %v871_v49, %v698_v48 }
  0x10   :  { %503 = vmatpush.bf16.msra.mxu2 %v1055_v11  ;;  %v882_v51 = vld [vmem:[%s1318_s0 + $0x94] sm:$0xf]  ;;  %v700_v53 = vld [vmem:[%s1318_s0 + $0x3c] sm:$0xf0]  ;;  %v872_v55 = vld [vmem:[%s1318_s0 + $0x40] sm:$0xf0] }
  0x11   :  { %v751_v57 = vor.u32 %v882_v51, %v748_v52  ;;  %v703_v58 = vor.u32 %v870_v50, %v700_v53  ;;  %v707_v59 = vor.u32 %v872_v55, %v706_v54  ;;  %v710_v60 = vld [vmem:[%s1318_s0 + $0x48] sm:$0xf]  ;;  %v874_v61 = vld [vmem:[%s1318_s0 + $0x50] sm:$0xf0]  ;;  %v873_v62 = vld [vmem:[%s1318_s0 + $0x4c] sm:$0xf] }
  0x12   :  { %406 = vmatpush.bf16.msra.mxu0 %v891_v12  ;;  %963 = vmatpush.bf16.msra.mxu3 %v891_v12  ;;  %v885_v63 = vld [vmem:[%s1318_s0 + $0xac] sm:$0xf]  ;;  %v760_v0 = vld [vmem:[%s1318_s0 + $0xb4] sm:$0xf0]  ;;  %v875_v3 = vld [vmem:[%s1318_s0 + $0x58] sm:$0xf0] }
  0x13   :  { %455 = vmatpush.bf16.msra.mxu1 %v899_v13  ;;  %v877_v9 = vld [vmem:[%s1318_s0 + $0x68] sm:$0xf0]  ;;  %v884_v12 = vld [vmem:[%s1318_s0 + $0xa0] sm:$0xf0]  ;;  %v887_v24 = vld [vmem:[%s1318_s0 + $0xb8] sm:$0xf0] }
  0x14   :  { %504 = vmatpush.bf16.msra.mxu2 %v1067_v14  ;;  %v736_v25 = vld [vmem:[%s1318_s0 + $0x84] sm:$0xf0]  ;;  %v742_v26 = vld [vmem:[%s1318_s0 + $0x80] sm:$0xf]  ;;  %v881_v27 = vld [vmem:[%s1318_s0 + $0x88] sm:$0xf0] }
  0x15   :  { %v743_v31 = vor.u32 %v881_v27, %v742_v26  ;;  %v1265_v40 = vld [vmem:[%s1319_s2] ss:$0 sm:$0xff] }
  0x16   :  { %407 = vmatpush.bf16.msra.mxu0 %v890_v15  ;;  %964 = vmatpush.bf16.msra.mxu3 %v890_v15  ;;  %v878_v15 = vld [vmem:[%s1318_s0 + $0x70] sm:$0xf0] }
  0x17   :  { %456 = vmatpush.bf16.msra.mxu1 %v898_v16 }
  0x18   :  { %505 = vmatpush.bf16.msra.mxu2 %v1079_v17 }
  0x1a   :  { %408 = vmatpush.bf16.msra.mxu0 %v889_v18  ;;  %965 = vmatpush.bf16.msra.mxu3 %v889_v18 }
  0x1b   :  { %457 = vmatpush.bf16.msra.mxu1 %v897_v19 }
  0x1c   :  { %506 = vmatpush.bf16.msra.mxu2 %v1091_v20 }
  0x1e   :  { %409 = vmatpush.bf16.msra.mxu0 %v888_v21  ;;  %966 = vmatpush.bf16.msra.mxu3 %v888_v21  ;;  %v880_v21 = vld [vmem:[%s1318_s0 + $0x80] sm:$0xf0] }
  0x1f   :  { %458 = vmatpush.bf16.msra.mxu1 %v896_v22 }
  0x20   :  { %507 = vmatpush.bf16.msra.mxu2 %v1102_v23 }
  0x21   :  { %410 = vmatmul.bf16.vlgmr.msra.gmra.mxu0 %v675_v32  ;;  %440 = vmatmul.bf16.vlgmr.msra.gmra.mxu3 %v747_v33 }
  0x22   :  { %967 = vmatpush.bf16.msrb.mxu3 %v1010_v1  ;;  %459 = vmatmul.bf16.vlgmr.msra.gmra.mxu1 %v679_v34  ;;  %v712_v1 = vld [vmem:[%s1318_s0 + $0x54] sm:$0xf0] }
  0x23   :  { %508 = vmatmul.bf16.vlgmr.msra.gmra.mxu2 %v683_v35  ;;  %v715_v6 = vor.u32 %v873_v62, %v712_v1 }
  0x26   :  { %968 = vmatpush.bf16.msrb.mxu3 %v1025_v4  ;;  %v711_v4 = vor.u32 %v874_v61, %v710_v60 }
  0x2a   :  { %969 = vmatpush.bf16.msrb.mxu3 %v901_v7 }
  0x2e   :  { %970 = vmatpush.bf16.msrb.mxu3 %v900_v10  ;;  %v876_v10 = vld [vmem:[%s1318_s0 + $0x64] sm:$0xf] }
  0x31   :  { %415 = vmatmul.bf16.gmra.mxu0 %v687_v44  ;;  %445 = vmatmul.bf16.gmra.mxu3 %v759_v45 }
  0x32   :  { %971 = vmatpush.bf16.msrb.mxu3 %v899_v13  ;;  %464 = vmatmul.bf16.gmra.mxu1 %v691_v46  ;;  %v724_v13 = vld [vmem:[%s1318_s0 + $0x6c] sm:$0xf0] }
  0x33   :  { %513 = vmatmul.bf16.gmra.mxu2 %v695_v47  ;;  %v727_v18 = vor.u32 %v876_v10, %v724_v13 }
  0x36   :  { %972 = vmatpush.bf16.msrb.mxu3 %v898_v16 }
  0x3a   :  { %973 = vmatpush.bf16.msrb.mxu3 %v897_v19 }
  0x3e   :  { %974 = vmatpush.bf16.msrb.mxu3 %v896_v22  ;;  %v879_v22 = vld [vmem:[%s1318_s0 + $0x7c] sm:$0xf] }
  0x3f   :  { %v739_v30 = vor.u32 %v879_v22, %v736_v25 }
  0x41   :  { %420 = vmatmul.bf16.gmra.mxu0 %v699_v56  ;;  %489 = vmatmul.bf16.vlgmr.msrb.gmra.mxu3 %v751_v57 }
  0x42   :  { %975 = vmatpush.bf16.msra.mxu3 %v1015_v2  ;;  %469 = vmatmul.bf16.gmra.mxu1 %v703_v58  ;;  %v718_v2 = vld [vmem:[%s1318_s0 + $0x50] sm:$0xf] }
  0x43   :  { %518 = vmatmul.bf16.gmra.mxu2 %v707_v59  ;;  %v719_v7 = vor.u32 %v875_v3, %v718_v2 }
  0x46   :  { %976 = vmatpush.bf16.msra.mxu3 %v1030_v5  ;;  %v763_v5 = vor.u32 %v885_v63, %v760_v0 }
  0x4a   :  { %977 = vmatpush.bf16.msra.mxu3 %v1043_v8  ;;  %v722_v8 = vld [vmem:[%s1318_s0 + $0x60] sm:$0xf] }
  0x4b   :  { %v723_v16 = vor.u32 %v877_v9, %v722_v8 }
  0x4e   :  { %978 = vmatpush.bf16.msra.mxu3 %v1055_v11  ;;  %v754_v11 = vld [vmem:[%s1318_s0 + $0x98] sm:$0xf] }
  0x51   :  { %425 = vmatmul.bf16.gmra.mxu0 %v711_v4  ;;  %494 = vmatmul.bf16.gmra.mxu3 %v763_v5 }
  0x52   :  { %979 = vmatpush.bf16.msra.mxu3 %v1067_v14  ;;  %474 = vmatmul.bf16.gmra.mxu1 %v715_v6  ;;  %v730_v14 = vld [vmem:[%s1318_s0 + $0x68] sm:$0xf] }
  0x53   :  { %523 = vmatmul.bf16.gmra.mxu2 %v719_v7  ;;  %v731_v19 = vor.u32 %v878_v15, %v730_v14 }
  0x56   :  { %980 = vmatpush.bf16.msra.mxu3 %v1079_v17  ;;  %v755_v17 = vor.u32 %v884_v12, %v754_v11 }
  0x5a   :  { %981 = vmatpush.bf16.msra.mxu3 %v1091_v20  ;;  %v734_v20 = vld [vmem:[%s1318_s0 + $0x78] sm:$0xf] }
  0x5b   :  { %v735_v28 = vor.u32 %v880_v21, %v734_v20 }
  0x5e   :  { %982 = vmatpush.bf16.msra.mxu3 %v1102_v23  ;;  %v766_v23 = vld [vmem:[%s1318_s0 + $0xb0] sm:$0xf] }
  0x5f   :  { %v767_v29 = vor.u32 %v887_v24, %v766_v23 }
  0x61   :  { %430 = vmatmul.bf16.gmra.mxu0 %v723_v16  ;;  %538 = vmatmul.bf16.vlgmr.msra.gmra.mxu3 %v755_v17 }
  0x62   :  { %479 = vmatmul.bf16.gmra.mxu1 %v727_v18 }
  0x63   :  { %528 = vmatmul.bf16.gmra.mxu2 %v731_v19 }
  0x71   :  { %435 = vmatmul.bf16.gmra.mxu0 %v735_v28  ;;  %543 = vmatmul.bf16.gmra.mxu3 %v767_v29 }
  0x72   :  { %484 = vmatmul.bf16.gmra.mxu1 %v739_v30 }
  0x73   :  { %533 = vmatmul.bf16.gmra.mxu2 %v743_v31 }
  0x9e   :  { %v411_v32 = vpop.f32.mrf.mxu0 }
  0x9f   :  { %v460_v33 = vpop.f32.mrf.mxu1 }
  0xa0   :  { %v461_v36 = vadd.f32 %v460_v33, %v411_v32 }
  0xa4   :  { %v1260_v34 = vpop.f32.mrf.mxu3 }
  0xa6   :  { %v509_v35 = vpop.f32.mrf.mxu2  ;;  %v413_v37 = vpop.f32.mrf.mxu0 }
  0xa7   :  { %v462_v38 = vpop.f32.mrf.mxu1  ;;  %v510_v39 = vadd.f32 %v509_v35, %v461_v36 }
  0xa8   :  { %v463_v41 = vadd.f32 %v462_v38, %v413_v37 }
  0xa9   :  { %v604_v44 = vadd.f32 %v1265_v40, %v510_v39 }
  0xab   :  { %v620_v49 = vmax.f32 %v604_v44, 0.0 }
  0xac   :  { %v1267_v42 = vpop.f32.mrf.mxu3 }
  0xae   :  { %v511_v43 = vpop.f32.mrf.mxu2  ;;  %v416_v46 = vpop.f32.mrf.mxu0 }
  0xaf   :  { %v512_v45 = vadd.f32 %v511_v43, %v463_v41  ;;  %v465_v47 = vpop.f32.mrf.mxu1 }
  0xb0   :  { %v466_v54 = vadd.f32 %v465_v47, %v416_v46 }
  0xb1   :  { %v605_v48 = vadd.f32 %v1265_v40, %v512_v45 }
  0xb3   :  { %v621_v50 = vmax.f32 %v605_v48, 0.0 }
  0xb4   :  { %v1271_v52 = vpop.f32.mrf.mxu3 }
  0xb5   :  { %v915_v51 = vpack.c.bf16 %v621_v50, %v620_v49 }
  0xb6   :  { %v514_v53 = vpop.f32.mrf.mxu2  ;;  %v418_v55 = vpop.f32.mrf.mxu0 }
  0xb7   :  { %916 = vst [vmem:[%s1320_s3] sm:$0xff] %v915_v51   ;;  %v467_v56 = vpop.f32.mrf.mxu1  ;;  %v515_v57 = vadd.f32 %v514_v53, %v466_v54 }
  0xb8   :  { %v468_v58 = vadd.f32 %v467_v56, %v418_v55 }
  0xb9   :  { %v606_v61 = vadd.f32 %v1265_v40, %v515_v57 }
  0xbb   :  { %v622_v2 = vmax.f32 %v606_v61, 0.0 }
  0xbc   :  { %v1276_v59 = vpop.f32.mrf.mxu3 }
  0xbe   :  { %v516_v60 = vpop.f32.mrf.mxu2  ;;  %v421_v63 = vpop.f32.mrf.mxu0 }
  0xbf   :  { %v517_v62 = vadd.f32 %v516_v60, %v468_v58  ;;  %v470_v0 = vpop.f32.mrf.mxu1 }
  0xc0   :  { %v471_v7 = vadd.f32 %v470_v0, %v421_v63 }
  0xc1   :  { %v607_v1 = vadd.f32 %v1265_v40, %v517_v62 }
  0xc3   :  { %v623_v3 = vmax.f32 %v607_v1, 0.0 }
  0xc4   :  { %v490_v5 = vpop.f32.mrf.mxu3 }
  0xc5   :  { %v920_v4 = vpack.c.bf16 %v623_v3, %v622_v2  ;;  %v491_v46 = vadd.f32 %v490_v5, %v1260_v34 }
  0xc6   :  { %v519_v6 = vpop.f32.mrf.mxu2  ;;  %v423_v8 = vpop.f32.mrf.mxu0 }
  0xc7   :  { %952 = vst [vmem:[%s1320_s3 + $0x8] sm:$0xff] %v920_v4   ;;  %v472_v9 = vpop.f32.mrf.mxu1  ;;  %v520_v10 = vadd.f32 %v519_v6, %v471_v7 }
  0xc8   :  { %v473_v11 = vadd.f32 %v472_v9, %v423_v8 }
  0xc9   :  { %v608_v14 = vadd.f32 %v1265_v40, %v520_v10 }
  0xcb   :  { %v624_v19 = vmax.f32 %v608_v14, 0.0 }
  0xcc   :  { %v492_v12 = vpop.f32.mrf.mxu3 }
  0xcd   :  { %v493_v50 = vadd.f32 %v492_v12, %v1267_v42 }
  0xce   :  { %v521_v13 = vpop.f32.mrf.mxu2  ;;  %v426_v16 = vpop.f32.mrf.mxu0 }
  0xcf   :  { %v522_v15 = vadd.f32 %v521_v13, %v473_v11  ;;  %v475_v17 = vpop.f32.mrf.mxu1 }
  0xd0   :  { %v476_v24 = vadd.f32 %v475_v17, %v426_v16 }
  0xd1   :  { %v609_v18 = vadd.f32 %v1265_v40, %v522_v15 }
  0xd3   :  { %v625_v20 = vmax.f32 %v609_v18, 0.0 }
  0xd4   :  { %v495_v22 = vpop.f32.mrf.mxu3 }
  0xd5   :  { %v925_v21 = vpack.c.bf16 %v625_v20, %v624_v19  ;;  %v496_v7 = vadd.f32 %v495_v22, %v1271_v52 }
  0xd6   :  { %v524_v23 = vpop.f32.mrf.mxu2  ;;  %v428_v25 = vpop.f32.mrf.mxu0 }
  0xd7   :  { %953 = vst [vmem:[%s1320_s3 + $0x10] sm:$0xff] %v925_v21   ;;  %v477_v26 = vpop.f32.mrf.mxu1  ;;  %v525_v27 = vadd.f32 %v524_v23, %v476_v24 }
  0xd8   :  { %v478_v28 = vadd.f32 %v477_v26, %v428_v25 }
  0xd9   :  { %v610_v31 = vadd.f32 %v1265_v40, %v525_v27 }
  0xdb   :  { %v626_v37 = vmax.f32 %v610_v31, 0.0 }
  0xdc   :  { %v497_v29 = vpop.f32.mrf.mxu3 }
  0xdd   :  { %v498_v12 = vadd.f32 %v497_v29, %v1276_v59 }
  0xde   :  { %v526_v30 = vpop.f32.mrf.mxu2  ;;  %v431_v33 = vpop.f32.mrf.mxu0 }
  0xdf   :  { %v527_v32 = vadd.f32 %v526_v30, %v478_v28  ;;  %v480_v35 = vpop.f32.mrf.mxu1 }
  0xe0   :  { %v481_v44 = vadd.f32 %v480_v35, %v431_v33 }
  0xe1   :  { %v611_v36 = vadd.f32 %v1265_v40, %v527_v32 }
  0xe3   :  { %v627_v38 = vmax.f32 %v611_v36, 0.0 }
  0xe4   :  { %v539_v41 = vpop.f32.mrf.mxu3 }
  0xe5   :  { %v930_v39 = vpack.c.bf16 %v627_v38, %v626_v37  ;;  %v540_v48 = vadd.f32 %v539_v41, %v491_v46 }
  0xe6   :  { %v529_v43 = vpop.f32.mrf.mxu2  ;;  %v433_v45 = vpop.f32.mrf.mxu0 }
  0xe7   :  { %954 = vst [vmem:[%s1320_s3 + $0x18] sm:$0xff] %v930_v39   ;;  %v482_v47 = vpop.f32.mrf.mxu1  ;;  %v530_v49 = vadd.f32 %v529_v43, %v481_v44  ;;  %v616_v54 = vadd.f32 %v1265_v40, %v540_v48 }
  0xe8   :  { %v483_v51 = vadd.f32 %v482_v47, %v433_v45 }
  0xe9   :  { %v612_v57 = vadd.f32 %v1265_v40, %v530_v49  ;;  %v632_v63 = vmax.f32 %v616_v54, 0.0 }
  0xeb   :  { %v628_v1 = vmax.f32 %v612_v57, 0.0 }
  0xec   :  { %v541_v53 = vpop.f32.mrf.mxu3 }
  0xed   :  { %v542_v56 = vadd.f32 %v541_v53, %v493_v50 }
  0xee   :  { %v531_v55 = vpop.f32.mrf.mxu2  ;;  %v436_v61 = vpop.f32.mrf.mxu0 }
  0xef   :  { %v532_v58 = vadd.f32 %v531_v55, %v483_v51  ;;  %v617_v60 = vadd.f32 %v1265_v40, %v542_v56  ;;  %v485_v62 = vpop.f32.mrf.mxu1 }
  0xf0   :  { %v486_v6 = vadd.f32 %v485_v62, %v436_v61 }
  0xf1   :  { %v613_v34 = vadd.f32 %v1265_v40, %v532_v58  ;;  %v633_v0 = vmax.f32 %v617_v60, 0.0 }
  0xf3   :  { %v629_v2 = vmax.f32 %v613_v34, 0.0  ;;  %v945_v42 = vpack.c.bf16 %v633_v0, %v632_v63 }
  0xf4   :  { %v544_v4 = vpop.f32.mrf.mxu3 }
  0xf5   :  { %v935_v3 = vpack.c.bf16 %v629_v2, %v628_v1  ;;  %957 = vst [vmem:[%s1320_s3 + $0x30] sm:$0xff] %v945_v42   ;;  %v545_v8 = vadd.f32 %v544_v4, %v496_v7 }
  0xf6   :  { %v534_v5 = vpop.f32.mrf.mxu2  ;;  %v438_v9 = vpop.f32.mrf.mxu0 }
  0xf7   :  { %955 = vst [vmem:[%s1320_s3 + $0x20] sm:$0xff] %v935_v3   ;;  %v487_v10 = vpop.f32.mrf.mxu1  ;;  %v535_v11 = vadd.f32 %v534_v5, %v486_v6  ;;  %v618_v15 = vadd.f32 %v1265_v40, %v545_v8 }
  0xf8   :  { %v488_v13 = vadd.f32 %v487_v10, %v438_v9 }
  0xf9   :  { %v614_v18 = vadd.f32 %v1265_v40, %v535_v11  ;;  %v634_v52 = vmax.f32 %v618_v15, 0.0 }
  0xfb   :  { %v630_v23 = vmax.f32 %v614_v18, 0.0 }
  0xfc   :  { %v546_v14 = vpop.f32.mrf.mxu3 }
  0xfd   :  { %v547_v17 = vadd.f32 %v546_v14, %v498_v12 }
  0xfe   :  { %v536_v16 = vpop.f32.mrf.mxu2 }
  0xff   :  { %v537_v19 = vadd.f32 %v536_v16, %v488_v13  ;;  %v619_v20 = vadd.f32 %v1265_v40, %v547_v17 }
 0x101   :  { %v615_v21 = vadd.f32 %v1265_v40, %v537_v19  ;;  %v635_v22 = vmax.f32 %v619_v20, 0.0 }
 0x103   :  { %v631_v24 = vmax.f32 %v615_v21, 0.0  ;;  %v950_v25 = vpack.c.bf16 %v635_v22, %v634_v52 }
 0x105   :  { %v940_v26 = vpack.c.bf16 %v631_v24, %v630_v23  ;;  %958 = vst [vmem:[%s1320_s3 + $0x38] sm:$0xff] %v950_v25  }
 0x107   :  { %956 = vst [vmem:[%s1320_s3 + $0x28] sm:$0xff] %v940_v26  }

// kernel: a_call__.10
= control target key start
LH: loop header
LB: loop body
LE: loop exit
PB: predicated region body
PF: predicated region fallthrough
CT: control target
= control target key end

     0   :  { %s5276_s1 = inlined_call_operand.vmem [shape: bf16[128,128], index: 1, kind: input, shape index: {}]   ;;  %s5277_s3 = inlined_call_operand.vmem [shape: bf16[128,4096], index: 3, kind: input, shape index: {}]   ;;  %s5278_s2 = inlined_call_operand.vmem [shape: f32[1,128], index: 2, kind: input, shape index: {}]   ;;  %s5279_s0 = inlined_call_operand.vmem [shape: f32[8,128], index: 0, kind: input, shape index: {}]   ;;  %s5280_s4 = inlined_call_operand.vmem [shape: f32[1,4096], index: 4, kind: input, shape index: {}]   ;;  %s5281_s5 = inlined_call_operand.vmem [shape: f32[8,4096], index: 5, kind: output, shape index: {}]  }
   0x1   :  { %v3260_v0 = vld [vmem:[%s5276_s1 + $0x38] sm:$0xff]  ;;  %v3259_v1 = vld [vmem:[%s5276_s1 + $0x30] sm:$0xff]  ;;  %v3127_v2 = vld [vmem:[%s5277_s3 + $0x700] sm:$0xf] }
   0x2   :  { %90 = vmatpush.bf16.msra.mxu0 %v3260_v0  ;;  %v3501_v3 = vld [vmem:[%s5277_s3 + $0x77c] sm:$0xf0]  ;;  %v3485_v4 = vld [vmem:[%s5277_s3 + $0x704] sm:$0xf]  ;;  %v3135_v7 = vld [vmem:[%s5277_s3 + $0x708] sm:$0xf] }
   0x3   :  { %v3128_v5 = vor.u32 %v3501_v3, %v3127_v2  ;;  %v3129_v6 = vld [vmem:[%s5277_s3 + $0x780] sm:$0xf0]  ;;  %v3502_v8 = vld [vmem:[%s5277_s3 + $0x784] sm:$0xf0]  ;;  %v2999_v12 = vld [vmem:[%s5277_s3 + $0x600] sm:$0xf] }
   0x4   :  { %v3258_v9 = vld [vmem:[%s5276_s1 + $0x28] sm:$0xff]  ;;  %v3132_v10 = vor.u32 %v3485_v4, %v3129_v6  ;;  %v3136_v11 = vor.u32 %v3502_v8, %v3135_v7  ;;  %v3469_v13 = vld [vmem:[%s5277_s3 + $0x67c] sm:$0xf0]  ;;  %v3453_v14 = vld [vmem:[%s5277_s3 + $0x604] sm:$0xf] }
   0x5   :  { %1713 = vmatpush.bf16.msra.mxu1 %v3128_v5  ;;  %v3001_v15 = vld [vmem:[%s5277_s3 + $0x680] sm:$0xf0]  ;;  %v3000_v16 = vor.u32 %v3469_v13, %v2999_v12  ;;  %v3007_v18 = vld [vmem:[%s5277_s3 + $0x608] sm:$0xf]  ;;  %v2871_v21 = vld [vmem:[%s5277_s3 + $0x500] sm:$0xf] }
   0x6   :  { %91 = vmatpush.bf16.msra.mxu0 %v3259_v1  ;;  %1726 = vmatpush.bf16.msra.mxu2 %v3132_v10  ;;  %v3004_v17 = vor.u32 %v3453_v14, %v3001_v15  ;;  %v3470_v19 = vld [vmem:[%s5277_s3 + $0x684] sm:$0xf0]  ;;  %v3437_v22 = vld [vmem:[%s5277_s3 + $0x57c] sm:$0xf0]  ;;  %v3421_v23 = vld [vmem:[%s5277_s3 + $0x504] sm:$0xf] }
   0x7   :  { %1739 = vmatpush.bf16.msra.mxu3 %v3136_v11  ;;  %v3008_v20 = vor.u32 %v3470_v19, %v3007_v18  ;;  %v2873_v24 = vld [vmem:[%s5277_s3 + $0x580] sm:$0xf0]  ;;  %v2879_v25 = vld [vmem:[%s5277_s3 + $0x508] sm:$0xf]  ;;  %v2872_v27 = vor.u32 %v3437_v22, %v2871_v21  ;;  %v2743_v31 = vld [vmem:[%s5277_s3 + $0x400] sm:$0xf] }
   0x8   :  { %v3257_v26 = vld [vmem:[%s5276_s1 + $0x20] sm:$0xff]  ;;  %v3438_v28 = vld [vmem:[%s5277_s3 + $0x584] sm:$0xf0]  ;;  %v2876_v29 = vor.u32 %v3421_v23, %v2873_v24  ;;  %v3256_v37 = vld [vmem:[%s5276_s1 + $0x18] sm:$0xff] }
   0x9   :  { %1714 = vmatpush.bf16.msra.mxu1 %v3000_v16  ;;  %v2880_v30 = vor.u32 %v3438_v28, %v2879_v25  ;;  %v3405_v32 = vld [vmem:[%s5277_s3 + $0x47c] sm:$0xf0]  ;;  %v3389_v33 = vld [vmem:[%s5277_s3 + $0x404] sm:$0xf]  ;;  %v2751_v35 = vld [vmem:[%s5277_s3 + $0x408] sm:$0xf] }
   0xa   :  { %92 = vmatpush.bf16.msra.mxu0 %v3258_v9  ;;  %1727 = vmatpush.bf16.msra.mxu2 %v3004_v17  ;;  %v2745_v34 = vld [vmem:[%s5277_s3 + $0x480] sm:$0xf0]  ;;  %v3406_v36 = vld [vmem:[%s5277_s3 + $0x484] sm:$0xf0]  ;;  %v2744_v38 = vor.u32 %v3405_v32, %v2743_v31  ;;  %v2615_v41 = vld [vmem:[%s5277_s3 + $0x300] sm:$0xf] }
   0xb   :  { %1740 = vmatpush.bf16.msra.mxu3 %v3008_v20  ;;  %v2748_v39 = vor.u32 %v3389_v33, %v2745_v34  ;;  %v2752_v40 = vor.u32 %v3406_v36, %v2751_v35  ;;  %v3373_v42 = vld [vmem:[%s5277_s3 + $0x37c] sm:$0xf0]  ;;  %v3357_v43 = vld [vmem:[%s5277_s3 + $0x304] sm:$0xf]  ;;  %v2623_v45 = vld [vmem:[%s5277_s3 + $0x308] sm:$0xf] }
   0xc   :  { %v2617_v44 = vld [vmem:[%s5277_s3 + $0x380] sm:$0xf0]  ;;  %v3374_v46 = vld [vmem:[%s5277_s3 + $0x384] sm:$0xf0]  ;;  %v3255_v47 = vld [vmem:[%s5276_s1 + $0x10] sm:$0xff]  ;;  %v2616_v48 = vor.u32 %v3373_v42, %v2615_v41 }
   0xd   :  { %1715 = vmatpush.bf16.msra.mxu1 %v2872_v27  ;;  %v2620_v49 = vor.u32 %v3357_v43, %v2617_v44  ;;  %v2624_v50 = vor.u32 %v3374_v46, %v2623_v45  ;;  %v2487_v51 = vld [vmem:[%s5277_s3 + $0x200] sm:$0xf]  ;;  %v3325_v53 = vld [vmem:[%s5277_s3 + $0x204] sm:$0xf]  ;;  %v2495_v55 = vld [vmem:[%s5277_s3 + $0x208] sm:$0xf] }
   0xe   :  { %93 = vmatpush.bf16.msra.mxu0 %v3257_v26  ;;  %1728 = vmatpush.bf16.msra.mxu2 %v2876_v29  ;;  %v3341_v52 = vld [vmem:[%s5277_s3 + $0x27c] sm:$0xf0]  ;;  %v2489_v54 = vld [vmem:[%s5277_s3 + $0x280] sm:$0xf0]  ;;  %v3342_v56 = vld [vmem:[%s5277_s3 + $0x284] sm:$0xf0] }
   0xf   :  { %1741 = vmatpush.bf16.msra.mxu3 %v2880_v30  ;;  %v3254_v57 = vld [vmem:[%s5276_s1 + $0x8] sm:$0xff]  ;;  %v2488_v58 = vor.u32 %v3341_v52, %v2487_v51  ;;  %v2492_v60 = vor.u32 %v3325_v53, %v2489_v54  ;;  %v2496_v61 = vor.u32 %v3342_v56, %v2495_v55  ;;  %v2359_v62 = vld [vmem:[%s5277_s3 + $0x100] sm:$0xf]  ;;  %v3293_v1 = vld [vmem:[%s5277_s3 + $0x104] sm:$0xf] }
  0x10   :  { %v3486_v59 = vld [vmem:[%s5277_s3 + $0x70c] sm:$0xf]  ;;  %v3309_v63 = vld [vmem:[%s5277_s3 + $0x17c] sm:$0xf0]  ;;  %v2361_v2 = vld [vmem:[%s5277_s3 + $0x180] sm:$0xf0] }
  0x11   :  { %1716 = vmatpush.bf16.msra.mxu1 %v2744_v38  ;;  %v3137_v0 = vld [vmem:[%s5277_s3 + $0x788] sm:$0xf0]  ;;  %v3253_v3 = vld [vmem:[%s5276_s1] sm:$0xff]  ;;  %v2367_v4 = vld [vmem:[%s5277_s3 + $0x108] sm:$0xf]  ;;  %v2360_v9 = vor.u32 %v3309_v63, %v2359_v62  ;;  %v2364_v11 = vor.u32 %v3293_v1, %v2361_v2 }
  0x12   :  { %94 = vmatpush.bf16.msra.mxu0 %v3256_v37  ;;  %1729 = vmatpush.bf16.msra.mxu2 %v2748_v39  ;;  %v3310_v5 = vld [vmem:[%s5277_s3 + $0x184] sm:$0xf0]  ;;  %v20_v6 = vld [vmem:[%s5279_s0] sm:$0xff]  ;;  %v3454_v7 = vld [vmem:[%s5277_s3 + $0x60c] sm:$0xf]  ;;  %v3140_v10 = vor.u32 %v3486_v59, %v3137_v0 }
  0x13   :  { %1742 = vmatpush.bf16.msra.mxu3 %v2752_v40  ;;  %v3009_v8 = vld [vmem:[%s5277_s3 + $0x688] sm:$0xf0]  ;;  %v2231_v12 = vld [vmem:[%s5277_s3] sm:$0xf]  ;;  %v3261_v14 = vld [vmem:[%s5277_s3 + $0x4] sm:$0xf]  ;;  %v2368_v15 = vor.u32 %v3310_v5, %v2367_v4  ;;  %v38_v19 = vpack.c.bf16 %v20_v6, %v20_v6 }
  0x14   :  { %v3277_v13 = vld [vmem:[%s5277_s3 + $0x7c] sm:$0xf0]  ;;  %v2233_v16 = vld [vmem:[%s5277_s3 + $0x80] sm:$0xf0]  ;;  %v2239_v17 = vld [vmem:[%s5277_s3 + $0x8] sm:$0xf]  ;;  %v3012_v27 = vor.u32 %v3454_v7, %v3009_v8 }
  0x15   :  { %1717 = vmatpush.bf16.msra.mxu1 %v2616_v48  ;;  %v3278_v18 = vld [vmem:[%s5277_s3 + $0x84] sm:$0xf0]  ;;  %v3143_v20 = vld [vmem:[%s5277_s3 + $0x710] sm:$0xf]  ;;  %v3487_v22 = vld [vmem:[%s5277_s3 + $0x714] sm:$0xf]  ;;  %v2232_v23 = vor.u32 %v3277_v13, %v2231_v12  ;;  %v2236_v28 = vor.u32 %v3261_v14, %v2233_v16 }
  0x16   :  { %95 = vmatpush.bf16.msra.mxu0 %v3255_v47  ;;  %1730 = vmatpush.bf16.msra.mxu2 %v2620_v49  ;;  %v3503_v21 = vld [vmem:[%s5277_s3 + $0x78c] sm:$0xf0]  ;;  %v3145_v24 = vld [vmem:[%s5277_s3 + $0x790] sm:$0xf0]  ;;  %v3151_v25 = vld [vmem:[%s5277_s3 + $0x718] sm:$0xf]  ;;  %v2240_v31 = vor.u32 %v3278_v18, %v2239_v17 }
  0x17   :  { %1743 = vmatpush.bf16.msra.mxu3 %v2624_v50  ;;  %v3504_v26 = vld [vmem:[%s5277_s3 + $0x794] sm:$0xf0]  ;;  %v3422_v29 = vld [vmem:[%s5277_s3 + $0x50c] sm:$0xf]  ;;  %v3144_v32 = vor.u32 %v3503_v21, %v3143_v20  ;;  %v3148_v33 = vor.u32 %v3487_v22, %v3145_v24  ;;  %v3015_v35 = vld [vmem:[%s5277_s3 + $0x610] sm:$0xf] }
  0x18   :  { %v2881_v30 = vld [vmem:[%s5277_s3 + $0x588] sm:$0xf0]  ;;  %v3152_v34 = vor.u32 %v3504_v26, %v3151_v25  ;;  %v3471_v36 = vld [vmem:[%s5277_s3 + $0x68c] sm:$0xf0]  ;;  %v3455_v37 = vld [vmem:[%s5277_s3 + $0x614] sm:$0xf] }
  0x19   :  { %1718 = vmatpush.bf16.msra.mxu1 %v2488_v58  ;;  %v3017_v38 = vld [vmem:[%s5277_s3 + $0x690] sm:$0xf0]  ;;  %v3023_v39 = vld [vmem:[%s5277_s3 + $0x618] sm:$0xf]  ;;  %v2884_v41 = vor.u32 %v3422_v29, %v2881_v30  ;;  %v3390_v42 = vld [vmem:[%s5277_s3 + $0x40c] sm:$0xf]  ;;  %v3016_v44 = vor.u32 %v3471_v36, %v3015_v35 }
  0x1a   :  { %96 = vmatpush.bf16.msra.mxu0 %v3254_v57  ;;  %1731 = vmatpush.bf16.msra.mxu2 %v2492_v60  ;;  %v3472_v40 = vld [vmem:[%s5277_s3 + $0x694] sm:$0xf0]  ;;  %v2753_v43 = vld [vmem:[%s5277_s3 + $0x488] sm:$0xf0]  ;;  %v3020_v45 = vor.u32 %v3455_v37, %v3017_v38  ;;  %v2887_v47 = vld [vmem:[%s5277_s3 + $0x510] sm:$0xf] }
  0x1b   :  { %1744 = vmatpush.bf16.msra.mxu3 %v2496_v61  ;;  %v3024_v46 = vor.u32 %v3472_v40, %v3023_v39  ;;  %v3439_v48 = vld [vmem:[%s5277_s3 + $0x58c] sm:$0xf0]  ;;  %v3423_v49 = vld [vmem:[%s5277_s3 + $0x514] sm:$0xf]  ;;  %v2895_v51 = vld [vmem:[%s5277_s3 + $0x518] sm:$0xf]  ;;  %v2756_v53 = vor.u32 %v3390_v42, %v2753_v43 }
  0x1c   :  { %v2889_v50 = vld [vmem:[%s5277_s3 + $0x590] sm:$0xf0]  ;;  %v3440_v52 = vld [vmem:[%s5277_s3 + $0x594] sm:$0xf0]  ;;  %v3358_v54 = vld [vmem:[%s5277_s3 + $0x30c] sm:$0xf]  ;;  %v2888_v56 = vor.u32 %v3439_v48, %v2887_v47 }
  0x1d   :  { %1719 = vmatpush.bf16.msra.mxu1 %v2360_v9  ;;  %v2625_v55 = vld [vmem:[%s5277_s3 + $0x388] sm:$0xf0]  ;;  %v2892_v57 = vor.u32 %v3423_v49, %v2889_v50  ;;  %v2896_v58 = vor.u32 %v3440_v52, %v2895_v51  ;;  %v2759_v59 = vld [vmem:[%s5277_s3 + $0x410] sm:$0xf]  ;;  %v3391_v61 = vld [vmem:[%s5277_s3 + $0x414] sm:$0xf] }
  0x1e   :  { %97 = vmatpush.bf16.msra.mxu0 %v3253_v3  ;;  %1732 = vmatpush.bf16.msra.mxu2 %v2364_v11  ;;  %v3407_v60 = vld [vmem:[%s5277_s3 + $0x48c] sm:$0xf0]  ;;  %v2761_v62 = vld [vmem:[%s5277_s3 + $0x490] sm:$0xf0]  ;;  %v2767_v63 = vld [vmem:[%s5277_s3 + $0x418] sm:$0xf]  ;;  %v2628_v1 = vor.u32 %v3358_v54, %v2625_v55 }
  0x1f   :  { %1745 = vmatpush.bf16.msra.mxu3 %v2368_v15  ;;  %v3408_v0 = vld [vmem:[%s5277_s3 + $0x494] sm:$0xf0]  ;;  %v3326_v2 = vld [vmem:[%s5277_s3 + $0x20c] sm:$0xf]  ;;  %v2760_v4 = vor.u32 %v3407_v60, %v2759_v59  ;;  %v2764_v5 = vor.u32 %v3391_v61, %v2761_v62  ;;  %v2631_v7 = vld [vmem:[%s5277_s3 + $0x310] sm:$0xf] }
  0x20   :  { %v2497_v3 = vld [vmem:[%s5277_s3 + $0x288] sm:$0xf0]  ;;  %v2768_v6 = vor.u32 %v3408_v0, %v2767_v63  ;;  %v3375_v8 = vld [vmem:[%s5277_s3 + $0x38c] sm:$0xf0]  ;;  %v3359_v9 = vld [vmem:[%s5277_s3 + $0x314] sm:$0xf] }
  0x21   :  { %98 = vmatmul.bf16.vlgmr.msra.gmra.mxu0 %v38_v19  ;;  %1720 = vmatpush.bf16.msra.mxu1 %v2232_v23  ;;  %v2639_v11 = vld [vmem:[%s5277_s3 + $0x318] sm:$0xf]  ;;  %v2500_v13 = vor.u32 %v3326_v2, %v2497_v3  ;;  %v3294_v14 = vld [vmem:[%s5277_s3 + $0x10c] sm:$0xf]  ;;  %v2632_v16 = vor.u32 %v3375_v8, %v2631_v7  ;;  %v2503_v19 = vld [vmem:[%s5277_s3 + $0x210] sm:$0xf] }
  0x22   :  { %1752 = vmatpush.bf16.msrb.mxu0 %v3140_v10  ;;  %1733 = vmatpush.bf16.msra.mxu2 %v2236_v28  ;;  %v2633_v10 = vld [vmem:[%s5277_s3 + $0x390] sm:$0xf0]  ;;  %v3376_v12 = vld [vmem:[%s5277_s3 + $0x394] sm:$0xf0]  ;;  %v2369_v15 = vld [vmem:[%s5277_s3 + $0x188] sm:$0xf0] }
  0x23   :  { %1746 = vmatpush.bf16.msra.mxu3 %v2240_v31  ;;  %v2636_v17 = vor.u32 %v3359_v9, %v2633_v10  ;;  %v2640_v18 = vor.u32 %v3376_v12, %v2639_v11  ;;  %v3343_v20 = vld [vmem:[%s5277_s3 + $0x28c] sm:$0xf0]  ;;  %v3327_v21 = vld [vmem:[%s5277_s3 + $0x214] sm:$0xf]  ;;  %v2511_v23 = vld [vmem:[%s5277_s3 + $0x218] sm:$0xf]  ;;  %v2372_v25 = vor.u32 %v3294_v14, %v2369_v15 }
  0x24   :  { %v2505_v22 = vld [vmem:[%s5277_s3 + $0x290] sm:$0xf0]  ;;  %v3344_v24 = vld [vmem:[%s5277_s3 + $0x294] sm:$0xf0]  ;;  %v3262_v26 = vld [vmem:[%s5277_s3 + $0xc] sm:$0xf]  ;;  %v2504_v28 = vor.u32 %v3343_v20, %v2503_v19 }
  0x25   :  { %1765 = vmatpush.bf16.msrb.mxu1 %v3144_v32  ;;  %v3488_v29 = vld [vmem:[%s5277_s3 + $0x71c] sm:$0xf]  ;;  %v2508_v31 = vor.u32 %v3327_v21, %v2505_v22  ;;  %v2512_v32 = vor.u32 %v3344_v24, %v2511_v23  ;;  %v2375_v50 = vld [vmem:[%s5277_s3 + $0x110] sm:$0xf]  ;;  %v3295_v52 = vld [vmem:[%s5277_s3 + $0x114] sm:$0xf] }
  0x26   :  { %1753 = vmatpush.bf16.msrb.mxu0 %v3012_v27  ;;  %1778 = vmatpush.bf16.msrb.mxu2 %v3148_v33  ;;  %v2241_v27 = vld [vmem:[%s5277_s3 + $0x88] sm:$0xf0]  ;;  %v3153_v30 = vld [vmem:[%s5277_s3 + $0x798] sm:$0xf0]  ;;  %v3311_v51 = vld [vmem:[%s5277_s3 + $0x18c] sm:$0xf0] }
  0x27   :  { %1791 = vmatpush.bf16.msrb.mxu3 %v3152_v34  ;;  %v2244_v33 = vor.u32 %v3262_v26, %v2241_v27  ;;  %v3156_v34 = vor.u32 %v3488_v29, %v3153_v30  ;;  %v3456_v35 = vld [vmem:[%s5277_s3 + $0x61c] sm:$0xf]  ;;  %v2377_v54 = vld [vmem:[%s5277_s3 + $0x190] sm:$0xf0]  ;;  %v2383_v55 = vld [vmem:[%s5277_s3 + $0x118] sm:$0xf] }
  0x28   :  { %v3025_v36 = vld [vmem:[%s5277_s3 + $0x698] sm:$0xf0]  ;;  %v2247_v62 = vld [vmem:[%s5277_s3 + $0x10] sm:$0xf]  ;;  %v3263_v0 = vld [vmem:[%s5277_s3 + $0x14] sm:$0xf] }
  0x29   :  { %1766 = vmatpush.bf16.msrb.mxu1 %v3016_v44  ;;  %v3028_v37 = vor.u32 %v3456_v35, %v3025_v36  ;;  %v3424_v38 = vld [vmem:[%s5277_s3 + $0x51c] sm:$0xf]  ;;  %v3279_v63 = vld [vmem:[%s5277_s3 + $0x8c] sm:$0xf0]  ;;  %v2249_v2 = vld [vmem:[%s5277_s3 + $0x90] sm:$0xf0] }
  0x2a   :  { %1754 = vmatpush.bf16.msrb.mxu0 %v2884_v41  ;;  %1779 = vmatpush.bf16.msrb.mxu2 %v3020_v45  ;;  %v2897_v39 = vld [vmem:[%s5277_s3 + $0x598] sm:$0xf0]  ;;  %v2255_v3 = vld [vmem:[%s5277_s3 + $0x18] sm:$0xf]  ;;  %v3517_v10 = vld [vmem:[%s5278_s2] ss:$0 sm:$0xff] }
  0x2b   :  { %1792 = vmatpush.bf16.msrb.mxu3 %v3024_v46  ;;  %v2900_v40 = vor.u32 %v3424_v38, %v2897_v39  ;;  %v3392_v41 = vld [vmem:[%s5277_s3 + $0x41c] sm:$0xf]  ;;  %v3505_v14 = vld [vmem:[%s5277_s3 + $0x79c] sm:$0xf0]  ;;  %v3489_v15 = vld [vmem:[%s5277_s3 + $0x724] sm:$0xf] }
  0x2c   :  { %v2769_v42 = vld [vmem:[%s5277_s3 + $0x498] sm:$0xf0]  ;;  %v3490_v20 = vld [vmem:[%s5277_s3 + $0x72c] sm:$0xf]  ;;  %v3473_v26 = vld [vmem:[%s5277_s3 + $0x69c] sm:$0xf0] }
  0x2d   :  { %1767 = vmatpush.bf16.msrb.mxu1 %v2888_v56  ;;  %v2772_v43 = vor.u32 %v3392_v41, %v2769_v42  ;;  %v3360_v44 = vld [vmem:[%s5277_s3 + $0x31c] sm:$0xf]  ;;  %v3312_v56 = vld [vmem:[%s5277_s3 + $0x194] sm:$0xf0]  ;;  %v3169_v21 = vld [vmem:[%s5277_s3 + $0x7a8] sm:$0xf0] }
  0x2e   :  { %1755 = vmatpush.bf16.msrb.mxu0 %v2756_v53  ;;  %1780 = vmatpush.bf16.msrb.mxu2 %v2892_v57  ;;  %v2641_v45 = vld [vmem:[%s5277_s3 + $0x398] sm:$0xf0]  ;;  %v2376_v53 = vor.u32 %v3311_v51, %v2375_v50  ;;  %v2380_v57 = vor.u32 %v3295_v52, %v2377_v54  ;;  %v3457_v29 = vld [vmem:[%s5277_s3 + $0x624] sm:$0xf]  ;;  %v2903_v38 = vld [vmem:[%s5277_s3 + $0x520] sm:$0xf] }
  0x2f   :  { %1793 = vmatpush.bf16.msrb.mxu3 %v2896_v58  ;;  %v2644_v46 = vor.u32 %v3360_v44, %v2641_v45  ;;  %v3328_v47 = vld [vmem:[%s5277_s3 + $0x21c] sm:$0xf]  ;;  %v2384_v58 = vor.u32 %v3312_v56, %v2383_v55  ;;  %v3033_v30 = vld [vmem:[%s5277_s3 + $0x6a0] sm:$0xf0]  ;;  %v3441_v39 = vld [vmem:[%s5277_s3 + $0x59c] sm:$0xf0] }
  0x30   :  { %v2513_v48 = vld [vmem:[%s5277_s3 + $0x298] sm:$0xf0]  ;;  %v3425_v42 = vld [vmem:[%s5277_s3 + $0x524] sm:$0xf]  ;;  %v2911_v44 = vld [vmem:[%s5277_s3 + $0x528] sm:$0xf] }
  0x31   :  { %1768 = vmatpush.bf16.msrb.mxu1 %v2760_v4  ;;  %v2516_v49 = vor.u32 %v3328_v47, %v2513_v48  ;;  %v3296_v59 = vld [vmem:[%s5277_s3 + $0x11c] sm:$0xf]  ;;  %v3280_v4 = vld [vmem:[%s5277_s3 + $0x94] sm:$0xf0]  ;;  %v3442_v45 = vld [vmem:[%s5277_s3 + $0x5a4] sm:$0xf0]  ;;  %v2904_v48 = vor.u32 %v3441_v39, %v2903_v38 }
  0x32   :  { %1756 = vmatpush.bf16.msrb.mxu0 %v2628_v1  ;;  %1781 = vmatpush.bf16.msrb.mxu2 %v2764_v5  ;;  %v2385_v60 = vld [vmem:[%s5277_s3 + $0x198] sm:$0xf0]  ;;  %v2248_v1 = vor.u32 %v3279_v63, %v2247_v62  ;;  %v2252_v5 = vor.u32 %v3263_v0, %v2249_v2  ;;  %v2913_v47 = vld [vmem:[%s5277_s3 + $0x5a8] sm:$0xf0]  ;;  %v2775_v50 = vld [vmem:[%s5277_s3 + $0x420] sm:$0xf]  ;;  %v2912_v52 = vor.u32 %v3442_v45, %v2911_v44 }
  0x33   :  { %1794 = vmatpush.bf16.msrb.mxu3 %v2768_v6  ;;  %v2388_v61 = vor.u32 %v3296_v59, %v2385_v60  ;;  %v2256_v6 = vor.u32 %v3280_v4, %v2255_v3  ;;  %v3264_v7 = vld [vmem:[%s5277_s3 + $0x1c] sm:$0xf]  ;;  %v3409_v51 = vld [vmem:[%s5277_s3 + $0x49c] sm:$0xf0]  ;;  %v3393_v54 = vld [vmem:[%s5277_s3 + $0x424] sm:$0xf] }
  0x34   :  { %v2257_v8 = vld [vmem:[%s5277_s3 + $0x98] sm:$0xf0]  ;;  %v2777_v55 = vld [vmem:[%s5277_s3 + $0x4a0] sm:$0xf0]  ;;  %v2783_v56 = vld [vmem:[%s5277_s3 + $0x428] sm:$0xf]  ;;  %v2776_v60 = vor.u32 %v3409_v51, %v2775_v50 }
  0x35   :  { %1769 = vmatpush.bf16.msrb.mxu1 %v2632_v16  ;;  %v2260_v9 = vor.u32 %v3264_v7, %v2257_v8  ;;  %v3161_v16 = vld [vmem:[%s5277_s3 + $0x7a0] sm:$0xf0]  ;;  %v2785_v59 = vld [vmem:[%s5277_s3 + $0x4a8] sm:$0xf0]  ;;  %v2647_v62 = vld [vmem:[%s5277_s3 + $0x320] sm:$0xf] }
  0x36   :  { %1757 = vmatpush.bf16.msrb.mxu0 %v2500_v13  ;;  %1782 = vmatpush.bf16.msrb.mxu2 %v2636_v17  ;;  %v3159_v13 = vld [vmem:[%s5277_s3 + $0x720] sm:$0xf]  ;;  %v3167_v17 = vld [vmem:[%s5277_s3 + $0x728] sm:$0xf]  ;;  %v3164_v24 = vor.u32 %v3489_v15, %v3161_v16  ;;  %v3361_v2 = vld [vmem:[%s5277_s3 + $0x324] sm:$0xf] }
  0x37   :  { %1795 = vmatpush.bf16.msrb.mxu3 %v2640_v18  ;;  %v3506_v18 = vld [vmem:[%s5277_s3 + $0x7a4] sm:$0xf0]  ;;  %v3160_v23 = vor.u32 %v3505_v14, %v3159_v13  ;;  %v3377_v63 = vld [vmem:[%s5277_s3 + $0x39c] sm:$0xf0]  ;;  %v2649_v3 = vld [vmem:[%s5277_s3 + $0x3a0] sm:$0xf0] }
  0x38   :  { %v3168_v27 = vor.u32 %v3506_v18, %v3167_v17  ;;  %v2655_v4 = vld [vmem:[%s5277_s3 + $0x328] sm:$0xf]  ;;  %v2657_v7 = vld [vmem:[%s5277_s3 + $0x3a8] sm:$0xf0]  ;;  %v2648_v8 = vor.u32 %v3377_v63, %v2647_v62  ;;  %v3329_v14 = vld [vmem:[%s5277_s3 + $0x224] sm:$0xf] }
  0x39   :  { %1770 = vmatpush.bf16.msrb.mxu1 %v2504_v28  ;;  %v3172_v28 = vor.u32 %v3490_v20, %v3169_v21  ;;  %v2521_v15 = vld [vmem:[%s5277_s3 + $0x2a0] sm:$0xf0]  ;;  %v2527_v16 = vld [vmem:[%s5277_s3 + $0x228] sm:$0xf]  ;;  %v3330_v18 = vld [vmem:[%s5277_s3 + $0x22c] sm:$0xf] }
  0x3a   :  { %1758 = vmatpush.bf16.msrb.mxu0 %v2372_v25  ;;  %1783 = vmatpush.bf16.msrb.mxu2 %v2508_v31  ;;  %v3031_v25 = vld [vmem:[%s5277_s3 + $0x620] sm:$0xf]  ;;  %v3039_v31 = vld [vmem:[%s5277_s3 + $0x628] sm:$0xf]  ;;  %v2524_v21 = vor.u32 %v3329_v14, %v2521_v15  ;;  %v2265_v38 = vld [vmem:[%s5277_s3 + $0xa0] sm:$0xf0] }
  0x3b   :  { %1796 = vmatpush.bf16.msrb.mxu3 %v2512_v32  ;;  %v3474_v32 = vld [vmem:[%s5277_s3 + $0x6a4] sm:$0xf0]  ;;  %v3032_v36 = vor.u32 %v3473_v26, %v3031_v25  ;;  %v2273_v44 = vld [vmem:[%s5277_s3 + $0xa8] sm:$0xf0]  ;;  %v3175_v45 = vld [vmem:[%s5277_s3 + $0x730] sm:$0xf] }
  0x3c   :  { %v3346_v17 = vld [vmem:[%s5277_s3 + $0x2a4] sm:$0xf0]  ;;  %v3459_v63 = vld [vmem:[%s5277_s3 + $0x634] sm:$0xf]  ;;  %v3444_v14 = vld [vmem:[%s5277_s3 + $0x5b4] sm:$0xf0] }
  0x3d   :  { %1771 = vmatpush.bf16.msrb.mxu1 %v2376_v53  ;;  %v2528_v25 = vor.u32 %v3346_v17, %v2527_v16  ;;  %v3428_v15 = vld [vmem:[%s5277_s3 + $0x53c] sm:$0xf] }
  0x3e   :  { %1759 = vmatpush.bf16.msrb.mxu0 %v2244_v33  ;;  %1784 = vmatpush.bf16.msrb.mxu2 %v2380_v57  ;;  %v3458_v33 = vld [vmem:[%s5277_s3 + $0x62c] sm:$0xf]  ;;  %v3410_v57 = vld [vmem:[%s5277_s3 + $0x4a4] sm:$0xf0]  ;;  %v2929_v16 = vld [vmem:[%s5277_s3 + $0x5b8] sm:$0xf0] }
  0x3f   :  { %1797 = vmatpush.bf16.msrb.mxu3 %v2384_v58  ;;  %v3394_v58 = vld [vmem:[%s5277_s3 + $0x42c] sm:$0xf]  ;;  %v2784_v0 = vor.u32 %v3410_v57, %v2783_v56 }
  0x41   :  { %1772 = vmatpush.bf16.msrb.mxu1 %v2248_v1  ;;  %v2788_v1 = vor.u32 %v3394_v58, %v2785_v59  ;;  %v3047_v59 = vld [vmem:[%s5277_s3 + $0x630] sm:$0xf] }
  0x42   :  { %1804 = vmatpush.bf16.msra.mxu0 %v3156_v34  ;;  %1785 = vmatpush.bf16.msrb.mxu2 %v2252_v5  ;;  %v3041_v34 = vld [vmem:[%s5277_s3 + $0x6a8] sm:$0xf0]  ;;  %v3378_v5 = vld [vmem:[%s5277_s3 + $0x3a4] sm:$0xf0] }
  0x43   :  { %1798 = vmatpush.bf16.msrb.mxu3 %v2256_v6  ;;  %v3044_v41 = vor.u32 %v3458_v33, %v3041_v34  ;;  %v3362_v6 = vld [vmem:[%s5277_s3 + $0x32c] sm:$0xf]  ;;  %v2263_v33 = vld [vmem:[%s5277_s3 + $0x20] sm:$0xf] }
  0x44   :  { %v2660_v13 = vor.u32 %v3362_v6, %v2657_v7  ;;  %v2919_v7 = vld [vmem:[%s5277_s3 + $0x530] sm:$0xf] }
  0x46   :  { %1805 = vmatpush.bf16.msra.mxu0 %v3028_v37  ;;  %v3036_v37 = vor.u32 %v3457_v29, %v3033_v30  ;;  %v2399_v29 = vld [vmem:[%s5277_s3 + $0x128] sm:$0xf] }
  0x47   :  { %v3314_v30 = vld [vmem:[%s5277_s3 + $0x1a4] sm:$0xf0] }
  0x48   :  { %v2400_v39 = vor.u32 %v3314_v30, %v2399_v29  ;;  %v2801_v29 = vld [vmem:[%s5277_s3 + $0x4b8] sm:$0xf0] }
  0x4a   :  { %1806 = vmatpush.bf16.msra.mxu0 %v2900_v40  ;;  %v3040_v40 = vor.u32 %v3474_v32, %v3039_v31  ;;  %v3298_v31 = vld [vmem:[%s5277_s3 + $0x12c] sm:$0xf] }
  0x4b   :  { %v2401_v32 = vld [vmem:[%s5277_s3 + $0x1a8] sm:$0xf0] }
  0x4e   :  { %1807 = vmatpush.bf16.msra.mxu0 %v2772_v43  ;;  %v2905_v43 = vld [vmem:[%s5277_s3 + $0x5a0] sm:$0xf0] }
  0x52   :  { %1808 = vmatpush.bf16.msra.mxu0 %v2644_v46  ;;  %v3426_v46 = vld [vmem:[%s5277_s3 + $0x52c] sm:$0xf] }
  0x53   :  { %v2916_v53 = vor.u32 %v3426_v46, %v2913_v47  ;;  %v3507_v46 = vld [vmem:[%s5277_s3 + $0x7ac] sm:$0xf0]  ;;  %v3491_v47 = vld [vmem:[%s5277_s3 + $0x734] sm:$0xf] }
  0x54   :  { %v3176_v57 = vor.u32 %v3507_v46, %v3175_v45  ;;  %v3347_v45 = vld [vmem:[%s5277_s3 + $0x2ac] sm:$0xf0] }
  0x56   :  { %1809 = vmatpush.bf16.msra.mxu0 %v2516_v49  ;;  %v2908_v49 = vor.u32 %v3425_v42, %v2905_v43  ;;  %v3282_v42 = vld [vmem:[%s5277_s3 + $0xa4] sm:$0xf0]  ;;  %v3266_v43 = vld [vmem:[%s5277_s3 + $0x2c] sm:$0xf] }
  0x57   :  { %v2276_v56 = vor.u32 %v3266_v43, %v2273_v44  ;;  %v2535_v44 = vld [vmem:[%s5277_s3 + $0x230] sm:$0xf] }
  0x5a   :  { %1810 = vmatpush.bf16.msra.mxu0 %v2388_v61  ;;  %v2780_v61 = vor.u32 %v3393_v54, %v2777_v55  ;;  %v3185_v54 = vld [vmem:[%s5277_s3 + $0x7b8] sm:$0xf0] }
  0x5e   :  { %1811 = vmatpush.bf16.msra.mxu0 %v2260_v9  ;;  %v2652_v9 = vor.u32 %v3361_v2, %v2649_v3  ;;  %v3476_v2 = vld [vmem:[%s5277_s3 + $0x6b4] sm:$0xf0]  ;;  %v3460_v3 = vld [vmem:[%s5277_s3 + $0x63c] sm:$0xf] }
  0x9e   :  { %v99_v11 = vpop.f32.mrf.mxu0 }
  0x9f   :  { %v100_v12 = vadd.f32 %v3517_v10, %v99_v11  ;;  %v2519_v10 = vld [vmem:[%s5277_s3 + $0x220] sm:$0xf] }
  0xa0   :  { %v3345_v11 = vld [vmem:[%s5277_s3 + $0x29c] sm:$0xf0] }
  0xa1   :  { %v103_v19 = vmax.f32 %v100_v12, 0.0  ;;  %v2656_v12 = vor.u32 %v3378_v5, %v2655_v4  ;;  %v2520_v20 = vor.u32 %v3345_v11, %v2519_v10  ;;  %v3057_v4 = vld [vmem:[%s5277_s3 + $0x6b8] sm:$0xf0]  ;;  %v3427_v11 = vld [vmem:[%s5277_s3 + $0x534] sm:$0xf] }
  0xa2   :  { %v3060_v10 = vor.u32 %v3460_v3, %v3057_v4 }
  0xa3   :  { %v3986_v22 = vpack.c.bf16 %v103_v19, %v103_v19  ;;  %v2529_v19 = vld [vmem:[%s5277_s3 + $0x2a8] sm:$0xf0] }
  0xa4   :  { %v2532_v26 = vor.u32 %v3330_v18, %v2529_v19  ;;  %v2791_v19 = vld [vmem:[%s5277_s3 + $0x430] sm:$0xf] }
  0xa5   :  { %1721 = vmatmul.bf16.vlgmr.msra.gmra.mxu1 %v3986_v22  ;;  %1734 = vmatmul.bf16.vlgmr.msra.gmra.mxu2 %v3986_v22 }
  0xa6   :  { %1747 = vmatmul.bf16.vlgmr.msra.gmra.mxu3 %v3986_v22  ;;  %1760 = vmatmul.bf16.vlgmr.msrb.gmra.mxu0 %v3986_v22  ;;  %v101_v35 = vpop.f32.mrf.mxu0 }
  0xa7   :  { %1817 = vmatpush.bf16.msra.mxu1 %v3160_v23  ;;  %1830 = vmatpush.bf16.msra.mxu2 %v3164_v24  ;;  %v2391_v23 = vld [vmem:[%s5277_s3 + $0x120] sm:$0xf] }
  0xa8   :  { %1843 = vmatpush.bf16.msra.mxu3 %v3168_v27  ;;  %1856 = vmatpush.bf16.msrb.mxu0 %v3172_v28  ;;  %v3313_v24 = vld [vmem:[%s5277_s3 + $0x19c] sm:$0xf0]  ;;  %v3297_v27 = vld [vmem:[%s5277_s3 + $0x124] sm:$0xf] }
  0xa9   :  { %v2393_v28 = vld [vmem:[%s5277_s3 + $0x1a0] sm:$0xf0]  ;;  %v2392_v34 = vor.u32 %v3313_v24, %v2391_v23  ;;  %v2932_v23 = vor.u32 %v3428_v15, %v2929_v16  ;;  %v3395_v24 = vld [vmem:[%s5277_s3 + $0x434] sm:$0xf]  ;;  %v3509_v15 = vld [vmem:[%s5277_s3 + $0x7bc] sm:$0xf0] }
  0xaa   :  { %v2396_v35 = vor.u32 %v3297_v27, %v2393_v28  ;;  %v3412_v27 = vld [vmem:[%s5277_s3 + $0x4b4] sm:$0xf0]  ;;  %v3396_v28 = vld [vmem:[%s5277_s3 + $0x43c] sm:$0xf]  ;;  %v3493_v16 = vld [vmem:[%s5277_s3 + $0x744] sm:$0xf] }
  0xab   :  { %1818 = vmatpush.bf16.msra.mxu1 %v3032_v36  ;;  %1831 = vmatpush.bf16.msra.mxu2 %v3036_v37  ;;  %v3281_v36 = vld [vmem:[%s5277_s3 + $0x9c] sm:$0xf0]  ;;  %v3265_v37 = vld [vmem:[%s5277_s3 + $0x24] sm:$0xf] }
  0xac   :  { %1844 = vmatpush.bf16.msra.mxu3 %v3040_v40  ;;  %1857 = vmatpush.bf16.msrb.mxu0 %v3044_v41  ;;  %v2404_v40 = vor.u32 %v3298_v31, %v2401_v32  ;;  %v2271_v41 = vld [vmem:[%s5277_s3 + $0x28] sm:$0xf]  ;;  %v2264_v50 = vor.u32 %v3281_v36, %v2263_v33  ;;  %v2268_v51 = vor.u32 %v3265_v37, %v2265_v38  ;;  %v2663_v32 = vld [vmem:[%s5277_s3 + $0x330] sm:$0xf]  ;;  %v3363_v36 = vld [vmem:[%s5277_s3 + $0x334] sm:$0xf] }
  0xad   :  { %v2272_v55 = vor.u32 %v3282_v42, %v2271_v41  ;;  %v3379_v33 = vld [vmem:[%s5277_s3 + $0x3ac] sm:$0xf0]  ;;  %v2665_v37 = vld [vmem:[%s5277_s3 + $0x3b0] sm:$0xf0]  ;;  %v2671_v38 = vld [vmem:[%s5277_s3 + $0x338] sm:$0xf] }
  0xae   :  { %v2673_v41 = vld [vmem:[%s5277_s3 + $0x3b8] sm:$0xf0]  ;;  %v2664_v42 = vor.u32 %v3379_v33, %v2663_v32  ;;  %v2668_v43 = vor.u32 %v3363_v36, %v2665_v37  ;;  %v3461_v33 = vld [vmem:[%s5277_s3 + $0x644] sm:$0xf]  ;;  %v3478_v36 = vld [vmem:[%s5277_s3 + $0x6c4] sm:$0xf0] }
  0xaf   :  { %1819 = vmatpush.bf16.msra.mxu1 %v2904_v48  ;;  %1832 = vmatpush.bf16.msra.mxu2 %v2908_v49  ;;  %v3177_v48 = vld [vmem:[%s5277_s3 + $0x7b0] sm:$0xf0]  ;;  %v3183_v49 = vld [vmem:[%s5277_s3 + $0x738] sm:$0xf]  ;;  %v3462_v37 = vld [vmem:[%s5277_s3 + $0x64c] sm:$0xf] }
  0xb0   :  { %1845 = vmatpush.bf16.msra.mxu3 %v2912_v52  ;;  %1858 = vmatpush.bf16.msrb.mxu0 %v2916_v53  ;;  %v3508_v52 = vld [vmem:[%s5277_s3 + $0x7b4] sm:$0xf0]  ;;  %v3492_v53 = vld [vmem:[%s5277_s3 + $0x73c] sm:$0xf]  ;;  %v3180_v58 = vor.u32 %v3491_v47, %v3177_v48  ;;  %v3331_v48 = vld [vmem:[%s5277_s3 + $0x234] sm:$0xf] }
  0xb1   :  { %v3188_v62 = vor.u32 %v3492_v53, %v3185_v54  ;;  %v2545_v53 = vld [vmem:[%s5277_s3 + $0x2b8] sm:$0xf0]  ;;  %v2536_v54 = vor.u32 %v3347_v45, %v2535_v44  ;;  %v3429_v45 = vld [vmem:[%s5277_s3 + $0x544] sm:$0xf] }
  0xb3   :  { %1820 = vmatpush.bf16.msra.mxu1 %v2776_v60  ;;  %1833 = vmatpush.bf16.msra.mxu2 %v2780_v61  ;;  %v3475_v60 = vld [vmem:[%s5277_s3 + $0x6ac] sm:$0xf0]  ;;  %v3184_v61 = vor.u32 %v3508_v52, %v3183_v49  ;;  %v2537_v49 = vld [vmem:[%s5277_s3 + $0x2b0] sm:$0xf0]  ;;  %v3332_v52 = vld [vmem:[%s5277_s3 + $0x23c] sm:$0xf] }
  0xb4   :  { %1846 = vmatpush.bf16.msra.mxu3 %v2784_v0  ;;  %1859 = vmatpush.bf16.msrb.mxu0 %v2788_v1  ;;  %v3049_v0 = vld [vmem:[%s5277_s3 + $0x6b0] sm:$0xf0]  ;;  %v3055_v1 = vld [vmem:[%s5277_s3 + $0x638] sm:$0xf]  ;;  %v3048_v5 = vor.u32 %v3475_v60, %v3047_v59  ;;  %v2548_v59 = vor.u32 %v3332_v52, %v2545_v53  ;;  %v2807_v53 = vld [vmem:[%s5277_s3 + $0x440] sm:$0xf] }
  0xb5   :  { %1773 = vmatmul.bf16.vlgmr.msrb.gmra.mxu1 %v3986_v22  ;;  %1786 = vmatmul.bf16.vlgmr.msrb.gmra.mxu2 %v3986_v22  ;;  %v3052_v6 = vor.u32 %v3459_v63, %v3049_v0  ;;  %v3299_v60 = vld [vmem:[%s5277_s3 + $0x134] sm:$0xf]  ;;  %v3316_v63 = vld [vmem:[%s5277_s3 + $0x1b4] sm:$0xf0]  ;;  %v3300_v0 = vld [vmem:[%s5277_s3 + $0x13c] sm:$0xf] }
  0xb6   :  { %1799 = vmatmul.bf16.vlgmr.msrb.gmra.mxu3 %v3986_v22  ;;  %1812 = vmatmul.bf16.vlgmr.msra.gmra.mxu0 %v3986_v22 }
  0xb7   :  { %1821 = vmatpush.bf16.msra.mxu1 %v2648_v8  ;;  %1834 = vmatpush.bf16.msra.mxu2 %v2652_v9  ;;  %v3443_v8 = vld [vmem:[%s5277_s3 + $0x5ac] sm:$0xf0]  ;;  %v3056_v9 = vor.u32 %v3476_v2, %v3055_v1  ;;  %v2417_v1 = vld [vmem:[%s5277_s3 + $0x1b8] sm:$0xf0] }
  0xb8   :  { %1847 = vmatpush.bf16.msra.mxu3 %v2656_v12  ;;  %1860 = vmatpush.bf16.msrb.mxu0 %v2660_v13  ;;  %v2921_v12 = vld [vmem:[%s5277_s3 + $0x5b0] sm:$0xf0]  ;;  %v2927_v13 = vld [vmem:[%s5277_s3 + $0x538] sm:$0xf]  ;;  %v2920_v17 = vor.u32 %v3443_v8, %v2919_v7  ;;  %v2279_v2 = vld [vmem:[%s5277_s3 + $0x30] sm:$0xf] }
  0xb9   :  { %v2924_v18 = vor.u32 %v3427_v11, %v2921_v12  ;;  %v2281_v7 = vld [vmem:[%s5277_s3 + $0xb0] sm:$0xf0]  ;;  %v3284_v11 = vld [vmem:[%s5277_s3 + $0xb4] sm:$0xf0]  ;;  %v3268_v12 = vld [vmem:[%s5277_s3 + $0x3c] sm:$0xf] }
  0xbb   :  { %1822 = vmatpush.bf16.msra.mxu1 %v2520_v20  ;;  %1835 = vmatpush.bf16.msra.mxu2 %v2524_v21  ;;  %v3411_v20 = vld [vmem:[%s5277_s3 + $0x4ac] sm:$0xf0]  ;;  %v2928_v21 = vor.u32 %v3444_v14, %v2927_v13  ;;  %v2289_v13 = vld [vmem:[%s5277_s3 + $0xb8] sm:$0xf0]  ;;  %v3191_v14 = vld [vmem:[%s5277_s3 + $0x740] sm:$0xf] }
  0xbc   :  { %1848 = vmatpush.bf16.msra.mxu3 %v2528_v25  ;;  %1861 = vmatpush.bf16.msrb.mxu0 %v2532_v26  ;;  %v2793_v25 = vld [vmem:[%s5277_s3 + $0x4b0] sm:$0xf0]  ;;  %v2799_v26 = vld [vmem:[%s5277_s3 + $0x438] sm:$0xf]  ;;  %v2792_v30 = vor.u32 %v3411_v20, %v2791_v19 }
  0xbd   :  { %v2796_v31 = vor.u32 %v3395_v24, %v2793_v25  ;;  %v3201_v24 = vld [vmem:[%s5277_s3 + $0x7c8] sm:$0xf0] }
  0xbf   :  { %1823 = vmatpush.bf16.msra.mxu1 %v2392_v34  ;;  %1836 = vmatpush.bf16.msra.mxu2 %v2396_v35  ;;  %v2800_v34 = vor.u32 %v3412_v27, %v2799_v26  ;;  %v2804_v35 = vor.u32 %v3396_v28, %v2801_v29  ;;  %v2292_v26 = vor.u32 %v3268_v12, %v2289_v13  ;;  %v3063_v29 = vld [vmem:[%s5277_s3 + $0x640] sm:$0xf] }
  0xc0   :  { %1849 = vmatpush.bf16.msra.mxu3 %v2400_v39  ;;  %1862 = vmatpush.bf16.msrb.mxu0 %v2404_v40  ;;  %v3380_v39 = vld [vmem:[%s5277_s3 + $0x3b4] sm:$0xf0]  ;;  %v3364_v40 = vld [vmem:[%s5277_s3 + $0x33c] sm:$0xf]  ;;  %v3192_v27 = vor.u32 %v3509_v15, %v3191_v14  ;;  %v2551_v13 = vld [vmem:[%s5277_s3 + $0x240] sm:$0xf] }
  0xc1   :  { %v2672_v46 = vor.u32 %v3380_v39, %v2671_v38  ;;  %v2676_v47 = vor.u32 %v3364_v40, %v2673_v41  ;;  %v3073_v38 = vld [vmem:[%s5277_s3 + $0x6c8] sm:$0xf0]  ;;  %v2935_v41 = vld [vmem:[%s5277_s3 + $0x540] sm:$0xf] }
  0xc2   :  { %v3076_v44 = vor.u32 %v3462_v37, %v3073_v38  ;;  %v3349_v14 = vld [vmem:[%s5277_s3 + $0x2bc] sm:$0xf0] }
  0xc3   :  { %1824 = vmatpush.bf16.msra.mxu1 %v2264_v50  ;;  %1837 = vmatpush.bf16.msra.mxu2 %v2268_v51  ;;  %v2543_v50 = vld [vmem:[%s5277_s3 + $0x238] sm:$0xf] }
  0xc4   :  { %1850 = vmatpush.bf16.msra.mxu3 %v2272_v55  ;;  %1863 = vmatpush.bf16.msrb.mxu0 %v2276_v56  ;;  %v3348_v51 = vld [vmem:[%s5277_s3 + $0x2b4] sm:$0xf0]  ;;  %v2540_v55 = vor.u32 %v3331_v48, %v2537_v49  ;;  %v2407_v56 = vld [vmem:[%s5277_s3 + $0x130] sm:$0xf]  ;;  %v3446_v48 = vld [vmem:[%s5277_s3 + $0x5c4] sm:$0xf0] }
  0xc5   :  { %v3430_v49 = vld [vmem:[%s5277_s3 + $0x54c] sm:$0xf] }
  0xc6   :  { %1825 = vmatmul.bf16.vlgmr.msra.gmra.mxu1 %v3986_v22  ;;  %1838 = vmatmul.bf16.vlgmr.msra.gmra.mxu2 %v3986_v22 }
  0xc7   :  { %1869 = vmatpush.bf16.msrb.mxu1 %v3176_v57  ;;  %1882 = vmatpush.bf16.msrb.mxu2 %v3180_v58  ;;  %v3315_v57 = vld [vmem:[%s5277_s3 + $0x1ac] sm:$0xf0]  ;;  %v2544_v58 = vor.u32 %v3348_v51, %v2543_v50  ;;  %v2945_v50 = vld [vmem:[%s5277_s3 + $0x5c8] sm:$0xf0] }
  0xc8   :  { %1895 = vmatpush.bf16.msrb.mxu3 %v3184_v61  ;;  %1908 = vmatpush.bf16.msra.mxu0 %v3188_v62  ;;  %v2409_v61 = vld [vmem:[%s5277_s3 + $0x1b0] sm:$0xf0]  ;;  %v2415_v62 = vld [vmem:[%s5277_s3 + $0x138] sm:$0xf]  ;;  %v2408_v3 = vor.u32 %v3315_v57, %v2407_v56  ;;  %v2948_v56 = vor.u32 %v3430_v49, %v2945_v50  ;;  %v3397_v57 = vld [vmem:[%s5277_s3 + $0x444] sm:$0xf] }
  0xc9   :  { %1851 = vmatmul.bf16.vlgmr.msra.gmra.mxu3 %v3986_v22  ;;  %1864 = vmatmul.bf16.vlgmr.msrb.gmra.mxu0 %v3986_v22  ;;  %v2412_v4 = vor.u32 %v3299_v60, %v2409_v61  ;;  %v2416_v8 = vor.u32 %v3316_v63, %v2415_v62  ;;  %v3414_v60 = vld [vmem:[%s5277_s3 + $0x4c4] sm:$0xf0]  ;;  %v3398_v61 = vld [vmem:[%s5277_s3 + $0x44c] sm:$0xf]  ;;  %v3511_v49 = vld [vmem:[%s5277_s3 + $0x7cc] sm:$0xf0] }
  0xca   :  { %v2817_v62 = vld [vmem:[%s5277_s3 + $0x4c8] sm:$0xf0]  ;;  %v3495_v50 = vld [vmem:[%s5277_s3 + $0x754] sm:$0xf] }
  0xcb   :  { %1870 = vmatpush.bf16.msrb.mxu1 %v3048_v5  ;;  %1883 = vmatpush.bf16.msrb.mxu2 %v3052_v6  ;;  %v3283_v5 = vld [vmem:[%s5277_s3 + $0xac] sm:$0xf0]  ;;  %v3267_v6 = vld [vmem:[%s5277_s3 + $0x34] sm:$0xf] }
  0xcc   :  { %1896 = vmatpush.bf16.msrb.mxu3 %v3056_v9  ;;  %1909 = vmatpush.bf16.msra.mxu0 %v3060_v10  ;;  %v2420_v9 = vor.u32 %v3300_v0, %v2417_v1  ;;  %v2287_v10 = vld [vmem:[%s5277_s3 + $0x38] sm:$0xf]  ;;  %v2280_v19 = vor.u32 %v3283_v5, %v2279_v2  ;;  %v2284_v20 = vor.u32 %v3267_v6, %v2281_v7  ;;  %v2679_v1 = vld [vmem:[%s5277_s3 + $0x340] sm:$0xf]  ;;  %v3365_v5 = vld [vmem:[%s5277_s3 + $0x344] sm:$0xf] }
  0xcd   :  { %v2288_v25 = vor.u32 %v3284_v11, %v2287_v10  ;;  %v3381_v2 = vld [vmem:[%s5277_s3 + $0x3bc] sm:$0xf0]  ;;  %v2681_v6 = vld [vmem:[%s5277_s3 + $0x3c0] sm:$0xf0]  ;;  %v2687_v7 = vld [vmem:[%s5277_s3 + $0x348] sm:$0xf] }
  0xce   :  { %v2689_v10 = vld [vmem:[%s5277_s3 + $0x3c8] sm:$0xf0]  ;;  %v2680_v11 = vor.u32 %v3381_v2, %v2679_v1  ;;  %v2684_v12 = vor.u32 %v3365_v5, %v2681_v6  ;;  %v3463_v2 = vld [vmem:[%s5277_s3 + $0x654] sm:$0xf]  ;;  %v3480_v5 = vld [vmem:[%s5277_s3 + $0x6d4] sm:$0xf0] }
  0xcf   :  { %1871 = vmatpush.bf16.msrb.mxu1 %v2920_v17  ;;  %1884 = vmatpush.bf16.msrb.mxu2 %v2924_v18  ;;  %v3193_v17 = vld [vmem:[%s5277_s3 + $0x7c0] sm:$0xf0]  ;;  %v3199_v18 = vld [vmem:[%s5277_s3 + $0x748] sm:$0xf]  ;;  %v3464_v6 = vld [vmem:[%s5277_s3 + $0x65c] sm:$0xf] }
  0xd0   :  { %1897 = vmatpush.bf16.msrb.mxu3 %v2928_v21  ;;  %1910 = vmatpush.bf16.msra.mxu0 %v2932_v23  ;;  %v3510_v21 = vld [vmem:[%s5277_s3 + $0x7c4] sm:$0xf0]  ;;  %v3494_v23 = vld [vmem:[%s5277_s3 + $0x74c] sm:$0xf]  ;;  %v3196_v28 = vor.u32 %v3493_v16, %v3193_v17  ;;  %v3333_v17 = vld [vmem:[%s5277_s3 + $0x244] sm:$0xf] }
  0xd1   :  { %v3204_v32 = vor.u32 %v3494_v23, %v3201_v24  ;;  %v2561_v23 = vld [vmem:[%s5277_s3 + $0x2c8] sm:$0xf0]  ;;  %v2552_v24 = vor.u32 %v3349_v14, %v2551_v13  ;;  %v3431_v14 = vld [vmem:[%s5277_s3 + $0x554] sm:$0xf] }
  0xd3   :  { %1872 = vmatpush.bf16.msrb.mxu1 %v2792_v30  ;;  %1885 = vmatpush.bf16.msrb.mxu2 %v2796_v31  ;;  %v3477_v30 = vld [vmem:[%s5277_s3 + $0x6bc] sm:$0xf0]  ;;  %v3200_v31 = vor.u32 %v3510_v21, %v3199_v18  ;;  %v2553_v18 = vld [vmem:[%s5277_s3 + $0x2c0] sm:$0xf0]  ;;  %v3334_v21 = vld [vmem:[%s5277_s3 + $0x24c] sm:$0xf] }
  0xd4   :  { %1898 = vmatpush.bf16.msrb.mxu3 %v2800_v34  ;;  %1911 = vmatpush.bf16.msra.mxu0 %v2804_v35  ;;  %v3065_v34 = vld [vmem:[%s5277_s3 + $0x6c0] sm:$0xf0]  ;;  %v3071_v35 = vld [vmem:[%s5277_s3 + $0x648] sm:$0xf]  ;;  %v3064_v39 = vor.u32 %v3477_v30, %v3063_v29  ;;  %v2564_v29 = vor.u32 %v3334_v21, %v2561_v23  ;;  %v2823_v23 = vld [vmem:[%s5277_s3 + $0x450] sm:$0xf] }
  0xd5   :  { %v3068_v40 = vor.u32 %v3461_v33, %v3065_v34  ;;  %v3301_v30 = vld [vmem:[%s5277_s3 + $0x144] sm:$0xf]  ;;  %v3318_v33 = vld [vmem:[%s5277_s3 + $0x1c4] sm:$0xf0]  ;;  %v3302_v34 = vld [vmem:[%s5277_s3 + $0x14c] sm:$0xf] }
  0xd7   :  { %1873 = vmatpush.bf16.msrb.mxu1 %v2664_v42  ;;  %1886 = vmatpush.bf16.msrb.mxu2 %v2668_v43  ;;  %v3445_v42 = vld [vmem:[%s5277_s3 + $0x5bc] sm:$0xf0]  ;;  %v3072_v43 = vor.u32 %v3478_v36, %v3071_v35  ;;  %v2433_v35 = vld [vmem:[%s5277_s3 + $0x1c8] sm:$0xf0] }
  0xd8   :  { %1899 = vmatpush.bf16.msrb.mxu3 %v2672_v46  ;;  %1912 = vmatpush.bf16.msra.mxu0 %v2676_v47  ;;  %v2937_v46 = vld [vmem:[%s5277_s3 + $0x5c0] sm:$0xf0]  ;;  %v2943_v47 = vld [vmem:[%s5277_s3 + $0x548] sm:$0xf]  ;;  %v2936_v51 = vor.u32 %v3445_v42, %v2935_v41  ;;  %v2295_v36 = vld [vmem:[%s5277_s3 + $0x40] sm:$0xf] }
  0xd9   :  { %v2940_v52 = vor.u32 %v3429_v45, %v2937_v46  ;;  %v2297_v41 = vld [vmem:[%s5277_s3 + $0xc0] sm:$0xf0]  ;;  %v3286_v45 = vld [vmem:[%s5277_s3 + $0xc4] sm:$0xf0]  ;;  %v3270_v46 = vld [vmem:[%s5277_s3 + $0x4c] sm:$0xf] }
  0xdb   :  { %1874 = vmatpush.bf16.msrb.mxu1 %v2536_v54  ;;  %1887 = vmatpush.bf16.msrb.mxu2 %v2540_v55  ;;  %v3413_v54 = vld [vmem:[%s5277_s3 + $0x4bc] sm:$0xf0]  ;;  %v2944_v55 = vor.u32 %v3446_v48, %v2943_v47  ;;  %v2305_v47 = vld [vmem:[%s5277_s3 + $0xc8] sm:$0xf0]  ;;  %v3207_v48 = vld [vmem:[%s5277_s3 + $0x750] sm:$0xf] }
  0xdc   :  { %1900 = vmatpush.bf16.msrb.mxu3 %v2544_v58  ;;  %1913 = vmatpush.bf16.msra.mxu0 %v2548_v59  ;;  %v2809_v58 = vld [vmem:[%s5277_s3 + $0x4c0] sm:$0xf0]  ;;  %v2815_v59 = vld [vmem:[%s5277_s3 + $0x448] sm:$0xf]  ;;  %v2808_v63 = vor.u32 %v3413_v54, %v2807_v53 }
  0xdd   :  { %v2812_v0 = vor.u32 %v3397_v57, %v2809_v58  ;;  %v3217_v57 = vld [vmem:[%s5277_s3 + $0x7d8] sm:$0xf0] }
  0xdf   :  { %1875 = vmatpush.bf16.msrb.mxu1 %v2408_v3  ;;  %1888 = vmatpush.bf16.msrb.mxu2 %v2412_v4  ;;  %v2816_v3 = vor.u32 %v3414_v60, %v2815_v59  ;;  %v2820_v4 = vor.u32 %v3398_v61, %v2817_v62  ;;  %v2308_v59 = vor.u32 %v3270_v46, %v2305_v47  ;;  %v3079_v62 = vld [vmem:[%s5277_s3 + $0x650] sm:$0xf] }
  0xe0   :  { %1901 = vmatpush.bf16.msrb.mxu3 %v2416_v8  ;;  %1914 = vmatpush.bf16.msra.mxu0 %v2420_v9  ;;  %v3382_v8 = vld [vmem:[%s5277_s3 + $0x3c4] sm:$0xf0]  ;;  %v3366_v9 = vld [vmem:[%s5277_s3 + $0x34c] sm:$0xf]  ;;  %v3208_v60 = vor.u32 %v3511_v49, %v3207_v48  ;;  %v2567_v47 = vld [vmem:[%s5277_s3 + $0x250] sm:$0xf] }
  0xe1   :  { %v2688_v15 = vor.u32 %v3382_v8, %v2687_v7  ;;  %v2692_v16 = vor.u32 %v3366_v9, %v2689_v10  ;;  %v3089_v7 = vld [vmem:[%s5277_s3 + $0x6d8] sm:$0xf0]  ;;  %v2951_v10 = vld [vmem:[%s5277_s3 + $0x550] sm:$0xf] }
  0xe2   :  { %v3092_v13 = vor.u32 %v3464_v6, %v3089_v7  ;;  %v3351_v48 = vld [vmem:[%s5277_s3 + $0x2cc] sm:$0xf0] }
  0xe3   :  { %1876 = vmatpush.bf16.msrb.mxu1 %v2280_v19  ;;  %1889 = vmatpush.bf16.msrb.mxu2 %v2284_v20  ;;  %v2559_v19 = vld [vmem:[%s5277_s3 + $0x248] sm:$0xf] }
  0xe4   :  { %1902 = vmatpush.bf16.msrb.mxu3 %v2288_v25  ;;  %1915 = vmatpush.bf16.msra.mxu0 %v2292_v26  ;;  %v3350_v20 = vld [vmem:[%s5277_s3 + $0x2c4] sm:$0xf0]  ;;  %v2556_v25 = vor.u32 %v3333_v17, %v2553_v18  ;;  %v2423_v26 = vld [vmem:[%s5277_s3 + $0x140] sm:$0xf]  ;;  %v3448_v17 = vld [vmem:[%s5277_s3 + $0x5d4] sm:$0xf0] }
  0xe5   :  { %v3432_v18 = vld [vmem:[%s5277_s3 + $0x55c] sm:$0xf] }
  0xe6   :  { %1877 = vmatmul.bf16.vlgmr.msrb.gmra.mxu1 %v3986_v22  ;;  %1890 = vmatmul.bf16.vlgmr.msrb.gmra.mxu2 %v3986_v22 }
  0xe7   :  { %1921 = vmatpush.bf16.msra.mxu1 %v3192_v27  ;;  %1934 = vmatpush.bf16.msra.mxu2 %v3196_v28  ;;  %v3317_v27 = vld [vmem:[%s5277_s3 + $0x1bc] sm:$0xf0]  ;;  %v2560_v28 = vor.u32 %v3350_v20, %v2559_v19  ;;  %v2961_v19 = vld [vmem:[%s5277_s3 + $0x5d8] sm:$0xf0] }
  0xe8   :  { %1947 = vmatpush.bf16.msra.mxu3 %v3200_v31  ;;  %1960 = vmatpush.bf16.msrb.mxu0 %v3204_v32  ;;  %v2425_v31 = vld [vmem:[%s5277_s3 + $0x1c0] sm:$0xf0]  ;;  %v2431_v32 = vld [vmem:[%s5277_s3 + $0x148] sm:$0xf]  ;;  %v2424_v37 = vor.u32 %v3317_v27, %v2423_v26  ;;  %v2964_v26 = vor.u32 %v3432_v18, %v2961_v19  ;;  %v3399_v27 = vld [vmem:[%s5277_s3 + $0x454] sm:$0xf] }
  0xe9   :  { %1903 = vmatmul.bf16.vlgmr.msrb.gmra.mxu3 %v3986_v22  ;;  %1916 = vmatmul.bf16.vlgmr.msra.gmra.mxu0 %v3986_v22  ;;  %v2428_v38 = vor.u32 %v3301_v30, %v2425_v31  ;;  %v2432_v42 = vor.u32 %v3318_v33, %v2431_v32  ;;  %v3416_v30 = vld [vmem:[%s5277_s3 + $0x4d4] sm:$0xf0]  ;;  %v3400_v31 = vld [vmem:[%s5277_s3 + $0x45c] sm:$0xf]  ;;  %v3513_v18 = vld [vmem:[%s5277_s3 + $0x7dc] sm:$0xf0] }
  0xea   :  { %v2833_v32 = vld [vmem:[%s5277_s3 + $0x4d8] sm:$0xf0]  ;;  %v3497_v19 = vld [vmem:[%s5277_s3 + $0x764] sm:$0xf] }
  0xeb   :  { %1922 = vmatpush.bf16.msra.mxu1 %v3064_v39  ;;  %1935 = vmatpush.bf16.msra.mxu2 %v3068_v40  ;;  %v3285_v39 = vld [vmem:[%s5277_s3 + $0xbc] sm:$0xf0]  ;;  %v3269_v40 = vld [vmem:[%s5277_s3 + $0x44] sm:$0xf] }
  0xec   :  { %1948 = vmatpush.bf16.msra.mxu3 %v3072_v43  ;;  %1961 = vmatpush.bf16.msrb.mxu0 %v3076_v44  ;;  %v2436_v43 = vor.u32 %v3302_v34, %v2433_v35  ;;  %v2303_v44 = vld [vmem:[%s5277_s3 + $0x48] sm:$0xf]  ;;  %v2296_v53 = vor.u32 %v3285_v39, %v2295_v36  ;;  %v2300_v54 = vor.u32 %v3269_v40, %v2297_v41  ;;  %v2695_v35 = vld [vmem:[%s5277_s3 + $0x350] sm:$0xf]  ;;  %v3367_v39 = vld [vmem:[%s5277_s3 + $0x354] sm:$0xf] }
  0xed   :  { %v2304_v58 = vor.u32 %v3286_v45, %v2303_v44  ;;  %v3383_v36 = vld [vmem:[%s5277_s3 + $0x3cc] sm:$0xf0]  ;;  %v2697_v40 = vld [vmem:[%s5277_s3 + $0x3d0] sm:$0xf0]  ;;  %v2703_v41 = vld [vmem:[%s5277_s3 + $0x358] sm:$0xf] }
  0xee   :  { %v2705_v44 = vld [vmem:[%s5277_s3 + $0x3d8] sm:$0xf0]  ;;  %v2696_v45 = vor.u32 %v3383_v36, %v2695_v35  ;;  %v2700_v46 = vor.u32 %v3367_v39, %v2697_v40  ;;  %v4794_v39 = vld [vmem:[%s5280_s4] sm:$0xff]  ;;  %v3482_v40 = vld [vmem:[%s5277_s3 + $0x6e4] sm:$0xf0] }
  0xef   :  { %1923 = vmatpush.bf16.msra.mxu1 %v2936_v51  ;;  %1936 = vmatpush.bf16.msra.mxu2 %v2940_v52  ;;  %v3209_v51 = vld [vmem:[%s5277_s3 + $0x7d0] sm:$0xf0]  ;;  %v3215_v52 = vld [vmem:[%s5277_s3 + $0x758] sm:$0xf] }
  0xf0   :  { %1949 = vmatpush.bf16.msra.mxu3 %v2944_v55  ;;  %1962 = vmatpush.bf16.msrb.mxu0 %v2948_v56  ;;  %v3512_v55 = vld [vmem:[%s5277_s3 + $0x7d4] sm:$0xf0]  ;;  %v3496_v56 = vld [vmem:[%s5277_s3 + $0x75c] sm:$0xf]  ;;  %v3212_v61 = vor.u32 %v3495_v50, %v3209_v51  ;;  %v3335_v51 = vld [vmem:[%s5277_s3 + $0x254] sm:$0xf] }
  0xf1   :  { %v3220_v1 = vor.u32 %v3496_v56, %v3217_v57  ;;  %v2577_v56 = vld [vmem:[%s5277_s3 + $0x2d8] sm:$0xf0]  ;;  %v2568_v57 = vor.u32 %v3351_v48, %v2567_v47  ;;  %v3433_v47 = vld [vmem:[%s5277_s3 + $0x564] sm:$0xf]  ;;  %v369_v48 = vperm.slane %v4794_v39, 0 }
  0xf3   :  { %1924 = vmatpush.bf16.msra.mxu1 %v2808_v63  ;;  %1937 = vmatpush.bf16.msra.mxu2 %v2812_v0  ;;  %v3479_v63 = vld [vmem:[%s5277_s3 + $0x6cc] sm:$0xf0]  ;;  %v3216_v0 = vor.u32 %v3512_v55, %v3215_v52  ;;  %v2569_v52 = vld [vmem:[%s5277_s3 + $0x2d0] sm:$0xf0]  ;;  %v3336_v55 = vld [vmem:[%s5277_s3 + $0x25c] sm:$0xf] }
  0xf4   :  { %1950 = vmatpush.bf16.msra.mxu3 %v2816_v3  ;;  %1963 = vmatpush.bf16.msrb.mxu0 %v2820_v4  ;;  %v3081_v3 = vld [vmem:[%s5277_s3 + $0x6d0] sm:$0xf0]  ;;  %v3087_v4 = vld [vmem:[%s5277_s3 + $0x658] sm:$0xf]  ;;  %v3080_v8 = vor.u32 %v3479_v63, %v3079_v62  ;;  %v2580_v62 = vor.u32 %v3336_v55, %v2577_v56  ;;  %v3434_v55 = vld [vmem:[%s5277_s3 + $0x56c] sm:$0xf] }
  0xf5   :  { %v3084_v9 = vor.u32 %v3463_v2, %v3081_v3  ;;  %v3303_v63 = vld [vmem:[%s5277_s3 + $0x154] sm:$0xf]  ;;  %v3320_v2 = vld [vmem:[%s5277_s3 + $0x1d4] sm:$0xf0]  ;;  %v3304_v3 = vld [vmem:[%s5277_s3 + $0x15c] sm:$0xf] }
  0xf6   :  { %v2977_v56 = vld [vmem:[%s5277_s3 + $0x5e8] sm:$0xf0] }
  0xf7   :  { %1925 = vmatpush.bf16.msra.mxu1 %v2680_v11  ;;  %1938 = vmatpush.bf16.msra.mxu2 %v2684_v12  ;;  %v3447_v11 = vld [vmem:[%s5277_s3 + $0x5cc] sm:$0xf0]  ;;  %v3088_v12 = vor.u32 %v3480_v5, %v3087_v4  ;;  %v2449_v4 = vld [vmem:[%s5277_s3 + $0x1d8] sm:$0xf0] }
  0xf8   :  { %1951 = vmatpush.bf16.msra.mxu3 %v2688_v15  ;;  %1964 = vmatpush.bf16.msrb.mxu0 %v2692_v16  ;;  %v2953_v15 = vld [vmem:[%s5277_s3 + $0x5d0] sm:$0xf0]  ;;  %v2959_v16 = vld [vmem:[%s5277_s3 + $0x558] sm:$0xf]  ;;  %v2952_v20 = vor.u32 %v3447_v11, %v2951_v10  ;;  %v2311_v5 = vld [vmem:[%s5277_s3 + $0x50] sm:$0xf] }
  0xf9   :  { %v2956_v21 = vor.u32 %v3431_v14, %v2953_v15  ;;  %v2313_v10 = vld [vmem:[%s5277_s3 + $0xd0] sm:$0xf0]  ;;  %v3288_v14 = vld [vmem:[%s5277_s3 + $0xd4] sm:$0xf0]  ;;  %v3272_v15 = vld [vmem:[%s5277_s3 + $0x5c] sm:$0xf] }
  0xfb   :  { %1926 = vmatpush.bf16.msra.mxu1 %v2552_v24  ;;  %1939 = vmatpush.bf16.msra.mxu2 %v2556_v25  ;;  %v3415_v24 = vld [vmem:[%s5277_s3 + $0x4cc] sm:$0xf0]  ;;  %v2960_v25 = vor.u32 %v3448_v17, %v2959_v16  ;;  %v2321_v16 = vld [vmem:[%s5277_s3 + $0xd8] sm:$0xf0]  ;;  %v3223_v17 = vld [vmem:[%s5277_s3 + $0x760] sm:$0xf] }
  0xfc   :  { %1952 = vmatpush.bf16.msra.mxu3 %v2560_v28  ;;  %1965 = vmatpush.bf16.msrb.mxu0 %v2564_v29  ;;  %v2825_v28 = vld [vmem:[%s5277_s3 + $0x4d0] sm:$0xf0]  ;;  %v2831_v29 = vld [vmem:[%s5277_s3 + $0x458] sm:$0xf]  ;;  %v2824_v33 = vor.u32 %v3415_v24, %v2823_v23 }
  0xfd   :  { %v2828_v34 = vor.u32 %v3399_v27, %v2825_v28  ;;  %v3233_v27 = vld [vmem:[%s5277_s3 + $0x7e8] sm:$0xf0] }
  0xff   :  { %1927 = vmatpush.bf16.msra.mxu1 %v2424_v37  ;;  %1940 = vmatpush.bf16.msra.mxu2 %v2428_v38  ;;  %v2832_v37 = vor.u32 %v3416_v30, %v2831_v29  ;;  %v2836_v38 = vor.u32 %v3400_v31, %v2833_v32  ;;  %v2324_v29 = vor.u32 %v3272_v15, %v2321_v16  ;;  %v3095_v32 = vld [vmem:[%s5277_s3 + $0x660] sm:$0xf] }
 0x100   :  { %1953 = vmatpush.bf16.msra.mxu3 %v2432_v42  ;;  %1966 = vmatpush.bf16.msrb.mxu0 %v2436_v43  ;;  %v3384_v42 = vld [vmem:[%s5277_s3 + $0x3d4] sm:$0xf0]  ;;  %v3368_v43 = vld [vmem:[%s5277_s3 + $0x35c] sm:$0xf]  ;;  %v3224_v30 = vor.u32 %v3513_v18, %v3223_v17  ;;  %v2711_v15 = vld [vmem:[%s5277_s3 + $0x360] sm:$0xf] }
 0x101   :  { %v2704_v49 = vor.u32 %v3384_v42, %v2703_v41  ;;  %v2708_v50 = vor.u32 %v3368_v43, %v2705_v44  ;;  %v3466_v41 = vld [vmem:[%s5277_s3 + $0x66c] sm:$0xf]  ;;  %v2967_v43 = vld [vmem:[%s5277_s3 + $0x560] sm:$0xf]  ;;  %v3369_v17 = vld [vmem:[%s5277_s3 + $0x364] sm:$0xf] }
 0x102   :  { %v3105_v42 = vld [vmem:[%s5277_s3 + $0x6e8] sm:$0xf0]  ;;  %v3385_v16 = vld [vmem:[%s5277_s3 + $0x3dc] sm:$0xf0] }
 0x103   :  { %1928 = vmatpush.bf16.msra.mxu1 %v2296_v53  ;;  %1941 = vmatpush.bf16.msra.mxu2 %v2300_v54  ;;  %v2575_v53 = vld [vmem:[%s5277_s3 + $0x258] sm:$0xf] }
 0x104   :  { %1954 = vmatpush.bf16.msra.mxu3 %v2304_v58  ;;  %1967 = vmatpush.bf16.msrb.mxu0 %v2308_v59  ;;  %v3352_v54 = vld [vmem:[%s5277_s3 + $0x2d4] sm:$0xf0]  ;;  %v2572_v58 = vor.u32 %v3335_v51, %v2569_v52  ;;  %v2439_v59 = vld [vmem:[%s5277_s3 + $0x150] sm:$0xf]  ;;  %v2969_v51 = vld [vmem:[%s5277_s3 + $0x5e0] sm:$0xf0] }
 0x105   :  { %v2975_v52 = vld [vmem:[%s5277_s3 + $0x568] sm:$0xf] }
 0x106   :  { %1929 = vmatmul.bf16.vlgmr.msra.gmra.mxu1 %v3986_v22  ;;  %1942 = vmatmul.bf16.vlgmr.msra.gmra.mxu2 %v3986_v22 }
 0x107   :  { %1973 = vmatpush.bf16.msrb.mxu1 %v3208_v60  ;;  %1986 = vmatpush.bf16.msrb.mxu2 %v3212_v61  ;;  %v3319_v60 = vld [vmem:[%s5277_s3 + $0x1cc] sm:$0xf0]  ;;  %v2576_v61 = vor.u32 %v3352_v54, %v2575_v53  ;;  %v372_v53 = vperm.slane %v4794_v39, 3  ;;  %v3450_v54 = vld [vmem:[%s5277_s3 + $0x5e4] sm:$0xf0] }
 0x108   :  { %1999 = vmatpush.bf16.msrb.mxu3 %v3216_v0  ;;  %2012 = vmatpush.bf16.msra.mxu0 %v3220_v1  ;;  %v2441_v0 = vld [vmem:[%s5277_s3 + $0x1d0] sm:$0xf0]  ;;  %v2447_v1 = vld [vmem:[%s5277_s3 + $0x158] sm:$0xf]  ;;  %v2440_v6 = vor.u32 %v3319_v60, %v2439_v59  ;;  %v2972_v59 = vor.u32 %v3433_v47, %v2969_v51  ;;  %v2455_v47 = vld [vmem:[%s5277_s3 + $0x160] sm:$0xf] }
 0x109   :  { %1955 = vmatmul.bf16.vlgmr.msra.gmra.mxu3 %v3986_v22  ;;  %1968 = vmatmul.bf16.vlgmr.msrb.gmra.mxu0 %v3986_v22  ;;  %v2444_v7 = vor.u32 %v3303_v63, %v2441_v0  ;;  %v2448_v11 = vor.u32 %v3320_v2, %v2447_v1  ;;  %v3417_v63 = vld [vmem:[%s5277_s3 + $0x4dc] sm:$0xf0]  ;;  %v3401_v0 = vld [vmem:[%s5277_s3 + $0x464] sm:$0xf]  ;;  %v2976_v1 = vor.u32 %v3450_v54, %v2975_v52  ;;  %v373_v52 = vperm.slane %v4794_v39, 4 }
 0x10a   :  { %v2980_v2 = vor.u32 %v3434_v55, %v2977_v56  ;;  %v3305_v51 = vld [vmem:[%s5277_s3 + $0x164] sm:$0xf] }
 0x10b   :  { %1974 = vmatpush.bf16.msrb.mxu1 %v3080_v8  ;;  %1987 = vmatpush.bf16.msrb.mxu2 %v3084_v9  ;;  %v3287_v8 = vld [vmem:[%s5277_s3 + $0xcc] sm:$0xf0]  ;;  %v3271_v9 = vld [vmem:[%s5277_s3 + $0x54] sm:$0xf]  ;;  %v2457_v56 = vld [vmem:[%s5277_s3 + $0x1e0] sm:$0xf0] }
 0x10c   :  { %2000 = vmatpush.bf16.msrb.mxu3 %v3088_v12  ;;  %2013 = vmatpush.bf16.msra.mxu0 %v3092_v13  ;;  %v2452_v12 = vor.u32 %v3304_v3, %v2449_v4  ;;  %v2319_v13 = vld [vmem:[%s5277_s3 + $0x58] sm:$0xf]  ;;  %v2312_v23 = vor.u32 %v3287_v8, %v2311_v5  ;;  %v2316_v24 = vor.u32 %v3271_v9, %v2313_v10  ;;  %v2841_v4 = vld [vmem:[%s5277_s3 + $0x4e0] sm:$0xf0]  ;;  %v2847_v5 = vld [vmem:[%s5277_s3 + $0x468] sm:$0xf] }
 0x10d   :  { %v2320_v28 = vor.u32 %v3288_v14, %v2319_v13  ;;  %v3402_v8 = vld [vmem:[%s5277_s3 + $0x46c] sm:$0xf]  ;;  %v370_v10 = vperm.slane %v4794_v39, 1  ;;  %v2844_v14 = vor.u32 %v3401_v0, %v2841_v4  ;;  %v2327_v0 = vld [vmem:[%s5277_s3 + $0x60] sm:$0xf] }
 0x10e   :  { %v2849_v9 = vld [vmem:[%s5277_s3 + $0x4e8] sm:$0xf0] }
 0x10f   :  { %1975 = vmatpush.bf16.msrb.mxu1 %v2952_v20  ;;  %1988 = vmatpush.bf16.msrb.mxu2 %v2956_v21  ;;  %v3225_v20 = vld [vmem:[%s5277_s3 + $0x7e0] sm:$0xf0]  ;;  %v3231_v21 = vld [vmem:[%s5277_s3 + $0x768] sm:$0xf] }
 0x110   :  { %2001 = vmatpush.bf16.msrb.mxu3 %v2960_v25  ;;  %2014 = vmatpush.bf16.msra.mxu0 %v2964_v26  ;;  %v3514_v25 = vld [vmem:[%s5277_s3 + $0x7e4] sm:$0xf0]  ;;  %v3498_v26 = vld [vmem:[%s5277_s3 + $0x76c] sm:$0xf]  ;;  %v3228_v31 = vor.u32 %v3497_v19, %v3225_v20  ;;  %v2852_v19 = vor.u32 %v3402_v8, %v2849_v9 }
 0x111   :  { %v3232_v35 = vor.u32 %v3514_v25, %v3231_v21  ;;  %v3236_v36 = vor.u32 %v3498_v26, %v3233_v27  ;;  %v2713_v21 = vld [vmem:[%s5277_s3 + $0x3e0] sm:$0xf0]  ;;  %v3386_v26 = vld [vmem:[%s5277_s3 + $0x3e4] sm:$0xf0]  ;;  %v3370_v27 = vld [vmem:[%s5277_s3 + $0x36c] sm:$0xf] }
 0x112   :  { %v2335_v8 = vld [vmem:[%s5277_s3 + $0x68] sm:$0xf] }
 0x113   :  { %1976 = vmatpush.bf16.msrb.mxu1 %v2824_v33  ;;  %1989 = vmatpush.bf16.msrb.mxu2 %v2828_v34  ;;  %v3481_v33 = vld [vmem:[%s5277_s3 + $0x6dc] sm:$0xf0]  ;;  %v3465_v34 = vld [vmem:[%s5277_s3 + $0x664] sm:$0xf]  ;;  %v3290_v9 = vld [vmem:[%s5277_s3 + $0xe4] sm:$0xf0] }
 0x114   :  { %2002 = vmatpush.bf16.msrb.mxu3 %v2832_v37  ;;  %2015 = vmatpush.bf16.msra.mxu0 %v2836_v38  ;;  %v3097_v37 = vld [vmem:[%s5277_s3 + $0x6e0] sm:$0xf0]  ;;  %v3103_v38 = vld [vmem:[%s5277_s3 + $0x668] sm:$0xf]  ;;  %v3096_v44 = vor.u32 %v3481_v33, %v3095_v32  ;;  %v3353_v32 = vld [vmem:[%s5277_s3 + $0x2dc] sm:$0xf0] }
 0x117   :  { %1977 = vmatpush.bf16.msrb.mxu1 %v2696_v45  ;;  %1990 = vmatpush.bf16.msrb.mxu2 %v2700_v46  ;;  %v3100_v45 = vor.u32 %v3465_v34, %v3097_v37  ;;  %v3449_v46 = vld [vmem:[%s5277_s3 + $0x5dc] sm:$0xf0]  ;;  %v2712_v34 = vor.u32 %v3385_v16, %v2711_v15  ;;  %v3337_v37 = vld [vmem:[%s5277_s3 + $0x264] sm:$0xf]  ;;  %v3239_v15 = vld [vmem:[%s5277_s3 + $0x770] sm:$0xf] }
 0x118   :  { %2003 = vmatpush.bf16.msrb.mxu3 %v2704_v49  ;;  %2016 = vmatpush.bf16.msra.mxu0 %v2708_v50  ;;  %v3104_v49 = vor.u32 %v3482_v40, %v3103_v38  ;;  %v3108_v50 = vor.u32 %v3466_v41, %v3105_v42  ;;  %v2585_v38 = vld [vmem:[%s5277_s3 + $0x2e0] sm:$0xf0]  ;;  %v3515_v16 = vld [vmem:[%s5277_s3 + $0x7ec] sm:$0xf0] }
 0x11b   :  { %1978 = vmatpush.bf16.msrb.mxu1 %v2568_v57  ;;  %1991 = vmatpush.bf16.msrb.mxu2 %v2572_v58  ;;  %v2968_v58 = vor.u32 %v3449_v46, %v2967_v43  ;;  %v2591_v43 = vld [vmem:[%s5277_s3 + $0x268] sm:$0xf]  ;;  %v2593_v46 = vld [vmem:[%s5277_s3 + $0x2e8] sm:$0xf0] }
 0x11c   :  { %2004 = vmatpush.bf16.msrb.mxu3 %v2576_v61  ;;  %2017 = vmatpush.bf16.msra.mxu0 %v2580_v62  ;;  %v2839_v62 = vld [vmem:[%s5277_s3 + $0x460] sm:$0xf] }
 0x11d   :  { %v2840_v13 = vor.u32 %v3417_v63, %v2839_v62  ;;  %v2465_v62 = vld [vmem:[%s5277_s3 + $0x1e8] sm:$0xf0] }
 0x11f   :  { %1979 = vmatpush.bf16.msrb.mxu1 %v2440_v6  ;;  %1992 = vmatpush.bf16.msrb.mxu2 %v2444_v7  ;;  %v3418_v6 = vld [vmem:[%s5277_s3 + $0x4e4] sm:$0xf0] }
 0x120   :  { %2005 = vmatpush.bf16.msrb.mxu3 %v2448_v11  ;;  %2018 = vmatpush.bf16.msra.mxu0 %v2452_v12  ;;  %v371_v12 = vperm.slane %v4794_v39, 2  ;;  %v2848_v18 = vor.u32 %v3418_v6, %v2847_v5  ;;  %v2460_v5 = vor.u32 %v3305_v51, %v2457_v56  ;;  %v3435_v56 = vld [vmem:[%s5277_s3 + $0x574] sm:$0xf] }
 0x122   :  { %v1722_v57 = vpop.f32.mrf.mxu1 }
 0x123   :  { %1980 = vmatpush.bf16.msrb.mxu1 %v2312_v23  ;;  %1993 = vmatpush.bf16.msrb.mxu2 %v2316_v24  ;;  %v1723_v60 = vadd.f32 %v1722_v57, %v369_v48  ;;  %v1761_v61 = vpop.f32.mrf.mxu0  ;;  %v2719_v23 = vld [vmem:[%s5277_s3 + $0x368] sm:$0xf] }
 0x124   :  { %2006 = vmatpush.bf16.msrb.mxu3 %v2320_v28  ;;  %2019 = vmatpush.bf16.msra.mxu0 %v2324_v29  ;;  %v1762_v3 = vadd.f32 %v1761_v61, %v372_v53  ;;  %v2721_v28 = vld [vmem:[%s5277_s3 + $0x3e8] sm:$0xf0]  ;;  %v2720_v41 = vor.u32 %v3386_v26, %v2719_v23  ;;  %v2463_v57 = vld [vmem:[%s5277_s3 + $0x168] sm:$0xf]  ;;  %v3247_v23 = vld [vmem:[%s5277_s3 + $0x778] sm:$0xf] }
 0x125   :  { %v2129_v7 = vmax.f32 %v1723_v60, 0.0  ;;  %v2724_v42 = vor.u32 %v3370_v27, %v2721_v28  ;;  %v3322_v60 = vld [vmem:[%s5277_s3 + $0x1e4] sm:$0xf0]  ;;  %v3306_v61 = vld [vmem:[%s5277_s3 + $0x16c] sm:$0xf] }
 0x126   :  { %1981 = vmatmul.bf16.vlgmr.msrb.gmra.mxu1 %v3986_v22  ;;  %1994 = vmatmul.bf16.vlgmr.msrb.gmra.mxu2 %v3986_v22  ;;  %v2132_v11 = vmax.f32 %v1762_v3, 0.0  ;;  %v2329_v3 = vld [vmem:[%s5277_s3 + $0xe0] sm:$0xf0]  ;;  %v3500_v28 = vld [vmem:[%s5277_s3 + $0x77c] sm:$0xf] }
 0x127   :  { %2025 = vmatpush.bf16.msra.mxu1 %v3224_v30  ;;  %2038 = vmatpush.bf16.msra.mxu2 %v3228_v31  ;;  %2161 = vst [vmem:[%s5281_s5] sm:$0xff] %v2129_v7  ;;  %v2583_v31 = vld [vmem:[%s5277_s3 + $0x260] sm:$0xf] }
 0x128   :  { %2051 = vmatpush.bf16.msra.mxu3 %v3232_v35  ;;  %2064 = vmatpush.bf16.msrb.mxu0 %v3236_v36  ;;  %2164 = vst [vmem:[%s5281_s5 + $0x18] sm:$0xff] %v2132_v11  ;;  %v1735_v20 = vpop.f32.mrf.mxu2  ;;  %v2716_v35 = vor.u32 %v3369_v17, %v2713_v21  ;;  %v2584_v48 = vor.u32 %v3353_v32, %v2583_v31 }
 0x129   :  { %2007 = vmatmul.bf16.vlgmr.msrb.gmra.mxu3 %v3986_v22  ;;  %2020 = vmatmul.bf16.vlgmr.msra.gmra.mxu0 %v3986_v22  ;;  %v1736_v24 = vadd.f32 %v1735_v20, %v370_v10  ;;  %v1748_v25 = vpop.f32.mrf.mxu3  ;;  %v3274_v10 = vld [vmem:[%s5277_s3 + $0x6c] sm:$0xf]  ;;  %v2464_v11 = vor.u32 %v3322_v60, %v2463_v57  ;;  %v374_v20 = vperm.slane %v4794_v39, 5  ;;  %v3240_v32 = vor.u32 %v3515_v16, %v3239_v15  ;;  %v2985_v60 = vld [vmem:[%s5277_s3 + $0x5f0] sm:$0xf0] }
 0x12a   :  { %v1749_v29 = vadd.f32 %v1748_v25, %v371_v12  ;;  %v1724_v30 = vpop.f32.mrf.mxu1  ;;  %v2468_v12 = vor.u32 %v3306_v61, %v2465_v62  ;;  %v375_v25 = vperm.slane %v4794_v39, 6  ;;  %v5042_v57 = vld [vmem:[%s5280_s4 + $0x8] sm:$0xff]  ;;  %v2991_v61 = vld [vmem:[%s5277_s3 + $0x578] sm:$0xf]  ;;  %v3404_v15 = vld [vmem:[%s5277_s3 + $0x47c] sm:$0xf] }
 0x12b   :  { %2026 = vmatpush.bf16.msra.mxu1 %v3096_v44  ;;  %2039 = vmatpush.bf16.msra.mxu2 %v3100_v45  ;;  %v2130_v33 = vmax.f32 %v1736_v24, 0.0  ;;  %v1763_v36 = vpop.f32.mrf.mxu0  ;;  %v3354_v44 = vld [vmem:[%s5277_s3 + $0x2e4] sm:$0xf0]  ;;  %v3338_v45 = vld [vmem:[%s5277_s3 + $0x26c] sm:$0xf] }
 0x12c   :  { %2052 = vmatpush.bf16.msra.mxu3 %v3104_v49  ;;  %2065 = vmatpush.bf16.msrb.mxu0 %v3108_v50  ;;  %v2131_v40 = vmax.f32 %v1749_v29, 0.0  ;;  %v2588_v49 = vor.u32 %v3337_v37, %v2585_v38  ;;  %v3321_v50 = vld [vmem:[%s5277_s3 + $0x1dc] sm:$0xf0]  ;;  %v2592_v53 = vor.u32 %v3354_v44, %v2591_v43  ;;  %v2596_v54 = vor.u32 %v3338_v45, %v2593_v46  ;;  %v3516_v24 = vld [vmem:[%s5277_s3 + $0x7f4] sm:$0xf0] }
 0x12d   :  { %2162 = vst [vmem:[%s5281_s5 + $0x8] sm:$0xff] %v2130_v33  ;;  %v2456_v4 = vor.u32 %v3321_v50, %v2455_v47  ;;  %v3249_v29 = vld [vmem:[%s5277_s3 + $0x7f8] sm:$0xf0]  ;;  %v3111_v36 = vld [vmem:[%s5277_s3 + $0x670] sm:$0xf] }
 0x12e   :  { %2163 = vst [vmem:[%s5281_s5 + $0x10] sm:$0xff] %v2131_v40  ;;  %v3483_v37 = vld [vmem:[%s5277_s3 + $0x6ec] sm:$0xf0]  ;;  %v3467_v38 = vld [vmem:[%s5277_s3 + $0x674] sm:$0xf]  ;;  %v3248_v40 = vor.u32 %v3516_v24, %v3247_v23 }
 0x12f   :  { %2027 = vmatpush.bf16.msra.mxu1 %v2968_v58  ;;  %2040 = vmatpush.bf16.msra.mxu2 %v2972_v59  ;;  %v376_v58 = vperm.slane %v4794_v39, 7  ;;  %v2336_v39 = vor.u32 %v3290_v9, %v2335_v8  ;;  %v3113_v44 = vld [vmem:[%s5277_s3 + $0x6f0] sm:$0xf0]  ;;  %v3119_v45 = vld [vmem:[%s5277_s3 + $0x678] sm:$0xf] }
 0x130   :  { %2053 = vmatpush.bf16.msra.mxu3 %v2976_v1  ;;  %2066 = vmatpush.bf16.msrb.mxu0 %v2980_v2  ;;  %v1737_v55 = vpop.f32.mrf.mxu2  ;;  %v3289_v1 = vld [vmem:[%s5277_s3 + $0xdc] sm:$0xf0]  ;;  %v3273_v2 = vld [vmem:[%s5277_s3 + $0x64] sm:$0xf]  ;;  %v3484_v46 = vld [vmem:[%s5277_s3 + $0x6f4] sm:$0xf0] }
 0x131   :  { %v1750_v59 = vpop.f32.mrf.mxu3  ;;  %v2328_v26 = vor.u32 %v3289_v1, %v2327_v0  ;;  %v2332_v27 = vor.u32 %v3273_v2, %v2329_v3  ;;  %v3121_v50 = vld [vmem:[%s5277_s3 + $0x6f8] sm:$0xf0]  ;;  %v3451_v55 = vld [vmem:[%s5277_s3 + $0x5ec] sm:$0xf0]  ;;  %v3452_v62 = vld [vmem:[%s5277_s3 + $0x5f4] sm:$0xf0] }
 0x132   :  { %v1774_v63 = vpop.f32.mrf.mxu1  ;;  %v2993_v0 = vld [vmem:[%s5277_s3 + $0x5f8] sm:$0xf0]  ;;  %v377_v2 = vperm.slane %v5042_v57, 0  ;;  %v3403_v8 = vld [vmem:[%s5277_s3 + $0x474] sm:$0xf]  ;;  %v2992_v9 = vor.u32 %v3452_v62, %v2991_v61 }
 0x133   :  { %2028 = vmatpush.bf16.msra.mxu1 %v2840_v13  ;;  %2041 = vmatpush.bf16.msra.mxu2 %v2844_v14  ;;  %v1775_v6 = vadd.f32 %v1774_v63, %v373_v52  ;;  %v1813_v7 = vpop.f32.mrf.mxu0  ;;  %v2337_v14 = vld [vmem:[%s5277_s3 + $0xe8] sm:$0xf0]  ;;  %v2983_v52 = vld [vmem:[%s5277_s3 + $0x570] sm:$0xf]  ;;  %v3436_v63 = vld [vmem:[%s5277_s3 + $0x57c] sm:$0xf] }
 0x134   :  { %2054 = vmatpush.bf16.msra.mxu3 %v2848_v18  ;;  %2067 = vmatpush.bf16.msrb.mxu0 %v2852_v19  ;;  %v1814_v13 = vadd.f32 %v1813_v7, %v376_v58  ;;  %v3499_v18 = vld [vmem:[%s5277_s3 + $0x774] sm:$0xf]  ;;  %v2340_v30 = vor.u32 %v3274_v10, %v2337_v14  ;;  %v3120_v58 = vor.u32 %v3484_v46, %v3119_v45  ;;  %v3419_v7 = vld [vmem:[%s5277_s3 + $0x4ec] sm:$0xf0]  ;;  %v3420_v14 = vld [vmem:[%s5277_s3 + $0x4f4] sm:$0xf0] }
 0x135   :  { %v2133_v17 = vmax.f32 %v1775_v6, 0.0  ;;  %v3241_v19 = vld [vmem:[%s5277_s3 + $0x7f0] sm:$0xf0]  ;;  %v2984_v3 = vor.u32 %v3451_v55, %v2983_v52  ;;  %v2855_v6 = vld [vmem:[%s5277_s3 + $0x470] sm:$0xf]  ;;  %v2996_v10 = vor.u32 %v3436_v63, %v2993_v0 }
 0x136   :  { %v2136_v21 = vmax.f32 %v1814_v13, 0.0  ;;  %v3244_v33 = vor.u32 %v3499_v18, %v3241_v19  ;;  %v2863_v13 = vld [vmem:[%s5277_s3 + $0x478] sm:$0xf]  ;;  %v2865_v16 = vld [vmem:[%s5277_s3 + $0x4f8] sm:$0xf0] }
 0x137   :  { %2029 = vmatpush.bf16.msra.mxu1 %v2712_v34  ;;  %2042 = vmatpush.bf16.msra.mxu2 %v2716_v35  ;;  %2165 = vst [vmem:[%s5281_s5 + $0x20] sm:$0xff] %v2133_v17  ;;  %v2727_v23 = vld [vmem:[%s5277_s3 + $0x370] sm:$0xf]  ;;  %v2601_v46 = vld [vmem:[%s5277_s3 + $0x2f0] sm:$0xf0] }
 0x138   :  { %2055 = vmatpush.bf16.msra.mxu3 %v2720_v41  ;;  %2068 = vmatpush.bf16.msrb.mxu0 %v2724_v42  ;;  %2168 = vst [vmem:[%s5281_s5 + $0x38] sm:$0xff] %v2136_v21  ;;  %v1787_v31 = vpop.f32.mrf.mxu2  ;;  %v3252_v41 = vor.u32 %v3500_v28, %v3249_v29  ;;  %v3387_v24 = vld [vmem:[%s5277_s3 + $0x3ec] sm:$0xf0]  ;;  %v2868_v28 = vor.u32 %v3404_v15, %v2865_v16  ;;  %v2729_v29 = vld [vmem:[%s5277_s3 + $0x3f0] sm:$0xf0] }
 0x139   :  { %v1788_v34 = vadd.f32 %v1787_v31, %v374_v20  ;;  %v1800_v35 = vpop.f32.mrf.mxu3  ;;  %v2856_v20 = vor.u32 %v3419_v7, %v2855_v6  ;;  %v2609_v52 = vld [vmem:[%s5277_s3 + $0x2f8] sm:$0xf0]  ;;  %v2471_v55 = vld [vmem:[%s5277_s3 + $0x170] sm:$0xf]  ;;  %v3307_v62 = vld [vmem:[%s5277_s3 + $0x174] sm:$0xf] }
 0x13a   :  { %v1801_v42 = vadd.f32 %v1800_v35, %v375_v25  ;;  %v1776_v43 = vpop.f32.mrf.mxu1  ;;  %v3371_v25 = vld [vmem:[%s5277_s3 + $0x374] sm:$0xf]  ;;  %v2481_v6 = vld [vmem:[%s5277_s3 + $0x1f8] sm:$0xf0]  ;;  %v2351_v16 = vld [vmem:[%s5277_s3 + $0x78] sm:$0xf] }
 0x13b   :  { %2030 = vmatpush.bf16.msra.mxu1 %v2584_v48  ;;  %2043 = vmatpush.bf16.msra.mxu2 %v2588_v49  ;;  %v2134_v47 = vmax.f32 %v1788_v34, 0.0  ;;  %v1815_v48 = vpop.f32.mrf.mxu0  ;;  %v3468_v49 = vld [vmem:[%s5277_s3 + $0x67c] sm:$0xf]  ;;  %v378_v34 = vperm.slane %v5042_v57, 1  ;;  %v2473_v63 = vld [vmem:[%s5277_s3 + $0x1f0] sm:$0xf0] }
 0x13c   :  { %2056 = vmatpush.bf16.msra.mxu3 %v2592_v53  ;;  %2069 = vmatpush.bf16.msrb.mxu0 %v2596_v54  ;;  %v2135_v51 = vmax.f32 %v1801_v42, 0.0  ;;  %v3112_v53 = vor.u32 %v3483_v37, %v3111_v36  ;;  %v3116_v54 = vor.u32 %v3467_v38, %v3113_v44  ;;  %v3124_v59 = vor.u32 %v3468_v49, %v3121_v50  ;;  %v2599_v37 = vld [vmem:[%s5277_s3 + $0x270] sm:$0xf]  ;;  %v3339_v42 = vld [vmem:[%s5277_s3 + $0x274] sm:$0xf] }
 0x13d   :  { %2166 = vst [vmem:[%s5281_s5 + $0x28] sm:$0xff] %v2134_v47  ;;  %v379_v36 = vperm.slane %v5042_v57, 2  ;;  %v2728_v38 = vor.u32 %v3387_v24, %v2727_v23  ;;  %v2607_v47 = vld [vmem:[%s5277_s3 + $0x278] sm:$0xf]  ;;  %v2604_v61 = vor.u32 %v3339_v42, %v2601_v46  ;;  %v2345_v15 = vld [vmem:[%s5277_s3 + $0xf0] sm:$0xf0] }
 0x13e   :  { %2167 = vst [vmem:[%s5281_s5 + $0x30] sm:$0xff] %v2135_v51  ;;  %v3356_v50 = vld [vmem:[%s5277_s3 + $0x2f4] sm:$0xf0]  ;;  %v3340_v51 = vld [vmem:[%s5277_s3 + $0x27c] sm:$0xf] }
 0x13f   :  { %2031 = vmatpush.bf16.msra.mxu1 %v2456_v4  ;;  %2044 = vmatpush.bf16.msra.mxu2 %v2460_v5  ;;  %v2988_v4 = vor.u32 %v3435_v56, %v2985_v60  ;;  %v3323_v56 = vld [vmem:[%s5277_s3 + $0x1ec] sm:$0xf0] }
 0x140   :  { %2057 = vmatpush.bf16.msra.mxu3 %v2464_v11  ;;  %2070 = vmatpush.bf16.msrb.mxu0 %v2468_v12  ;;  %v1789_v1 = vpop.f32.mrf.mxu2  ;;  %v380_v11 = vperm.slane %v5042_v57, 3  ;;  %v2857_v12 = vld [vmem:[%s5277_s3 + $0x4f0] sm:$0xf0]  ;;  %v2472_v7 = vor.u32 %v3323_v56, %v2471_v55 }
 0x141   :  { %v1802_v5 = vpop.f32.mrf.mxu3  ;;  %v2860_v21 = vor.u32 %v3403_v8, %v2857_v12  ;;  %v2608_v1 = vor.u32 %v3356_v50, %v2607_v47  ;;  %v2476_v8 = vor.u32 %v3307_v62, %v2473_v63 }
 0x142   :  { %v3308_v5 = vld [vmem:[%s5277_s3 + $0x17c] sm:$0xf] }
 0x143   :  { %2032 = vmatpush.bf16.msra.mxu1 %v2328_v26  ;;  %2045 = vmatpush.bf16.msra.mxu2 %v2332_v27  ;;  %v1826_v17 = vpop.f32.mrf.mxu1  ;;  %v2864_v27 = vor.u32 %v3420_v14, %v2863_v13  ;;  %v2484_v12 = vor.u32 %v3308_v5, %v2481_v6  ;;  %v3275_v14 = vld [vmem:[%s5277_s3 + $0x74] sm:$0xf] }
 0x144   :  { %2058 = vmatpush.bf16.msra.mxu3 %v2336_v39  ;;  %2071 = vmatpush.bf16.msrb.mxu0 %v2340_v30  ;;  %v1827_v18 = vadd.f32 %v1826_v17, %v377_v2  ;;  %v2735_v39 = vld [vmem:[%s5277_s3 + $0x378] sm:$0xf]  ;;  %v2612_v2 = vor.u32 %v3340_v51, %v2609_v52  ;;  %v2348_v23 = vor.u32 %v3275_v14, %v2345_v15 }
 0x145   :  { %v3388_v30 = vld [vmem:[%s5277_s3 + $0x3f4] sm:$0xf0] }
 0x146   :  { %2033 = vmatmul.bf16.vlgmr.msra.gmra.mxu1 %v3986_v22  ;;  %2046 = vmatmul.bf16.vlgmr.msra.gmra.mxu2 %v3986_v22  ;;  %v1865_v19 = vpop.f32.mrf.mxu0  ;;  %v2137_v31 = vmax.f32 %v1827_v18, 0.0  ;;  %v2736_v43 = vor.u32 %v3388_v30, %v2735_v39  ;;  %v3292_v18 = vld [vmem:[%s5277_s3 + $0xf4] sm:$0xf0] }
 0x147   :  { %2077 = vmatpush.bf16.msrb.mxu1 %v3240_v32  ;;  %2090 = vmatpush.bf16.msrb.mxu2 %v3244_v33  ;;  %v1866_v26 = vadd.f32 %v1865_v19, %v380_v11  ;;  %v3372_v32 = vld [vmem:[%s5277_s3 + $0x37c] sm:$0xf]  ;;  %v2352_v24 = vor.u32 %v3292_v18, %v2351_v16 }
 0x148   :  { %2103 = vmatpush.bf16.msrb.mxu3 %v3248_v40  ;;  %2116 = vmatpush.bf16.msra.mxu0 %v3252_v41  ;;  %v2737_v33 = vld [vmem:[%s5277_s3 + $0x3f8] sm:$0xf0]  ;;  %2169 = vst [vmem:[%s5281_s5 + $0x40] sm:$0xff] %v2137_v31  ;;  %v2732_v40 = vor.u32 %v3371_v25, %v2729_v29  ;;  %v3355_v41 = vld [vmem:[%s5277_s3 + $0x2ec] sm:$0xf0] }
 0x149   :  { %2059 = vmatmul.bf16.vlgmr.msra.gmra.mxu3 %v3986_v22  ;;  %2072 = vmatmul.bf16.vlgmr.msrb.gmra.mxu0 %v3986_v22  ;;  %v2140_v35 = vmax.f32 %v1866_v26, 0.0  ;;  %v2740_v44 = vor.u32 %v3372_v32, %v2737_v33  ;;  %v1839_v45 = vpop.f32.mrf.mxu2  ;;  %v2600_v60 = vor.u32 %v3355_v41, %v2599_v37  ;;  %v3276_v19 = vld [vmem:[%s5277_s3 + $0x7c] sm:$0xf]  ;;  %v381_v26 = vperm.slane %v5042_v57, 4 }
 0x14a   :  { %v1840_v48 = vadd.f32 %v1839_v45, %v378_v34  ;;  %v382_v32 = vperm.slane %v5042_v57, 5  ;;  %v383_v34 = vperm.slane %v5042_v57, 6 }
 0x14b   :  { %2078 = vmatpush.bf16.msrb.mxu1 %v3112_v53  ;;  %2091 = vmatpush.bf16.msrb.mxu2 %v3116_v54  ;;  %2172 = vst [vmem:[%s5281_s5 + $0x58] sm:$0xff] %v2140_v35  ;;  %v1828_v54 = vpop.f32.mrf.mxu1 }
 0x14c   :  { %2104 = vmatpush.bf16.msrb.mxu3 %v3120_v58  ;;  %2117 = vmatpush.bf16.msra.mxu0 %v3124_v59  ;;  %v1852_v49 = vpop.f32.mrf.mxu3  ;;  %v2138_v58 = vmax.f32 %v1840_v48, 0.0 }
 0x14d   :  { %v1853_v53 = vadd.f32 %v1852_v49, %v379_v36 }
 0x14e   :  { %v1867_v59 = vpop.f32.mrf.mxu0  ;;  %2170 = vst [vmem:[%s5281_s5 + $0x48] sm:$0xff] %v2138_v58 }
 0x14f   :  { %2079 = vmatpush.bf16.msrb.mxu1 %v2984_v3  ;;  %2092 = vmatpush.bf16.msrb.mxu2 %v2988_v4  ;;  %v2139_v0 = vmax.f32 %v1853_v53, 0.0  ;;  %v2479_v3 = vld [vmem:[%s5277_s3 + $0x178] sm:$0xf] }
 0x150   :  { %2105 = vmatpush.bf16.msrb.mxu3 %v2992_v9  ;;  %2118 = vmatpush.bf16.msra.mxu0 %v2996_v10  ;;  %v3324_v4 = vld [vmem:[%s5277_s3 + $0x1f4] sm:$0xf0]  ;;  %v2343_v9 = vld [vmem:[%s5277_s3 + $0x70] sm:$0xf] }
 0x151   :  { %2171 = vst [vmem:[%s5281_s5 + $0x50] sm:$0xff] %v2139_v0  ;;  %v3291_v10 = vld [vmem:[%s5277_s3 + $0xec] sm:$0xf0]  ;;  %v2480_v11 = vor.u32 %v3324_v4, %v2479_v3  ;;  %v1841_v13 = vpop.f32.mrf.mxu2 }
 0x153   :  { %2080 = vmatpush.bf16.msrb.mxu1 %v2856_v20  ;;  %2093 = vmatpush.bf16.msrb.mxu2 %v2860_v21  ;;  %v2353_v20 = vld [vmem:[%s5277_s3 + $0xf8] sm:$0xf0]  ;;  %v2344_v21 = vor.u32 %v3291_v10, %v2343_v9 }
 0x154   :  { %2106 = vmatpush.bf16.msrb.mxu3 %v2864_v27  ;;  %2119 = vmatpush.bf16.msra.mxu0 %v2868_v28  ;;  %v1854_v17 = vpop.f32.mrf.mxu3  ;;  %v2356_v25 = vor.u32 %v3276_v19, %v2353_v20  ;;  %v384_v27 = vperm.slane %v5042_v57, 7 }
 0x157   :  { %2081 = vmatpush.bf16.msrb.mxu1 %v2728_v38  ;;  %2094 = vmatpush.bf16.msrb.mxu2 %v2732_v40 }
 0x158   :  { %2107 = vmatpush.bf16.msrb.mxu3 %v2736_v43  ;;  %2120 = vmatpush.bf16.msra.mxu0 %v2740_v44  ;;  %v362_v44 = vld [vmem:[%s5280_s4 + $0x10] sm:$0xff] }
 0x159   :  { %v385_v45 = vperm.slane %v362_v44, 0  ;;  %v388_v46 = vperm.slane %v362_v44, 3  ;;  %v386_v52 = vperm.slane %v362_v44, 1  ;;  %v387_v54 = vperm.slane %v362_v44, 2 }
 0x15a   :  { %v392_v3 = vperm.slane %v362_v44, 7  ;;  %v390_v9 = vperm.slane %v362_v44, 5 }
 0x15b   :  { %2082 = vmatpush.bf16.msrb.mxu1 %v2600_v60  ;;  %2095 = vmatpush.bf16.msrb.mxu2 %v2604_v61 }
 0x15c   :  { %2108 = vmatpush.bf16.msrb.mxu3 %v2608_v1  ;;  %2121 = vmatpush.bf16.msra.mxu0 %v2612_v2  ;;  %v389_v2 = vperm.slane %v362_v44, 4 }
 0x15f   :  { %2083 = vmatpush.bf16.msrb.mxu1 %v2472_v7  ;;  %2096 = vmatpush.bf16.msrb.mxu2 %v2476_v8 }
 0x160   :  { %2109 = vmatpush.bf16.msrb.mxu3 %v2480_v11  ;;  %2122 = vmatpush.bf16.msra.mxu0 %v2484_v12  ;;  %v391_v11 = vperm.slane %v362_v44, 6 }
 0x163   :  { %2084 = vmatpush.bf16.msrb.mxu1 %v2344_v21  ;;  %2097 = vmatpush.bf16.msrb.mxu2 %v2348_v23  ;;  %v1878_v28 = vpop.f32.mrf.mxu1  ;;  %v363_v23 = vld [vmem:[%s5280_s4 + $0x18] sm:$0xff] }
 0x164   :  { %2110 = vmatpush.bf16.msrb.mxu3 %v2352_v24  ;;  %2123 = vmatpush.bf16.msra.mxu0 %v2356_v25  ;;  %v1879_v29 = vadd.f32 %v1878_v28, %v381_v26  ;;  %v393_v24 = vperm.slane %v363_v23, 0  ;;  %v396_v25 = vperm.slane %v363_v23, 3 }
 0x166   :  { %2085 = vmatmul.bf16.vlgmr.msrb.gmra.mxu1 %v3986_v22  ;;  %2098 = vmatmul.bf16.vlgmr.msrb.gmra.mxu2 %v3986_v22  ;;  %v1917_v39 = vpop.f32.mrf.mxu0  ;;  %v2141_v31 = vmax.f32 %v1879_v29, 0.0 }
 0x167   :  { %2111 = vmatmul.bf16.vlgmr.msrb.gmra.mxu3 %v3986_v22  ;;  %2124 = vmatmul.bf16.vlgmr.msra.gmra.mxu0 %v3986_v22  ;;  %v1918_v30 = vadd.f32 %v1917_v39, %v384_v27 }
 0x168   :  { %2173 = vst [vmem:[%s5281_s5 + $0x60] sm:$0xff] %v2141_v31 }
 0x169   :  { %v2144_v33 = vmax.f32 %v1918_v30, 0.0  ;;  %v1891_v22 = vpop.f32.mrf.mxu2  ;;  %v394_v30 = vperm.slane %v363_v23, 1 }
 0x16a   :  { %v1892_v35 = vadd.f32 %v1891_v22, %v382_v32  ;;  %v395_v32 = vperm.slane %v363_v23, 2 }
 0x16b   :  { %2176 = vst [vmem:[%s5281_s5 + $0x78] sm:$0xff] %v2144_v33  ;;  %v1880_v38 = vpop.f32.mrf.mxu1 }
 0x16c   :  { %v1904_v36 = vpop.f32.mrf.mxu3  ;;  %v2142_v40 = vmax.f32 %v1892_v35, 0.0 }
 0x16d   :  { %v1905_v37 = vadd.f32 %v1904_v36, %v383_v34 }
 0x16e   :  { %v1919_v41 = vpop.f32.mrf.mxu0  ;;  %2174 = vst [vmem:[%s5281_s5 + $0x68] sm:$0xff] %v2142_v40 }
 0x16f   :  { %v2143_v42 = vmax.f32 %v1905_v37, 0.0 }
 0x171   :  { %2175 = vst [vmem:[%s5281_s5 + $0x70] sm:$0xff] %v2143_v42  ;;  %v1893_v57 = vpop.f32.mrf.mxu2 }
 0x172   :  { %v397_v57 = vperm.slane %v363_v23, 4 }
 0x174   :  { %v1906_v43 = vpop.f32.mrf.mxu3 }
 0x175   :  { %v400_v43 = vperm.slane %v363_v23, 7 }
 0x183   :  { %v1930_v47 = vpop.f32.mrf.mxu1 }
 0x184   :  { %v1931_v48 = vadd.f32 %v1930_v47, %v385_v45 }
 0x186   :  { %v1969_v49 = vpop.f32.mrf.mxu0  ;;  %v2145_v51 = vmax.f32 %v1931_v48, 0.0 }
 0x187   :  { %v1970_v50 = vadd.f32 %v1969_v49, %v388_v46  ;;  %v398_v49 = vperm.slane %v363_v23, 5 }
 0x188   :  { %2177 = vst [vmem:[%s5281_s5 + $0x80] sm:$0xff] %v2145_v51  ;;  %v399_v51 = vperm.slane %v363_v23, 6 }
 0x189   :  { %v2148_v53 = vmax.f32 %v1970_v50, 0.0  ;;  %v1943_v55 = vpop.f32.mrf.mxu2 }
 0x18a   :  { %v1944_v56 = vadd.f32 %v1943_v55, %v386_v52 }
 0x18b   :  { %2180 = vst [vmem:[%s5281_s5 + $0x98] sm:$0xff] %v2148_v53  ;;  %v1932_v60 = vpop.f32.mrf.mxu1 }
 0x18c   :  { %v1956_v58 = vpop.f32.mrf.mxu3  ;;  %v2146_v61 = vmax.f32 %v1944_v56, 0.0 }
 0x18d   :  { %v1957_v59 = vadd.f32 %v1956_v58, %v387_v54 }
 0x18e   :  { %v1971_v62 = vpop.f32.mrf.mxu0  ;;  %2178 = vst [vmem:[%s5281_s5 + $0x88] sm:$0xff] %v2146_v61 }
 0x18f   :  { %v2147_v63 = vmax.f32 %v1957_v59, 0.0 }
 0x191   :  { %2179 = vst [vmem:[%s5281_s5 + $0x90] sm:$0xff] %v2147_v63  ;;  %v1945_v0 = vpop.f32.mrf.mxu2 }
 0x194   :  { %v1958_v1 = vpop.f32.mrf.mxu3 }
 0x1a3   :  { %v1982_v4 = vpop.f32.mrf.mxu1 }
 0x1a4   :  { %v1983_v5 = vadd.f32 %v1982_v4, %v389_v2 }
 0x1a6   :  { %v2021_v6 = vpop.f32.mrf.mxu0  ;;  %v2149_v8 = vmax.f32 %v1983_v5, 0.0 }
 0x1a7   :  { %v2022_v7 = vadd.f32 %v2021_v6, %v392_v3 }
 0x1a8   :  { %2181 = vst [vmem:[%s5281_s5 + $0xa0] sm:$0xff] %v2149_v8 }
 0x1a9   :  { %v2152_v10 = vmax.f32 %v2022_v7, 0.0  ;;  %v1995_v12 = vpop.f32.mrf.mxu2 }
 0x1aa   :  { %v1996_v13 = vadd.f32 %v1995_v12, %v390_v9 }
 0x1ab   :  { %2184 = vst [vmem:[%s5281_s5 + $0xb8] sm:$0xff] %v2152_v10  ;;  %v1984_v16 = vpop.f32.mrf.mxu1 }
 0x1ac   :  { %v2008_v14 = vpop.f32.mrf.mxu3  ;;  %v2150_v17 = vmax.f32 %v1996_v13, 0.0 }
 0x1ad   :  { %v2009_v15 = vadd.f32 %v2008_v14, %v391_v11 }
 0x1ae   :  { %v2023_v18 = vpop.f32.mrf.mxu0  ;;  %2182 = vst [vmem:[%s5281_s5 + $0xa8] sm:$0xff] %v2150_v17 }
 0x1af   :  { %v2151_v19 = vmax.f32 %v2009_v15, 0.0 }
 0x1b1   :  { %2183 = vst [vmem:[%s5281_s5 + $0xb0] sm:$0xff] %v2151_v19  ;;  %v1997_v20 = vpop.f32.mrf.mxu2 }
 0x1b4   :  { %v2010_v21 = vpop.f32.mrf.mxu3 }
 0x1c3   :  { %v2034_v26 = vpop.f32.mrf.mxu1 }
 0x1c4   :  { %v2035_v27 = vadd.f32 %v2034_v26, %v393_v24 }
 0x1c6   :  { %v2073_v28 = vpop.f32.mrf.mxu0  ;;  %v2153_v39 = vmax.f32 %v2035_v27, 0.0 }
 0x1c7   :  { %v2074_v29 = vadd.f32 %v2073_v28, %v396_v25 }
 0x1c8   :  { %2185 = vst [vmem:[%s5281_s5 + $0xc0] sm:$0xff] %v2153_v39 }
 0x1c9   :  { %v2156_v31 = vmax.f32 %v2074_v29, 0.0  ;;  %v2047_v33 = vpop.f32.mrf.mxu2 }
 0x1ca   :  { %v2048_v34 = vadd.f32 %v2047_v33, %v394_v30 }
 0x1cb   :  { %2188 = vst [vmem:[%s5281_s5 + $0xd8] sm:$0xff] %v2156_v31  ;;  %v2036_v36 = vpop.f32.mrf.mxu1 }
 0x1cc   :  { %v2060_v22 = vpop.f32.mrf.mxu3  ;;  %v2154_v37 = vmax.f32 %v2048_v34, 0.0 }
 0x1cd   :  { %v2061_v35 = vadd.f32 %v2060_v22, %v395_v32 }
 0x1ce   :  { %v2075_v38 = vpop.f32.mrf.mxu0  ;;  %2186 = vst [vmem:[%s5281_s5 + $0xc8] sm:$0xff] %v2154_v37 }
 0x1cf   :  { %v2155_v40 = vmax.f32 %v2061_v35, 0.0 }
 0x1d1   :  { %2187 = vst [vmem:[%s5281_s5 + $0xd0] sm:$0xff] %v2155_v40  ;;  %v2049_v41 = vpop.f32.mrf.mxu2 }
 0x1d4   :  { %v2062_v42 = vpop.f32.mrf.mxu3 }
 0x1e3   :  { %v2086_v44 = vpop.f32.mrf.mxu1 }
 0x1e4   :  { %v2087_v45 = vadd.f32 %v2086_v44, %v397_v57  ;;  %v2125_v46 = vpop.f32.mrf.mxu0 }
 0x1e5   :  { %v2126_v47 = vadd.f32 %v2125_v46, %v400_v43 }
 0x1e6   :  { %v2157_v48 = vmax.f32 %v2087_v45, 0.0 }
 0x1e7   :  { %v2160_v50 = vmax.f32 %v2126_v47, 0.0 }
 0x1e8   :  { %2189 = vst [vmem:[%s5281_s5 + $0xe0] sm:$0xff] %v2157_v48 }
 0x1e9   :  { %2192 = vst [vmem:[%s5281_s5 + $0xf8] sm:$0xff] %v2160_v50  ;;  %v2099_v52 = vpop.f32.mrf.mxu2 }
 0x1ea   :  { %v2100_v53 = vadd.f32 %v2099_v52, %v398_v49  ;;  %v2112_v54 = vpop.f32.mrf.mxu3 }
 0x1eb   :  { %v2113_v55 = vadd.f32 %v2112_v54, %v399_v51  ;;  %v2088_v56 = vpop.f32.mrf.mxu1 }
 0x1ec   :  { %v2158_v58 = vmax.f32 %v2100_v53, 0.0  ;;  %v2127_v59 = vpop.f32.mrf.mxu0 }
 0x1ed   :  { %v2159_v60 = vmax.f32 %v2113_v55, 0.0 }
 0x1ee   :  { %2190 = vst [vmem:[%s5281_s5 + $0xe8] sm:$0xff] %v2158_v58 }
 0x1ef   :  { %2191 = vst [vmem:[%s5281_s5 + $0xf0] sm:$0xff] %v2159_v60 }
 0x1f1   :  { %v2101_v61 = vpop.f32.mrf.mxu2 }
 0x1f2   :  { %v2114_v62 = vpop.f32.mrf.mxu3 }

// kernel: a_call__.9
= control target key start
LH: loop header
LB: loop body
LE: loop exit
PB: predicated region body
PF: predicated region fallthrough
CT: control target
= control target key end

     0   :  { %s5078_s1 = inlined_call_operand.vmem [shape: bf16[4096,128], index: 1, kind: input, shape index: {}]   ;;  %s5079_s0 = inlined_call_operand.vmem [shape: bf16[8,4096], index: 0, kind: input, shape index: {}]   ;;  %s5080_s2 = inlined_call_operand.vmem [shape: f32[1,128], index: 2, kind: input, shape index: {}]   ;;  %s5081_s4 = inlined_call_operand.vmem [shape: f32[1,128], index: 4, kind: input, shape index: {}]   ;;  %s5082_s3 = inlined_call_operand.vmem [shape: bf16[128,128], index: 3, kind: input, shape index: {}]   ;;  %s5083_s5 = inlined_call_operand.vmem [shape: bf16[128,128], index: 5, kind: input, shape index: {}]   ;;  %s5084_s6 = inlined_call_operand.vmem [shape: f32[1,128], index: 6, kind: input, shape index: {}]   ;;  %s5085_s7 = inlined_call_operand.vmem [shape: f32[8,128], index: 7, kind: output, shape index: {}]  }
   0x1   :  { %v3888_v0 = vld [vmem:[%s5078_s1 + $0x38] sm:$0xff]  ;;  %v3887_v4 = vld [vmem:[%s5078_s1 + $0x30] sm:$0xff]  ;;  %v3886_v8 = vld [vmem:[%s5078_s1 + $0x28] sm:$0xff] }
   0x2   :  { %v3896_v1 = vld [vmem:[%s5078_s1 + $0x78] sm:$0xff]  ;;  %2206 = vmatpush.bf16.msra.mxu0 %v3888_v0  ;;  %v3895_v5 = vld [vmem:[%s5078_s1 + $0x70] sm:$0xff]  ;;  %v3894_v9 = vld [vmem:[%s5078_s1 + $0x68] sm:$0xff] }
   0x3   :  { %v3904_v2 = vld [vmem:[%s5078_s1 + $0xb8] sm:$0xff]  ;;  %2219 = vmatpush.bf16.msra.mxu1 %v3896_v1  ;;  %v3903_v6 = vld [vmem:[%s5078_s1 + $0xb0] sm:$0xff]  ;;  %v3902_v10 = vld [vmem:[%s5078_s1 + $0xa8] sm:$0xff] }
   0x4   :  { %v3912_v3 = vld [vmem:[%s5078_s1 + $0xf8] sm:$0xff]  ;;  %2232 = vmatpush.bf16.msra.mxu2 %v3904_v2  ;;  %v3911_v7 = vld [vmem:[%s5078_s1 + $0xf0] sm:$0xff]  ;;  %v3910_v11 = vld [vmem:[%s5078_s1 + $0xe8] sm:$0xff] }
   0x5   :  { %2245 = vmatpush.bf16.msra.mxu3 %v3912_v3  ;;  %v3885_v12 = vld [vmem:[%s5078_s1 + $0x20] sm:$0xff]  ;;  %v3884_v16 = vld [vmem:[%s5078_s1 + $0x18] sm:$0xff]  ;;  %v3883_v20 = vld [vmem:[%s5078_s1 + $0x10] sm:$0xff] }
   0x6   :  { %2207 = vmatpush.bf16.msra.mxu0 %v3887_v4  ;;  %v3893_v13 = vld [vmem:[%s5078_s1 + $0x60] sm:$0xff]  ;;  %v3892_v17 = vld [vmem:[%s5078_s1 + $0x58] sm:$0xff]  ;;  %v3891_v21 = vld [vmem:[%s5078_s1 + $0x50] sm:$0xff] }
   0x7   :  { %2220 = vmatpush.bf16.msra.mxu1 %v3895_v5  ;;  %v3901_v14 = vld [vmem:[%s5078_s1 + $0xa0] sm:$0xff]  ;;  %v3900_v18 = vld [vmem:[%s5078_s1 + $0x98] sm:$0xff]  ;;  %v3899_v22 = vld [vmem:[%s5078_s1 + $0x90] sm:$0xff] }
   0x8   :  { %2233 = vmatpush.bf16.msra.mxu2 %v3903_v6  ;;  %v3909_v15 = vld [vmem:[%s5078_s1 + $0xe0] sm:$0xff]  ;;  %v3908_v19 = vld [vmem:[%s5078_s1 + $0xd8] sm:$0xff]  ;;  %v3907_v23 = vld [vmem:[%s5078_s1 + $0xd0] sm:$0xff] }
   0x9   :  { %2246 = vmatpush.bf16.msra.mxu3 %v3911_v7  ;;  %v3882_v24 = vld [vmem:[%s5078_s1 + $0x8] sm:$0xff]  ;;  %v26_v29 = vld [vmem:[%s5079_s0] sm:$0xff]  ;;  %v3920_v38 = vld [vmem:[%s5078_s1 + $0x138] sm:$0xff] }
   0xa   :  { %2208 = vmatpush.bf16.msra.mxu0 %v3886_v8  ;;  %v3890_v25 = vld [vmem:[%s5078_s1 + $0x48] sm:$0xff]  ;;  %v3881_v30 = vld [vmem:[%s5078_s1] sm:$0xff]  ;;  %v574_v33 = vunpack.c.l.b16 %v26_v29  ;;  %v575_v37 = vunpack.c.h.b16 %v26_v29  ;;  %v3928_v39 = vld [vmem:[%s5078_s1 + $0x178] sm:$0xff] }
   0xb   :  { %2221 = vmatpush.bf16.msra.mxu1 %v3894_v9  ;;  %v3898_v26 = vld [vmem:[%s5078_s1 + $0x88] sm:$0xff]  ;;  %v3889_v31 = vld [vmem:[%s5078_s1 + $0x40] sm:$0xff]  ;;  %v3936_v40 = vld [vmem:[%s5078_s1 + $0x1b8] sm:$0xff] }
   0xc   :  { %2234 = vmatpush.bf16.msra.mxu2 %v3902_v10  ;;  %v3906_v27 = vld [vmem:[%s5078_s1 + $0xc8] sm:$0xff]  ;;  %v3897_v34 = vld [vmem:[%s5078_s1 + $0x80] sm:$0xff]  ;;  %v3944_v41 = vld [vmem:[%s5078_s1 + $0x1f8] sm:$0xff]  ;;  %v606_v43 = vpack.c.b16 %v574_v33, %v574_v33  ;;  %v607_v45 = vpack.c.b16 %v575_v37, %v575_v37 }
   0xd   :  { %2247 = vmatpush.bf16.msra.mxu3 %v3910_v11  ;;  %v27_v28 = vld [vmem:[%s5079_s0 + $0x8] sm:$0xff]  ;;  %v3905_v35 = vld [vmem:[%s5078_s1 + $0xc0] sm:$0xff]  ;;  %v3919_v46 = vld [vmem:[%s5078_s1 + $0x130] sm:$0xff] }
   0xe   :  { %2209 = vmatpush.bf16.msra.mxu0 %v3885_v12  ;;  %v576_v32 = vunpack.c.l.b16 %v27_v28  ;;  %v577_v36 = vunpack.c.h.b16 %v27_v28  ;;  %v3927_v47 = vld [vmem:[%s5078_s1 + $0x170] sm:$0xff]  ;;  %v3918_v50 = vld [vmem:[%s5078_s1 + $0x128] sm:$0xff]  ;;  %v3917_v54 = vld [vmem:[%s5078_s1 + $0x120] sm:$0xff] }
   0xf   :  { %2222 = vmatpush.bf16.msra.mxu1 %v3893_v13  ;;  %v3935_v48 = vld [vmem:[%s5078_s1 + $0x1b0] sm:$0xff]  ;;  %v3926_v51 = vld [vmem:[%s5078_s1 + $0x168] sm:$0xff]  ;;  %v3925_v55 = vld [vmem:[%s5078_s1 + $0x160] sm:$0xff] }
  0x10   :  { %2235 = vmatpush.bf16.msra.mxu2 %v3901_v14  ;;  %v608_v42 = vpack.c.b16 %v576_v32, %v576_v32  ;;  %v609_v44 = vpack.c.b16 %v577_v36, %v577_v36  ;;  %v3943_v49 = vld [vmem:[%s5078_s1 + $0x1f0] sm:$0xff]  ;;  %v3934_v52 = vld [vmem:[%s5078_s1 + $0x1a8] sm:$0xff]  ;;  %v3933_v56 = vld [vmem:[%s5078_s1 + $0x1a0] sm:$0xff] }
  0x11   :  { %2248 = vmatpush.bf16.msra.mxu3 %v3909_v15  ;;  %v3942_v53 = vld [vmem:[%s5078_s1 + $0x1e8] sm:$0xff]  ;;  %v3941_v57 = vld [vmem:[%s5078_s1 + $0x1e0] sm:$0xff]  ;;  %v3916_v58 = vld [vmem:[%s5078_s1 + $0x118] sm:$0xff] }
  0x12   :  { %2210 = vmatpush.bf16.msra.mxu0 %v3884_v16  ;;  %v3924_v59 = vld [vmem:[%s5078_s1 + $0x158] sm:$0xff]  ;;  %v3915_v62 = vld [vmem:[%s5078_s1 + $0x110] sm:$0xff]  ;;  %v3914_v2 = vld [vmem:[%s5078_s1 + $0x108] sm:$0xff] }
  0x13   :  { %2223 = vmatpush.bf16.msra.mxu1 %v3892_v17  ;;  %v3932_v60 = vld [vmem:[%s5078_s1 + $0x198] sm:$0xff]  ;;  %v3923_v63 = vld [vmem:[%s5078_s1 + $0x150] sm:$0xff]  ;;  %v3922_v3 = vld [vmem:[%s5078_s1 + $0x148] sm:$0xff] }
  0x14   :  { %2236 = vmatpush.bf16.msra.mxu2 %v3900_v18  ;;  %v3940_v61 = vld [vmem:[%s5078_s1 + $0x1d8] sm:$0xff]  ;;  %v3931_v0 = vld [vmem:[%s5078_s1 + $0x190] sm:$0xff]  ;;  %v3930_v4 = vld [vmem:[%s5078_s1 + $0x188] sm:$0xff] }
  0x15   :  { %2249 = vmatpush.bf16.msra.mxu3 %v3908_v19  ;;  %v3939_v1 = vld [vmem:[%s5078_s1 + $0x1d0] sm:$0xff]  ;;  %v3938_v5 = vld [vmem:[%s5078_s1 + $0x1c8] sm:$0xff]  ;;  %v29_v6 = vld [vmem:[%s5079_s0 + $0x18] sm:$0xff] }
  0x16   :  { %2211 = vmatpush.bf16.msra.mxu0 %v3883_v20  ;;  %v28_v7 = vld [vmem:[%s5079_s0 + $0x10] sm:$0xff]  ;;  %v3913_v8 = vld [vmem:[%s5078_s1 + $0x100] sm:$0xff]  ;;  %v580_v10 = vunpack.c.l.b16 %v29_v6  ;;  %v581_v14 = vunpack.c.h.b16 %v29_v6  ;;  %v3952_v16 = vld [vmem:[%s5078_s1 + $0x238] sm:$0xff] }
  0x17   :  { %2224 = vmatpush.bf16.msra.mxu1 %v3891_v21  ;;  %v3921_v9 = vld [vmem:[%s5078_s1 + $0x140] sm:$0xff]  ;;  %v578_v11 = vunpack.c.l.b16 %v28_v7  ;;  %v579_v15 = vunpack.c.h.b16 %v28_v7  ;;  %v3960_v17 = vld [vmem:[%s5078_s1 + $0x278] sm:$0xff]  ;;  %v3950_v28 = vld [vmem:[%s5078_s1 + $0x228] sm:$0xff] }
  0x18   :  { %2237 = vmatpush.bf16.msra.mxu2 %v3899_v22  ;;  %v3929_v12 = vld [vmem:[%s5078_s1 + $0x180] sm:$0xff]  ;;  %v3968_v18 = vld [vmem:[%s5078_s1 + $0x2b8] sm:$0xff]  ;;  %v612_v20 = vpack.c.b16 %v580_v10, %v580_v10  ;;  %v613_v22 = vpack.c.b16 %v581_v14, %v581_v14  ;;  %v3958_v29 = vld [vmem:[%s5078_s1 + $0x268] sm:$0xff] }
  0x19   :  { %2250 = vmatpush.bf16.msra.mxu3 %v3907_v23  ;;  %v3937_v13 = vld [vmem:[%s5078_s1 + $0x1c0] sm:$0xff]  ;;  %v3976_v19 = vld [vmem:[%s5078_s1 + $0x2f8] sm:$0xff]  ;;  %v610_v21 = vpack.c.b16 %v578_v11, %v578_v11  ;;  %v611_v23 = vpack.c.b16 %v579_v15, %v579_v15  ;;  %v3982_v6 = vld [vmem:[%s5078_s1 + $0x328] sm:$0xff] }
  0x1a   :  { %2212 = vmatpush.bf16.msra.mxu0 %v3882_v24  ;;  %v3951_v24 = vld [vmem:[%s5078_s1 + $0x230] sm:$0xff]  ;;  %v3949_v32 = vld [vmem:[%s5078_s1 + $0x220] sm:$0xff]  ;;  %v3948_v36 = vld [vmem:[%s5078_s1 + $0x218] sm:$0xff] }
  0x1b   :  { %2225 = vmatpush.bf16.msra.mxu1 %v3890_v25  ;;  %v3959_v25 = vld [vmem:[%s5078_s1 + $0x270] sm:$0xff]  ;;  %v3957_v33 = vld [vmem:[%s5078_s1 + $0x260] sm:$0xff]  ;;  %v3956_v37 = vld [vmem:[%s5078_s1 + $0x258] sm:$0xff] }
  0x1c   :  { %2238 = vmatpush.bf16.msra.mxu2 %v3898_v26  ;;  %v3967_v26 = vld [vmem:[%s5078_s1 + $0x2b0] sm:$0xff]  ;;  %v3990_v7 = vld [vmem:[%s5078_s1 + $0x368] sm:$0xff]  ;;  %v3981_v10 = vld [vmem:[%s5078_s1 + $0x320] sm:$0xff] }
  0x1d   :  { %2251 = vmatpush.bf16.msra.mxu3 %v3906_v27  ;;  %v3975_v27 = vld [vmem:[%s5078_s1 + $0x2f0] sm:$0xff]  ;;  %v3989_v11 = vld [vmem:[%s5078_s1 + $0x360] sm:$0xff]  ;;  %v3980_v14 = vld [vmem:[%s5078_s1 + $0x318] sm:$0xff] }
  0x1e   :  { %2213 = vmatpush.bf16.msra.mxu0 %v3881_v30  ;;  %v3966_v30 = vld [vmem:[%s5078_s1 + $0x2a8] sm:$0xff]  ;;  %v3988_v15 = vld [vmem:[%s5078_s1 + $0x358] sm:$0xff] }
  0x1f   :  { %2226 = vmatpush.bf16.msra.mxu1 %v3889_v31  ;;  %v3974_v31 = vld [vmem:[%s5078_s1 + $0x2e8] sm:$0xff] }
  0x20   :  { %2239 = vmatpush.bf16.msra.mxu2 %v3897_v34  ;;  %v3965_v34 = vld [vmem:[%s5078_s1 + $0x2a0] sm:$0xff] }
  0x21   :  { %2252 = vmatpush.bf16.msra.mxu3 %v3905_v35  ;;  %2214 = vmatmul.bf16.vlgmr.msra.gmra.mxu0 %v606_v43  ;;  %v3973_v35 = vld [vmem:[%s5078_s1 + $0x2e0] sm:$0xff]  ;;  %v3971_v43 = vld [vmem:[%s5078_s1 + $0x2d0] sm:$0xff] }
  0x22   :  { %2258 = vmatpush.bf16.msrb.mxu0 %v3920_v38  ;;  %2227 = vmatmul.bf16.vlgmr.msra.gmra.mxu1 %v607_v45  ;;  %v3964_v38 = vld [vmem:[%s5078_s1 + $0x298] sm:$0xff]  ;;  %v3954_v45 = vld [vmem:[%s5078_s1 + $0x248] sm:$0xff] }
  0x23   :  { %2271 = vmatpush.bf16.msrb.mxu1 %v3928_v39  ;;  %2240 = vmatmul.bf16.vlgmr.msra.gmra.mxu2 %v608_v42  ;;  %v3972_v39 = vld [vmem:[%s5078_s1 + $0x2d8] sm:$0xff]  ;;  %v3963_v42 = vld [vmem:[%s5078_s1 + $0x290] sm:$0xff] }
  0x24   :  { %2284 = vmatpush.bf16.msrb.mxu2 %v3936_v40  ;;  %2253 = vmatmul.bf16.vlgmr.msra.gmra.mxu3 %v609_v44  ;;  %v3947_v40 = vld [vmem:[%s5078_s1 + $0x210] sm:$0xff]  ;;  %v3946_v44 = vld [vmem:[%s5078_s1 + $0x208] sm:$0xff] }
  0x25   :  { %2297 = vmatpush.bf16.msrb.mxu3 %v3944_v41  ;;  %v3955_v41 = vld [vmem:[%s5078_s1 + $0x250] sm:$0xff] }
  0x26   :  { %2259 = vmatpush.bf16.msrb.mxu0 %v3919_v46  ;;  %v3962_v46 = vld [vmem:[%s5078_s1 + $0x288] sm:$0xff] }
  0x27   :  { %2272 = vmatpush.bf16.msrb.mxu1 %v3927_v47  ;;  %v3970_v47 = vld [vmem:[%s5078_s1 + $0x2c8] sm:$0xff] }
  0x28   :  { %2285 = vmatpush.bf16.msrb.mxu2 %v3935_v48  ;;  %v30_v48 = vld [vmem:[%s5079_s0 + $0x20] sm:$0xff] }
  0x29   :  { %2298 = vmatpush.bf16.msrb.mxu3 %v3943_v49  ;;  %v31_v49 = vld [vmem:[%s5079_s0 + $0x28] sm:$0xff] }
  0x2a   :  { %2260 = vmatpush.bf16.msrb.mxu0 %v3918_v50  ;;  %v3945_v50 = vld [vmem:[%s5078_s1 + $0x200] sm:$0xff] }
  0x2b   :  { %2273 = vmatpush.bf16.msrb.mxu1 %v3926_v51  ;;  %v3953_v51 = vld [vmem:[%s5078_s1 + $0x240] sm:$0xff] }
  0x2c   :  { %2286 = vmatpush.bf16.msrb.mxu2 %v3934_v52  ;;  %v582_v52 = vunpack.c.l.b16 %v30_v48 }
  0x2d   :  { %2299 = vmatpush.bf16.msrb.mxu3 %v3942_v53  ;;  %v584_v53 = vunpack.c.l.b16 %v31_v49 }
  0x2e   :  { %2261 = vmatpush.bf16.msrb.mxu0 %v3917_v54  ;;  %v3961_v54 = vld [vmem:[%s5078_s1 + $0x280] sm:$0xff] }
  0x2f   :  { %2274 = vmatpush.bf16.msrb.mxu1 %v3925_v55  ;;  %v3969_v55 = vld [vmem:[%s5078_s1 + $0x2c0] sm:$0xff] }
  0x30   :  { %2287 = vmatpush.bf16.msrb.mxu2 %v3933_v56  ;;  %v583_v56 = vunpack.c.h.b16 %v30_v48  ;;  %v4014_v48 = vld [vmem:[%s5078_s1 + $0x428] sm:$0xff] }
  0x31   :  { %2300 = vmatpush.bf16.msrb.mxu3 %v3941_v57  ;;  %v585_v57 = vunpack.c.h.b16 %v31_v49  ;;  %v4022_v49 = vld [vmem:[%s5078_s1 + $0x468] sm:$0xff] }
  0x32   :  { %2262 = vmatpush.bf16.msrb.mxu0 %v3916_v58  ;;  %v3984_v58 = vld [vmem:[%s5078_s1 + $0x338] sm:$0xff] }
  0x33   :  { %2275 = vmatpush.bf16.msrb.mxu1 %v3924_v59  ;;  %v3992_v59 = vld [vmem:[%s5078_s1 + $0x378] sm:$0xff] }
  0x34   :  { %2288 = vmatpush.bf16.msrb.mxu2 %v3932_v60  ;;  %v4000_v60 = vld [vmem:[%s5078_s1 + $0x3b8] sm:$0xff] }
  0x35   :  { %2301 = vmatpush.bf16.msrb.mxu3 %v3940_v61  ;;  %v4008_v61 = vld [vmem:[%s5078_s1 + $0x3f8] sm:$0xff] }
  0x36   :  { %2263 = vmatpush.bf16.msrb.mxu0 %v3915_v62  ;;  %v614_v62 = vpack.c.b16 %v582_v52, %v582_v52  ;;  %v4013_v52 = vld [vmem:[%s5078_s1 + $0x420] sm:$0xff] }
  0x37   :  { %2276 = vmatpush.bf16.msrb.mxu1 %v3923_v63  ;;  %v616_v63 = vpack.c.b16 %v584_v53, %v584_v53  ;;  %v4021_v53 = vld [vmem:[%s5078_s1 + $0x460] sm:$0xff] }
  0x38   :  { %2289 = vmatpush.bf16.msrb.mxu2 %v3931_v0  ;;  %v615_v0 = vpack.c.b16 %v583_v56, %v583_v56  ;;  %v4012_v56 = vld [vmem:[%s5078_s1 + $0x418] sm:$0xff] }
  0x39   :  { %2302 = vmatpush.bf16.msrb.mxu3 %v3939_v1  ;;  %v617_v1 = vpack.c.b16 %v585_v57, %v585_v57  ;;  %v4020_v57 = vld [vmem:[%s5078_s1 + $0x458] sm:$0xff] }
  0x3a   :  { %2264 = vmatpush.bf16.msrb.mxu0 %v3914_v2  ;;  %v3983_v2 = vld [vmem:[%s5078_s1 + $0x330] sm:$0xff] }
  0x3b   :  { %2277 = vmatpush.bf16.msrb.mxu1 %v3922_v3  ;;  %v3991_v3 = vld [vmem:[%s5078_s1 + $0x370] sm:$0xff] }
  0x3c   :  { %2290 = vmatpush.bf16.msrb.mxu2 %v3930_v4  ;;  %v3999_v4 = vld [vmem:[%s5078_s1 + $0x3b0] sm:$0xff] }
  0x3d   :  { %2303 = vmatpush.bf16.msrb.mxu3 %v3938_v5  ;;  %v4007_v5 = vld [vmem:[%s5078_s1 + $0x3f0] sm:$0xff] }
  0x3e   :  { %2265 = vmatpush.bf16.msrb.mxu0 %v3913_v8  ;;  %v3998_v8 = vld [vmem:[%s5078_s1 + $0x3a8] sm:$0xff] }
  0x3f   :  { %2278 = vmatpush.bf16.msrb.mxu1 %v3921_v9  ;;  %v4006_v9 = vld [vmem:[%s5078_s1 + $0x3e8] sm:$0xff] }
  0x40   :  { %2291 = vmatpush.bf16.msrb.mxu2 %v3929_v12  ;;  %v3997_v12 = vld [vmem:[%s5078_s1 + $0x3a0] sm:$0xff] }
  0x41   :  { %2304 = vmatpush.bf16.msrb.mxu3 %v3937_v13  ;;  %2266 = vmatmul.bf16.vlgmr.msrb.gmra.mxu0 %v610_v21  ;;  %v4005_v13 = vld [vmem:[%s5078_s1 + $0x3e0] sm:$0xff]  ;;  %v4003_v21 = vld [vmem:[%s5078_s1 + $0x3d0] sm:$0xff] }
  0x42   :  { %2310 = vmatpush.bf16.msra.mxu0 %v3952_v16  ;;  %2279 = vmatmul.bf16.vlgmr.msrb.gmra.mxu1 %v611_v23  ;;  %v3996_v16 = vld [vmem:[%s5078_s1 + $0x398] sm:$0xff]  ;;  %v3986_v23 = vld [vmem:[%s5078_s1 + $0x348] sm:$0xff] }
  0x43   :  { %2323 = vmatpush.bf16.msra.mxu1 %v3960_v17  ;;  %2292 = vmatmul.bf16.vlgmr.msrb.gmra.mxu2 %v612_v20  ;;  %v4004_v17 = vld [vmem:[%s5078_s1 + $0x3d8] sm:$0xff]  ;;  %v3995_v20 = vld [vmem:[%s5078_s1 + $0x390] sm:$0xff] }
  0x44   :  { %2336 = vmatpush.bf16.msra.mxu2 %v3968_v18  ;;  %2305 = vmatmul.bf16.vlgmr.msrb.gmra.mxu3 %v613_v22  ;;  %v3979_v18 = vld [vmem:[%s5078_s1 + $0x310] sm:$0xff]  ;;  %v3978_v22 = vld [vmem:[%s5078_s1 + $0x308] sm:$0xff] }
  0x45   :  { %2349 = vmatpush.bf16.msra.mxu3 %v3976_v19  ;;  %v3987_v19 = vld [vmem:[%s5078_s1 + $0x350] sm:$0xff] }
  0x46   :  { %2311 = vmatpush.bf16.msra.mxu0 %v3951_v24  ;;  %v3994_v24 = vld [vmem:[%s5078_s1 + $0x388] sm:$0xff] }
  0x47   :  { %2324 = vmatpush.bf16.msra.mxu1 %v3959_v25  ;;  %v4002_v25 = vld [vmem:[%s5078_s1 + $0x3c8] sm:$0xff] }
  0x48   :  { %2337 = vmatpush.bf16.msra.mxu2 %v3967_v26  ;;  %v32_v26 = vld [vmem:[%s5079_s0 + $0x30] sm:$0xff] }
  0x49   :  { %2350 = vmatpush.bf16.msra.mxu3 %v3975_v27  ;;  %v33_v27 = vld [vmem:[%s5079_s0 + $0x38] sm:$0xff] }
  0x4a   :  { %2312 = vmatpush.bf16.msra.mxu0 %v3950_v28  ;;  %v3977_v28 = vld [vmem:[%s5078_s1 + $0x300] sm:$0xff] }
  0x4b   :  { %2325 = vmatpush.bf16.msra.mxu1 %v3958_v29  ;;  %v3985_v29 = vld [vmem:[%s5078_s1 + $0x340] sm:$0xff] }
  0x4c   :  { %2338 = vmatpush.bf16.msra.mxu2 %v3966_v30  ;;  %v586_v30 = vunpack.c.l.b16 %v32_v26 }
  0x4d   :  { %2351 = vmatpush.bf16.msra.mxu3 %v3974_v31  ;;  %v588_v31 = vunpack.c.l.b16 %v33_v27 }
  0x4e   :  { %2313 = vmatpush.bf16.msra.mxu0 %v3949_v32  ;;  %v3993_v32 = vld [vmem:[%s5078_s1 + $0x380] sm:$0xff] }
  0x4f   :  { %2326 = vmatpush.bf16.msra.mxu1 %v3957_v33  ;;  %v4001_v33 = vld [vmem:[%s5078_s1 + $0x3c0] sm:$0xff] }
  0x50   :  { %2339 = vmatpush.bf16.msra.mxu2 %v3965_v34  ;;  %v587_v34 = vunpack.c.h.b16 %v32_v26  ;;  %v4046_v26 = vld [vmem:[%s5078_s1 + $0x528] sm:$0xff] }
  0x51   :  { %2352 = vmatpush.bf16.msra.mxu3 %v3973_v35  ;;  %v589_v35 = vunpack.c.h.b16 %v33_v27  ;;  %v4054_v27 = vld [vmem:[%s5078_s1 + $0x568] sm:$0xff] }
  0x52   :  { %2314 = vmatpush.bf16.msra.mxu0 %v3948_v36  ;;  %v4016_v36 = vld [vmem:[%s5078_s1 + $0x438] sm:$0xff] }
  0x53   :  { %2327 = vmatpush.bf16.msra.mxu1 %v3956_v37  ;;  %v4024_v37 = vld [vmem:[%s5078_s1 + $0x478] sm:$0xff] }
  0x54   :  { %2340 = vmatpush.bf16.msra.mxu2 %v3964_v38  ;;  %v4032_v38 = vld [vmem:[%s5078_s1 + $0x4b8] sm:$0xff] }
  0x55   :  { %2353 = vmatpush.bf16.msra.mxu3 %v3972_v39  ;;  %v4040_v39 = vld [vmem:[%s5078_s1 + $0x4f8] sm:$0xff] }
  0x56   :  { %2315 = vmatpush.bf16.msra.mxu0 %v3947_v40  ;;  %v618_v40 = vpack.c.b16 %v586_v30, %v586_v30  ;;  %v4070_v30 = vld [vmem:[%s5078_s1 + $0x5e8] sm:$0xff] }
  0x57   :  { %2328 = vmatpush.bf16.msra.mxu1 %v3955_v41  ;;  %v620_v41 = vpack.c.b16 %v588_v31, %v588_v31 }
  0x58   :  { %2341 = vmatpush.bf16.msra.mxu2 %v3963_v42  ;;  %v619_v42 = vpack.c.b16 %v587_v34, %v587_v34 }
  0x59   :  { %2354 = vmatpush.bf16.msra.mxu3 %v3971_v43  ;;  %v621_v43 = vpack.c.b16 %v589_v35, %v589_v35 }
  0x5a   :  { %2316 = vmatpush.bf16.msra.mxu0 %v3946_v44  ;;  %v4015_v44 = vld [vmem:[%s5078_s1 + $0x430] sm:$0xff] }
  0x5b   :  { %2329 = vmatpush.bf16.msra.mxu1 %v3954_v45  ;;  %v4023_v45 = vld [vmem:[%s5078_s1 + $0x470] sm:$0xff] }
  0x5c   :  { %2342 = vmatpush.bf16.msra.mxu2 %v3962_v46  ;;  %v4031_v46 = vld [vmem:[%s5078_s1 + $0x4b0] sm:$0xff] }
  0x5d   :  { %2355 = vmatpush.bf16.msra.mxu3 %v3970_v47  ;;  %v4039_v47 = vld [vmem:[%s5078_s1 + $0x4f0] sm:$0xff] }
  0x5e   :  { %2317 = vmatpush.bf16.msra.mxu0 %v3945_v50  ;;  %v4030_v50 = vld [vmem:[%s5078_s1 + $0x4a8] sm:$0xff] }
  0x5f   :  { %2330 = vmatpush.bf16.msra.mxu1 %v3953_v51  ;;  %v4038_v51 = vld [vmem:[%s5078_s1 + $0x4e8] sm:$0xff] }
  0x60   :  { %2343 = vmatpush.bf16.msra.mxu2 %v3961_v54  ;;  %v4029_v54 = vld [vmem:[%s5078_s1 + $0x4a0] sm:$0xff] }
  0x61   :  { %2356 = vmatpush.bf16.msra.mxu3 %v3969_v55  ;;  %2318 = vmatmul.bf16.vlgmr.msra.gmra.mxu0 %v614_v62  ;;  %v4037_v55 = vld [vmem:[%s5078_s1 + $0x4e0] sm:$0xff]  ;;  %v4027_v62 = vld [vmem:[%s5078_s1 + $0x490] sm:$0xff] }
  0x62   :  { %2362 = vmatpush.bf16.msrb.mxu0 %v3984_v58  ;;  %2331 = vmatmul.bf16.vlgmr.msra.gmra.mxu1 %v615_v0  ;;  %v4028_v58 = vld [vmem:[%s5078_s1 + $0x498] sm:$0xff]  ;;  %v4010_v0 = vld [vmem:[%s5078_s1 + $0x408] sm:$0xff] }
  0x63   :  { %2375 = vmatpush.bf16.msrb.mxu1 %v3992_v59  ;;  %2344 = vmatmul.bf16.vlgmr.msra.gmra.mxu2 %v616_v63  ;;  %v4036_v59 = vld [vmem:[%s5078_s1 + $0x4d8] sm:$0xff]  ;;  %v4035_v63 = vld [vmem:[%s5078_s1 + $0x4d0] sm:$0xff] }
  0x64   :  { %2388 = vmatpush.bf16.msrb.mxu2 %v4000_v60  ;;  %2357 = vmatmul.bf16.vlgmr.msra.gmra.mxu3 %v617_v1  ;;  %v4011_v60 = vld [vmem:[%s5078_s1 + $0x410] sm:$0xff]  ;;  %v4018_v1 = vld [vmem:[%s5078_s1 + $0x448] sm:$0xff] }
  0x65   :  { %2401 = vmatpush.bf16.msrb.mxu3 %v4008_v61  ;;  %v4019_v61 = vld [vmem:[%s5078_s1 + $0x450] sm:$0xff] }
  0x66   :  { %2363 = vmatpush.bf16.msrb.mxu0 %v3983_v2  ;;  %v4026_v2 = vld [vmem:[%s5078_s1 + $0x488] sm:$0xff] }
  0x67   :  { %2376 = vmatpush.bf16.msrb.mxu1 %v3991_v3  ;;  %v4034_v3 = vld [vmem:[%s5078_s1 + $0x4c8] sm:$0xff] }
  0x68   :  { %2389 = vmatpush.bf16.msrb.mxu2 %v3999_v4  ;;  %v34_v4 = vld [vmem:[%s5079_s0 + $0x40] sm:$0xff] }
  0x69   :  { %2402 = vmatpush.bf16.msrb.mxu3 %v4007_v5  ;;  %v35_v5 = vld [vmem:[%s5079_s0 + $0x48] sm:$0xff] }
  0x6a   :  { %2364 = vmatpush.bf16.msrb.mxu0 %v3982_v6  ;;  %v4009_v6 = vld [vmem:[%s5078_s1 + $0x400] sm:$0xff] }
  0x6b   :  { %2377 = vmatpush.bf16.msrb.mxu1 %v3990_v7  ;;  %v4017_v7 = vld [vmem:[%s5078_s1 + $0x440] sm:$0xff] }
  0x6c   :  { %2390 = vmatpush.bf16.msrb.mxu2 %v3998_v8  ;;  %v590_v8 = vunpack.c.l.b16 %v34_v4 }
  0x6d   :  { %2403 = vmatpush.bf16.msrb.mxu3 %v4006_v9  ;;  %v592_v9 = vunpack.c.l.b16 %v35_v5 }
  0x6e   :  { %2365 = vmatpush.bf16.msrb.mxu0 %v3981_v10  ;;  %v4025_v10 = vld [vmem:[%s5078_s1 + $0x480] sm:$0xff] }
  0x6f   :  { %2378 = vmatpush.bf16.msrb.mxu1 %v3989_v11  ;;  %v4033_v11 = vld [vmem:[%s5078_s1 + $0x4c0] sm:$0xff] }
  0x70   :  { %2391 = vmatpush.bf16.msrb.mxu2 %v3997_v12  ;;  %v591_v12 = vunpack.c.h.b16 %v34_v4 }
  0x71   :  { %2404 = vmatpush.bf16.msrb.mxu3 %v4005_v13  ;;  %v593_v13 = vunpack.c.h.b16 %v35_v5  ;;  %v4080_v5 = vld [vmem:[%s5078_s1 + $0x638] sm:$0xff] }
  0x72   :  { %2366 = vmatpush.bf16.msrb.mxu0 %v3980_v14  ;;  %v4048_v14 = vld [vmem:[%s5078_s1 + $0x538] sm:$0xff] }
  0x73   :  { %2379 = vmatpush.bf16.msrb.mxu1 %v3988_v15  ;;  %v4056_v15 = vld [vmem:[%s5078_s1 + $0x578] sm:$0xff] }
  0x74   :  { %2392 = vmatpush.bf16.msrb.mxu2 %v3996_v16  ;;  %v4064_v16 = vld [vmem:[%s5078_s1 + $0x5b8] sm:$0xff] }
  0x75   :  { %2405 = vmatpush.bf16.msrb.mxu3 %v4004_v17  ;;  %v4072_v17 = vld [vmem:[%s5078_s1 + $0x5f8] sm:$0xff] }
  0x76   :  { %2367 = vmatpush.bf16.msrb.mxu0 %v3979_v18  ;;  %v622_v18 = vpack.c.b16 %v590_v8, %v590_v8  ;;  %v4104_v8 = vld [vmem:[%s5078_s1 + $0x6f8] sm:$0xff] }
  0x77   :  { %2380 = vmatpush.bf16.msrb.mxu1 %v3987_v19  ;;  %v624_v19 = vpack.c.b16 %v592_v9, %v592_v9 }
  0x78   :  { %2393 = vmatpush.bf16.msrb.mxu2 %v3995_v20  ;;  %v623_v20 = vpack.c.b16 %v591_v12, %v591_v12 }
  0x79   :  { %2406 = vmatpush.bf16.msrb.mxu3 %v4003_v21  ;;  %v625_v21 = vpack.c.b16 %v593_v13, %v593_v13  ;;  %v4079_v13 = vld [vmem:[%s5078_s1 + $0x630] sm:$0xff] }
  0x7a   :  { %2368 = vmatpush.bf16.msrb.mxu0 %v3978_v22  ;;  %v4047_v22 = vld [vmem:[%s5078_s1 + $0x530] sm:$0xff] }
  0x7b   :  { %2381 = vmatpush.bf16.msrb.mxu1 %v3986_v23  ;;  %v4055_v23 = vld [vmem:[%s5078_s1 + $0x570] sm:$0xff] }
  0x7c   :  { %2394 = vmatpush.bf16.msrb.mxu2 %v3994_v24  ;;  %v4063_v24 = vld [vmem:[%s5078_s1 + $0x5b0] sm:$0xff] }
  0x7d   :  { %2407 = vmatpush.bf16.msrb.mxu3 %v4002_v25  ;;  %v4071_v25 = vld [vmem:[%s5078_s1 + $0x5f0] sm:$0xff] }
  0x7e   :  { %2369 = vmatpush.bf16.msrb.mxu0 %v3977_v28  ;;  %v4153_v28 = vld [vmem:[%s5080_s2] ss:$0 sm:$0xff] }
  0x7f   :  { %2382 = vmatpush.bf16.msrb.mxu1 %v3985_v29  ;;  %v4062_v29 = vld [vmem:[%s5078_s1 + $0x5a8] sm:$0xff] }
  0x80   :  { %2395 = vmatpush.bf16.msrb.mxu2 %v3993_v32  ;;  %v4045_v32 = vld [vmem:[%s5078_s1 + $0x520] sm:$0xff] }
  0x81   :  { %2408 = vmatpush.bf16.msrb.mxu3 %v4001_v33  ;;  %2370 = vmatmul.bf16.vlgmr.msrb.gmra.mxu0 %v618_v40  ;;  %v4053_v33 = vld [vmem:[%s5078_s1 + $0x560] sm:$0xff]  ;;  %v4052_v40 = vld [vmem:[%s5078_s1 + $0x558] sm:$0xff] }
  0x82   :  { %2414 = vmatpush.bf16.msra.mxu0 %v4016_v36  ;;  %2383 = vmatmul.bf16.vlgmr.msrb.gmra.mxu1 %v619_v42  ;;  %v4061_v36 = vld [vmem:[%s5078_s1 + $0x5a0] sm:$0xff]  ;;  %v4068_v42 = vld [vmem:[%s5078_s1 + $0x5d8] sm:$0xff] }
  0x83   :  { %2427 = vmatpush.bf16.msra.mxu1 %v4024_v37  ;;  %2396 = vmatmul.bf16.vlgmr.msrb.gmra.mxu2 %v620_v41  ;;  %v4069_v37 = vld [vmem:[%s5078_s1 + $0x5e0] sm:$0xff]  ;;  %v4060_v41 = vld [vmem:[%s5078_s1 + $0x598] sm:$0xff] }
  0x84   :  { %2440 = vmatpush.bf16.msra.mxu2 %v4032_v38  ;;  %2409 = vmatmul.bf16.vlgmr.msrb.gmra.mxu3 %v621_v43 }
  0x85   :  { %2453 = vmatpush.bf16.msra.mxu3 %v4040_v39  ;;  %v4044_v39 = vld [vmem:[%s5078_s1 + $0x518] sm:$0xff] }
  0x86   :  { %2415 = vmatpush.bf16.msra.mxu0 %v4015_v44 }
  0x87   :  { %2428 = vmatpush.bf16.msra.mxu1 %v4023_v45 }
  0x88   :  { %2441 = vmatpush.bf16.msra.mxu2 %v4031_v46 }
  0x89   :  { %2454 = vmatpush.bf16.msra.mxu3 %v4039_v47  ;;  %v4043_v47 = vld [vmem:[%s5078_s1 + $0x510] sm:$0xff] }
  0x8a   :  { %2416 = vmatpush.bf16.msra.mxu0 %v4014_v48  ;;  %v4051_v48 = vld [vmem:[%s5078_s1 + $0x550] sm:$0xff] }
  0x8b   :  { %2429 = vmatpush.bf16.msra.mxu1 %v4022_v49 }
  0x8c   :  { %2442 = vmatpush.bf16.msra.mxu2 %v4030_v50 }
  0x8d   :  { %2455 = vmatpush.bf16.msra.mxu3 %v4038_v51  ;;  %v4059_v51 = vld [vmem:[%s5078_s1 + $0x590] sm:$0xff] }
  0x8e   :  { %2417 = vmatpush.bf16.msra.mxu0 %v4013_v52  ;;  %v4067_v52 = vld [vmem:[%s5078_s1 + $0x5d0] sm:$0xff] }
  0x8f   :  { %2430 = vmatpush.bf16.msra.mxu1 %v4021_v53  ;;  %v4042_v53 = vld [vmem:[%s5078_s1 + $0x508] sm:$0xff] }
  0x90   :  { %2443 = vmatpush.bf16.msra.mxu2 %v4029_v54  ;;  %v4050_v54 = vld [vmem:[%s5078_s1 + $0x548] sm:$0xff] }
  0x91   :  { %2456 = vmatpush.bf16.msra.mxu3 %v4037_v55  ;;  %v4058_v55 = vld [vmem:[%s5078_s1 + $0x588] sm:$0xff] }
  0x92   :  { %2418 = vmatpush.bf16.msra.mxu0 %v4012_v56  ;;  %v4066_v56 = vld [vmem:[%s5078_s1 + $0x5c8] sm:$0xff] }
  0x93   :  { %2431 = vmatpush.bf16.msra.mxu1 %v4020_v57  ;;  %v36_v57 = vld [vmem:[%s5079_s0 + $0x50] sm:$0xff] }
  0x94   :  { %2444 = vmatpush.bf16.msra.mxu2 %v4028_v58  ;;  %v37_v58 = vld [vmem:[%s5079_s0 + $0x58] sm:$0xff] }
  0x95   :  { %2457 = vmatpush.bf16.msra.mxu3 %v4036_v59  ;;  %v597_v4 = vunpack.c.h.b16 %v37_v58 }
  0x96   :  { %2419 = vmatpush.bf16.msra.mxu0 %v4011_v60 }
  0x97   :  { %2432 = vmatpush.bf16.msra.mxu1 %v4019_v61  ;;  %v4041_v61 = vld [vmem:[%s5078_s1 + $0x500] sm:$0xff]  ;;  %v629_v12 = vpack.c.b16 %v597_v4, %v597_v4  ;;  %v4119_v4 = vld [vmem:[%s5078_s1 + $0x770] sm:$0xff] }
  0x98   :  { %2445 = vmatpush.bf16.msra.mxu2 %v4027_v62  ;;  %v4049_v62 = vld [vmem:[%s5078_s1 + $0x540] sm:$0xff] }
  0x99   :  { %2458 = vmatpush.bf16.msra.mxu3 %v4035_v63  ;;  %v594_v63 = vunpack.c.l.b16 %v36_v57 }
  0x9a   :  { %2420 = vmatpush.bf16.msra.mxu0 %v4010_v0  ;;  %v596_v0 = vunpack.c.l.b16 %v37_v58 }
  0x9b   :  { %2433 = vmatpush.bf16.msra.mxu1 %v4018_v1  ;;  %v4057_v1 = vld [vmem:[%s5078_s1 + $0x580] sm:$0xff]  ;;  %v626_v9 = vpack.c.b16 %v594_v63, %v594_v63 }
  0x9c   :  { %2446 = vmatpush.bf16.msra.mxu2 %v4026_v2  ;;  %v4065_v2 = vld [vmem:[%s5078_s1 + $0x5c0] sm:$0xff] }
  0x9d   :  { %2459 = vmatpush.bf16.msra.mxu3 %v4034_v3  ;;  %v595_v3 = vunpack.c.h.b16 %v36_v57 }
  0x9e   :  { %2421 = vmatpush.bf16.msra.mxu0 %v4009_v6  ;;  %v2215_v31 = vpop.f32.mrf.mxu0  ;;  %v4088_v6 = vld [vmem:[%s5078_s1 + $0x678] sm:$0xff] }
  0x9f   :  { %2434 = vmatpush.bf16.msra.mxu1 %v4017_v7  ;;  %v2216_v34 = vadd.f32 %v4153_v28, %v2215_v31  ;;  %v2228_v35 = vpop.f32.mrf.mxu1  ;;  %v4096_v7 = vld [vmem:[%s5078_s1 + $0x6b8] sm:$0xff] }
  0xa0   :  { %2447 = vmatpush.bf16.msra.mxu2 %v4025_v10  ;;  %v628_v10 = vpack.c.b16 %v596_v0, %v596_v0  ;;  %v4092_v31 = vld [vmem:[%s5078_s1 + $0x698] sm:$0xff] }
  0xa1   :  { %2460 = vmatpush.bf16.msra.mxu3 %v4033_v11  ;;  %2422 = vmatmul.bf16.vlgmr.msra.gmra.mxu0 %v622_v18  ;;  %v2229_v38 = vadd.f32 %v2228_v35, %v2216_v34  ;;  %v627_v11 = vpack.c.b16 %v595_v3, %v595_v3  ;;  %v4086_v18 = vld [vmem:[%s5078_s1 + $0x668] sm:$0xff]  ;;  %v4111_v3 = vld [vmem:[%s5078_s1 + $0x730] sm:$0xff] }
  0xa2   :  { %2466 = vmatpush.bf16.msrb.mxu0 %v4048_v14  ;;  %2435 = vmatmul.bf16.vlgmr.msra.gmra.mxu1 %v623_v20  ;;  %v4087_v14 = vld [vmem:[%s5078_s1 + $0x670] sm:$0xff]  ;;  %v4102_v20 = vld [vmem:[%s5078_s1 + $0x6e8] sm:$0xff] }
  0xa3   :  { %2479 = vmatpush.bf16.msrb.mxu1 %v4056_v15  ;;  %2448 = vmatmul.bf16.vlgmr.msra.gmra.mxu2 %v624_v19  ;;  %v4095_v15 = vld [vmem:[%s5078_s1 + $0x6b0] sm:$0xff]  ;;  %v4094_v19 = vld [vmem:[%s5078_s1 + $0x6a8] sm:$0xff] }
  0xa4   :  { %2492 = vmatpush.bf16.msrb.mxu2 %v4064_v16  ;;  %2461 = vmatmul.bf16.vlgmr.msra.gmra.mxu3 %v625_v21  ;;  %v4103_v16 = vld [vmem:[%s5078_s1 + $0x6f0] sm:$0xff] }
  0xa5   :  { %2505 = vmatpush.bf16.msrb.mxu3 %v4072_v17  ;;  %v4078_v17 = vld [vmem:[%s5078_s1 + $0x628] sm:$0xff] }
  0xa6   :  { %2467 = vmatpush.bf16.msrb.mxu0 %v4047_v22  ;;  %v2241_v43 = vpop.f32.mrf.mxu2  ;;  %v2217_v46 = vpop.f32.mrf.mxu0  ;;  %v4077_v22 = vld [vmem:[%s5078_s1 + $0x620] sm:$0xff] }
  0xa7   :  { %2480 = vmatpush.bf16.msrb.mxu1 %v4055_v23  ;;  %v2242_v44 = vadd.f32 %v2241_v43, %v2229_v38  ;;  %v2254_v45 = vpop.f32.mrf.mxu3  ;;  %v2230_v50 = vpop.f32.mrf.mxu1  ;;  %v4085_v23 = vld [vmem:[%s5078_s1 + $0x660] sm:$0xff]  ;;  %v4083_v38 = vld [vmem:[%s5078_s1 + $0x650] sm:$0xff]  ;;  %v4074_v43 = vld [vmem:[%s5078_s1 + $0x608] sm:$0xff] }
  0xa8   :  { %2493 = vmatpush.bf16.msrb.mxu2 %v4063_v24  ;;  %v4098_v46 = vld [vmem:[%s5078_s1 + $0x6c8] sm:$0xff] }
  0xa9   :  { %2506 = vmatpush.bf16.msrb.mxu3 %v4071_v25  ;;  %v4775_v49 = vadd.f32 %v2254_v45, %v2242_v44  ;;  %v4082_v44 = vld [vmem:[%s5078_s1 + $0x648] sm:$0xff] }
  0xaa   :  { %2468 = vmatpush.bf16.msrb.mxu0 %v4046_v26  ;;  %v4093_v26 = vld [vmem:[%s5078_s1 + $0x6a0] sm:$0xff]  ;;  %v4090_v45 = vld [vmem:[%s5078_s1 + $0x688] sm:$0xff] }
  0xab   :  { %2481 = vmatpush.bf16.msrb.mxu1 %v4054_v27  ;;  %v4101_v27 = vld [vmem:[%s5078_s1 + $0x6e0] sm:$0xff] }
  0xac   :  { %2494 = vmatpush.bf16.msrb.mxu2 %v4062_v29  ;;  %v4076_v29 = vld [vmem:[%s5078_s1 + $0x618] sm:$0xff] }
  0xad   :  { %2507 = vmatpush.bf16.msrb.mxu3 %v4070_v30  ;;  %v4084_v30 = vld [vmem:[%s5078_s1 + $0x658] sm:$0xff] }
  0xae   :  { %2469 = vmatpush.bf16.msrb.mxu0 %v4045_v32  ;;  %v2243_v59 = vpop.f32.mrf.mxu2  ;;  %v4100_v32 = vld [vmem:[%s5078_s1 + $0x6d8] sm:$0xff] }
  0xaf   :  { %2482 = vmatpush.bf16.msrb.mxu1 %v4053_v33  ;;  %v2256_v60 = vpop.f32.mrf.mxu3  ;;  %v4112_v59 = vld [vmem:[%s5078_s1 + $0x738] sm:$0xff] }
  0xb0   :  { %2495 = vmatpush.bf16.msrb.mxu2 %v4061_v36  ;;  %v4120_v60 = vld [vmem:[%s5078_s1 + $0x778] sm:$0xff] }
  0xb1   :  { %2508 = vmatpush.bf16.msrb.mxu3 %v4069_v37  ;;  %v4075_v37 = vld [vmem:[%s5078_s1 + $0x610] sm:$0xff] }
  0xb2   :  { %2470 = vmatpush.bf16.msrb.mxu0 %v4044_v39 }
  0xb3   :  { %2483 = vmatpush.bf16.msrb.mxu1 %v4052_v40 }
  0xb4   :  { %2496 = vmatpush.bf16.msrb.mxu2 %v4060_v41  ;;  %v4091_v41 = vld [vmem:[%s5078_s1 + $0x690] sm:$0xff] }
  0xb5   :  { %2509 = vmatpush.bf16.msrb.mxu3 %v4068_v42  ;;  %v4099_v42 = vld [vmem:[%s5078_s1 + $0x6d0] sm:$0xff] }
  0xb6   :  { %2471 = vmatpush.bf16.msrb.mxu0 %v4043_v47  ;;  %v38_v47 = vld [vmem:[%s5079_s0 + $0x60] sm:$0xff] }
  0xb7   :  { %2484 = vmatpush.bf16.msrb.mxu1 %v4051_v48  ;;  %v39_v48 = vld [vmem:[%s5079_s0 + $0x68] sm:$0xff]  ;;  %v599_v57 = vunpack.c.h.b16 %v38_v47 }
  0xb8   :  { %2497 = vmatpush.bf16.msrb.mxu2 %v4059_v51  ;;  %v4073_v51 = vld [vmem:[%s5078_s1 + $0x600] sm:$0xff]  ;;  %v601_v58 = vunpack.c.h.b16 %v39_v48 }
  0xb9   :  { %2510 = vmatpush.bf16.msrb.mxu3 %v4067_v52  ;;  %v4081_v52 = vld [vmem:[%s5078_s1 + $0x640] sm:$0xff] }
  0xba   :  { %2472 = vmatpush.bf16.msrb.mxu0 %v4042_v53  ;;  %v598_v53 = vunpack.c.l.b16 %v38_v47  ;;  %v4121_v47 = vld [vmem:[%s5078_s1 + $0x780] sm:$0xff] }
  0xbb   :  { %2485 = vmatpush.bf16.msrb.mxu1 %v4050_v54  ;;  %v600_v54 = vunpack.c.l.b16 %v39_v48  ;;  %v4129_v48 = vld [vmem:[%s5078_s1 + $0x7c0] sm:$0xff] }
  0xbc   :  { %2498 = vmatpush.bf16.msrb.mxu2 %v4058_v55  ;;  %v4089_v55 = vld [vmem:[%s5078_s1 + $0x680] sm:$0xff]  ;;  %v630_v63 = vpack.c.b16 %v598_v53, %v598_v53 }
  0xbd   :  { %2511 = vmatpush.bf16.msrb.mxu3 %v4066_v56  ;;  %v4097_v56 = vld [vmem:[%s5078_s1 + $0x6c0] sm:$0xff]  ;;  %v632_v0 = vpack.c.b16 %v600_v54, %v600_v54 }
  0xbe   :  { %2473 = vmatpush.bf16.msrb.mxu0 %v4041_v61  ;;  %v2267_v21 = vpop.f32.mrf.mxu0  ;;  %v4128_v61 = vld [vmem:[%s5078_s1 + $0x7b8] sm:$0xff] }
  0xbf   :  { %2486 = vmatpush.bf16.msrb.mxu1 %v4049_v62  ;;  %v2268_v24 = vadd.f32 %v2267_v21, %v4775_v49  ;;  %v2280_v25 = vpop.f32.mrf.mxu1  ;;  %v4136_v62 = vld [vmem:[%s5078_s1 + $0x7f8] sm:$0xff] }
  0xc0   :  { %2499 = vmatpush.bf16.msrb.mxu2 %v4057_v1  ;;  %v631_v1 = vpack.c.b16 %v599_v57, %v599_v57  ;;  %v4124_v21 = vld [vmem:[%s5078_s1 + $0x798] sm:$0xff] }
  0xc1   :  { %2512 = vmatpush.bf16.msrb.mxu3 %v4065_v2  ;;  %2474 = vmatmul.bf16.vlgmr.msrb.gmra.mxu0 %v626_v9  ;;  %v2281_v28 = vadd.f32 %v2280_v25, %v2268_v24  ;;  %v633_v2 = vpack.c.b16 %v601_v58, %v601_v58  ;;  %v4126_v9 = vld [vmem:[%s5078_s1 + $0x7a8] sm:$0xff] }
  0xc2   :  { %2518 = vmatpush.bf16.msra.mxu0 %v4080_v5  ;;  %2487 = vmatmul.bf16.vlgmr.msrb.gmra.mxu1 %v627_v11  ;;  %v4127_v5 = vld [vmem:[%s5078_s1 + $0x7b0] sm:$0xff] }
  0xc3   :  { %2531 = vmatpush.bf16.msra.mxu1 %v4088_v6  ;;  %2500 = vmatmul.bf16.vlgmr.msrb.gmra.mxu2 %v628_v10  ;;  %v4135_v6 = vld [vmem:[%s5078_s1 + $0x7f0] sm:$0xff]  ;;  %v4134_v10 = vld [vmem:[%s5078_s1 + $0x7e8] sm:$0xff] }
  0xc4   :  { %2544 = vmatpush.bf16.msra.mxu2 %v4096_v7  ;;  %2513 = vmatmul.bf16.vlgmr.msrb.gmra.mxu3 %v629_v12  ;;  %v4110_v7 = vld [vmem:[%s5078_s1 + $0x728] sm:$0xff] }
  0xc5   :  { %2557 = vmatpush.bf16.msra.mxu3 %v4104_v8  ;;  %v4118_v8 = vld [vmem:[%s5078_s1 + $0x768] sm:$0xff] }
  0xc6   :  { %2519 = vmatpush.bf16.msra.mxu0 %v4079_v13  ;;  %v2293_v33 = vpop.f32.mrf.mxu2  ;;  %v2269_v36 = vpop.f32.mrf.mxu0  ;;  %v4109_v13 = vld [vmem:[%s5078_s1 + $0x720] sm:$0xff] }
  0xc7   :  { %2532 = vmatpush.bf16.msra.mxu1 %v4087_v14  ;;  %v2294_v34 = vadd.f32 %v2293_v33, %v2281_v28  ;;  %v2306_v35 = vpop.f32.mrf.mxu3  ;;  %v2282_v40 = vpop.f32.mrf.mxu1  ;;  %v4117_v14 = vld [vmem:[%s5078_s1 + $0x760] sm:$0xff]  ;;  %v4107_v28 = vld [vmem:[%s5078_s1 + $0x710] sm:$0xff]  ;;  %v4106_v33 = vld [vmem:[%s5078_s1 + $0x708] sm:$0xff] }
  0xc8   :  { %2545 = vmatpush.bf16.msra.mxu2 %v4095_v15  ;;  %v4122_v36 = vld [vmem:[%s5078_s1 + $0x788] sm:$0xff] }
  0xc9   :  { %2558 = vmatpush.bf16.msra.mxu3 %v4103_v16  ;;  %v4880_v39 = vadd.f32 %v2306_v35, %v2294_v34  ;;  %v4125_v16 = vld [vmem:[%s5078_s1 + $0x7a0] sm:$0xff]  ;;  %v4114_v34 = vld [vmem:[%s5078_s1 + $0x748] sm:$0xff]  ;;  %v40_v35 = vld [vmem:[%s5079_s0 + $0x70] sm:$0xff] }
  0xca   :  { %2520 = vmatpush.bf16.msra.mxu0 %v4078_v17  ;;  %v4133_v17 = vld [vmem:[%s5078_s1 + $0x7e0] sm:$0xff] }
  0xcb   :  { %2533 = vmatpush.bf16.msra.mxu1 %v4086_v18 }
  0xcc   :  { %2546 = vmatpush.bf16.msra.mxu2 %v4094_v19  ;;  %v4108_v19 = vld [vmem:[%s5078_s1 + $0x718] sm:$0xff] }
  0xcd   :  { %2559 = vmatpush.bf16.msra.mxu3 %v4102_v20  ;;  %v4116_v20 = vld [vmem:[%s5078_s1 + $0x758] sm:$0xff] }
  0xce   :  { %2521 = vmatpush.bf16.msra.mxu0 %v4077_v22  ;;  %v2295_v49 = vpop.f32.mrf.mxu2  ;;  %v4132_v22 = vld [vmem:[%s5078_s1 + $0x7d8] sm:$0xff] }
  0xcf   :  { %2534 = vmatpush.bf16.msra.mxu1 %v4085_v23  ;;  %v2308_v50 = vpop.f32.mrf.mxu3 }
  0xd0   :  { %2547 = vmatpush.bf16.msra.mxu2 %v4093_v26 }
  0xd1   :  { %2560 = vmatpush.bf16.msra.mxu3 %v4101_v27 }
  0xd2   :  { %2522 = vmatpush.bf16.msra.mxu0 %v4076_v29  ;;  %v4115_v29 = vld [vmem:[%s5078_s1 + $0x750] sm:$0xff] }
  0xd3   :  { %2535 = vmatpush.bf16.msra.mxu1 %v4084_v30 }
  0xd4   :  { %2548 = vmatpush.bf16.msra.mxu2 %v4092_v31  ;;  %v4123_v31 = vld [vmem:[%s5078_s1 + $0x790] sm:$0xff] }
  0xd5   :  { %2561 = vmatpush.bf16.msra.mxu3 %v4100_v32  ;;  %v4131_v32 = vld [vmem:[%s5078_s1 + $0x7d0] sm:$0xff] }
  0xd6   :  { %2523 = vmatpush.bf16.msra.mxu0 %v4075_v37  ;;  %v4130_v37 = vld [vmem:[%s5078_s1 + $0x7c8] sm:$0xff] }
  0xd7   :  { %2536 = vmatpush.bf16.msra.mxu1 %v4083_v38  ;;  %v41_v38 = vld [vmem:[%s5079_s0 + $0x78] sm:$0xff] }
  0xd8   :  { %2549 = vmatpush.bf16.msra.mxu2 %v4091_v41  ;;  %v602_v41 = vunpack.c.l.b16 %v40_v35 }
  0xd9   :  { %2562 = vmatpush.bf16.msra.mxu3 %v4099_v42  ;;  %v603_v42 = vunpack.c.h.b16 %v40_v35 }
  0xda   :  { %2524 = vmatpush.bf16.msra.mxu0 %v4074_v43  ;;  %v4105_v43 = vld [vmem:[%s5078_s1 + $0x700] sm:$0xff]  ;;  %v634_v49 = vpack.c.b16 %v602_v41, %v602_v41  ;;  %v4151_v41 = vld [vmem:[%s5083_s5 + $0x30] sm:$0xff] }
  0xdb   :  { %2537 = vmatpush.bf16.msra.mxu1 %v4082_v44  ;;  %v4113_v44 = vld [vmem:[%s5078_s1 + $0x740] sm:$0xff]  ;;  %v635_v50 = vpack.c.b16 %v603_v42, %v603_v42 }
  0xdc   :  { %2550 = vmatpush.bf16.msra.mxu2 %v4090_v45  ;;  %v604_v45 = vunpack.c.l.b16 %v41_v38 }
  0xdd   :  { %2563 = vmatpush.bf16.msra.mxu3 %v4098_v46  ;;  %v605_v46 = vunpack.c.h.b16 %v41_v38  ;;  %v4152_v38 = vld [vmem:[%s5083_s5 + $0x38] sm:$0xff] }
  0xde   :  { %2525 = vmatpush.bf16.msra.mxu0 %v4073_v51  ;;  %v2319_v11 = vpop.f32.mrf.mxu0  ;;  %v636_v51 = vpack.c.b16 %v604_v45, %v604_v45 }
  0xdf   :  { %2538 = vmatpush.bf16.msra.mxu1 %v4081_v52  ;;  %v2320_v12 = vadd.f32 %v2319_v11, %v4880_v39  ;;  %v2332_v15 = vpop.f32.mrf.mxu1  ;;  %v637_v52 = vpack.c.b16 %v605_v46, %v605_v46  ;;  %v4149_v46 = vld [vmem:[%s5083_s5 + $0x20] sm:$0xff] }
  0xe0   :  { %2551 = vmatpush.bf16.msra.mxu2 %v4089_v55 }
  0xe1   :  { %2564 = vmatpush.bf16.msra.mxu3 %v4097_v56  ;;  %2526 = vmatmul.bf16.vlgmr.msra.gmra.mxu0 %v630_v63  ;;  %v2333_v18 = vadd.f32 %v2332_v15, %v2320_v12 }
  0xe2   :  { %2570 = vmatpush.bf16.msrb.mxu0 %v4112_v59  ;;  %2539 = vmatmul.bf16.vlgmr.msra.gmra.mxu1 %v631_v1 }
  0xe3   :  { %2583 = vmatpush.bf16.msrb.mxu1 %v4120_v60  ;;  %2552 = vmatmul.bf16.vlgmr.msra.gmra.mxu2 %v632_v0 }
  0xe4   :  { %2596 = vmatpush.bf16.msrb.mxu2 %v4128_v61  ;;  %2565 = vmatmul.bf16.vlgmr.msra.gmra.mxu3 %v633_v2 }
  0xe5   :  { %2609 = vmatpush.bf16.msrb.mxu3 %v4136_v62 }
  0xe6   :  { %2571 = vmatpush.bf16.msrb.mxu0 %v4111_v3  ;;  %v2345_v23 = vpop.f32.mrf.mxu2  ;;  %v2321_v26 = vpop.f32.mrf.mxu0 }
  0xe7   :  { %2584 = vmatpush.bf16.msrb.mxu1 %v4119_v4  ;;  %v2346_v24 = vadd.f32 %v2345_v23, %v2333_v18  ;;  %v2358_v25 = vpop.f32.mrf.mxu3  ;;  %v2334_v30 = vpop.f32.mrf.mxu1 }
  0xe8   :  { %2597 = vmatpush.bf16.msrb.mxu2 %v4127_v5 }
  0xe9   :  { %2610 = vmatpush.bf16.msrb.mxu3 %v4135_v6  ;;  %v2359_v27 = vadd.f32 %v2358_v25, %v2346_v24  ;;  %v4141_v24 = vld [vmem:[%s5082_s3 + $0x20] sm:$0xff]  ;;  %v4140_v25 = vld [vmem:[%s5082_s3 + $0x18] sm:$0xff] }
  0xea   :  { %2572 = vmatpush.bf16.msrb.mxu0 %v4110_v7 }
  0xeb   :  { %2585 = vmatpush.bf16.msrb.mxu1 %v4118_v8 }
  0xec   :  { %2598 = vmatpush.bf16.msrb.mxu2 %v4126_v9 }
  0xed   :  { %2611 = vmatpush.bf16.msrb.mxu3 %v4134_v10 }
  0xee   :  { %2573 = vmatpush.bf16.msrb.mxu0 %v4109_v13  ;;  %v2347_v39 = vpop.f32.mrf.mxu2 }
  0xef   :  { %2586 = vmatpush.bf16.msrb.mxu1 %v4117_v14  ;;  %v2360_v40 = vpop.f32.mrf.mxu3 }
  0xf0   :  { %2599 = vmatpush.bf16.msrb.mxu2 %v4125_v16 }
  0xf1   :  { %2612 = vmatpush.bf16.msrb.mxu3 %v4133_v17  ;;  %v4144_v17 = vld [vmem:[%s5082_s3 + $0x38] sm:$0xff] }
  0xf2   :  { %2574 = vmatpush.bf16.msrb.mxu0 %v4108_v19 }
  0xf3   :  { %2587 = vmatpush.bf16.msrb.mxu1 %v4116_v20  ;;  %v4143_v20 = vld [vmem:[%s5082_s3 + $0x30] sm:$0xff] }
  0xf4   :  { %2600 = vmatpush.bf16.msrb.mxu2 %v4124_v21  ;;  %v4142_v21 = vld [vmem:[%s5082_s3 + $0x28] sm:$0xff] }
  0xf5   :  { %2613 = vmatpush.bf16.msrb.mxu3 %v4132_v22 }
  0xf6   :  { %2575 = vmatpush.bf16.msrb.mxu0 %v4107_v28 }
  0xf7   :  { %2588 = vmatpush.bf16.msrb.mxu1 %v4115_v29  ;;  %v4138_v29 = vld [vmem:[%s5082_s3 + $0x8] sm:$0xff] }
  0xf8   :  { %2601 = vmatpush.bf16.msrb.mxu2 %v4123_v31 }
  0xf9   :  { %2614 = vmatpush.bf16.msrb.mxu3 %v4131_v32 }
  0xfa   :  { %2576 = vmatpush.bf16.msrb.mxu0 %v4106_v33 }
  0xfb   :  { %2589 = vmatpush.bf16.msrb.mxu1 %v4114_v34  ;;  %v4137_v34 = vld [vmem:[%s5082_s3] sm:$0xff] }
  0xfc   :  { %2602 = vmatpush.bf16.msrb.mxu2 %v4122_v36 }
  0xfd   :  { %2615 = vmatpush.bf16.msrb.mxu3 %v4130_v37 }
  0xfe   :  { %2577 = vmatpush.bf16.msrb.mxu0 %v4105_v43  ;;  %v2371_v53 = vpop.f32.mrf.mxu0 }
  0xff   :  { %2590 = vmatpush.bf16.msrb.mxu1 %v4113_v44  ;;  %v2372_v54 = vadd.f32 %v2371_v53, %v2359_v27  ;;  %v2384_v55 = vpop.f32.mrf.mxu1  ;;  %v4139_v27 = vld [vmem:[%s5082_s3 + $0x10] sm:$0xff]  ;;  %v4150_v44 = vld [vmem:[%s5083_s5 + $0x28] sm:$0xff] }
 0x100   :  { %2603 = vmatpush.bf16.msrb.mxu2 %v4121_v47  ;;  %v4147_v53 = vld [vmem:[%s5083_s5 + $0x10] sm:$0xff] }
 0x101   :  { %2616 = vmatpush.bf16.msrb.mxu3 %v4129_v48  ;;  %2578 = vmatmul.bf16.vlgmr.msrb.gmra.mxu0 %v634_v49  ;;  %v2385_v56 = vadd.f32 %v2384_v55, %v2372_v54  ;;  %v4148_v48 = vld [vmem:[%s5083_s5 + $0x18] sm:$0xff] }
 0x102   :  { %2591 = vmatmul.bf16.vlgmr.msrb.gmra.mxu1 %v635_v50  ;;  %2692 = vmatpush.bf16.msra.mxu0 %v4144_v17 }
 0x103   :  { %2604 = vmatmul.bf16.vlgmr.msrb.gmra.mxu2 %v636_v51  ;;  %2775 = vmatpush.bf16.msra.mxu1 %v4152_v38 }
 0x104   :  { %2617 = vmatmul.bf16.vlgmr.msrb.gmra.mxu3 %v637_v52 }
 0x106   :  { %v2397_v57 = vpop.f32.mrf.mxu2  ;;  %v2373_v60 = vpop.f32.mrf.mxu0  ;;  %2693 = vmatpush.bf16.msra.mxu0 %v4143_v20 }
 0x107   :  { %v2398_v58 = vadd.f32 %v2397_v57, %v2385_v56  ;;  %v2410_v59 = vpop.f32.mrf.mxu3  ;;  %v2386_v62 = vpop.f32.mrf.mxu1  ;;  %2776 = vmatpush.bf16.msra.mxu1 %v4151_v41 }
 0x109   :  { %v2411_v61 = vadd.f32 %v2410_v59, %v2398_v58 }
 0x10a   :  { %2694 = vmatpush.bf16.msra.mxu0 %v4142_v21 }
 0x10b   :  { %2777 = vmatpush.bf16.msra.mxu1 %v4150_v44 }
 0x10e   :  { %v2399_v63 = vpop.f32.mrf.mxu2  ;;  %2695 = vmatpush.bf16.msra.mxu0 %v4141_v24 }
 0x10f   :  { %v2412_v0 = vpop.f32.mrf.mxu3  ;;  %2778 = vmatpush.bf16.msra.mxu1 %v4149_v46 }
 0x112   :  { %2696 = vmatpush.bf16.msra.mxu0 %v4140_v25 }
 0x113   :  { %2779 = vmatpush.bf16.msra.mxu1 %v4148_v48 }
 0x116   :  { %2697 = vmatpush.bf16.msra.mxu0 %v4139_v27 }
 0x117   :  { %2780 = vmatpush.bf16.msra.mxu1 %v4147_v53 }
 0x11a   :  { %2698 = vmatpush.bf16.msra.mxu0 %v4138_v29 }
 0x11e   :  { %v2423_v1 = vpop.f32.mrf.mxu0  ;;  %2699 = vmatpush.bf16.msra.mxu0 %v4137_v34 }
 0x11f   :  { %v2424_v2 = vadd.f32 %v2423_v1, %v2411_v61  ;;  %v2436_v3 = vpop.f32.mrf.mxu1  ;;  %v4146_v1 = vld [vmem:[%s5083_s5 + $0x8] sm:$0xff] }
 0x120   :  { %2781 = vmatpush.bf16.msra.mxu1 %v4146_v1 }
 0x121   :  { %v2437_v4 = vadd.f32 %v2436_v3, %v2424_v2  ;;  %v4145_v2 = vld [vmem:[%s5083_s5] sm:$0xff] }
 0x122   :  { %v4154_v3 = vld [vmem:[%s5081_s4] ss:$0 sm:$0xff] }
 0x124   :  { %2782 = vmatpush.bf16.msra.mxu1 %v4145_v2 }
 0x126   :  { %v2449_v5 = vpop.f32.mrf.mxu2  ;;  %v2425_v8 = vpop.f32.mrf.mxu0 }
 0x127   :  { %v2450_v6 = vadd.f32 %v2449_v5, %v2437_v4  ;;  %v2462_v7 = vpop.f32.mrf.mxu3  ;;  %v2438_v10 = vpop.f32.mrf.mxu1 }
 0x129   :  { %v2463_v9 = vadd.f32 %v2462_v7, %v2450_v6 }
 0x12e   :  { %v2451_v11 = vpop.f32.mrf.mxu2 }
 0x12f   :  { %v2464_v12 = vpop.f32.mrf.mxu3 }
 0x13e   :  { %v2475_v13 = vpop.f32.mrf.mxu0 }
 0x13f   :  { %v2488_v14 = vpop.f32.mrf.mxu1  ;;  %v2476_v31 = vadd.f32 %v2475_v13, %v2463_v9  ;;  %v4155_v9 = vld [vmem:[%s5084_s6] ss:$0 sm:$0xff] }
 0x141   :  { %v2489_v36 = vadd.f32 %v2488_v14, %v2476_v31 }
 0x146   :  { %v2501_v15 = vpop.f32.mrf.mxu2  ;;  %v2477_v18 = vpop.f32.mrf.mxu0 }
 0x147   :  { %v2514_v16 = vpop.f32.mrf.mxu3  ;;  %v2490_v19 = vpop.f32.mrf.mxu1  ;;  %v2502_v37 = vadd.f32 %v2501_v15, %v2489_v36 }
 0x149   :  { %v2515_v42 = vadd.f32 %v2514_v16, %v2502_v37 }
 0x14e   :  { %v2503_v22 = vpop.f32.mrf.mxu2 }
 0x14f   :  { %v2516_v23 = vpop.f32.mrf.mxu3 }
 0x15e   :  { %v2527_v26 = vpop.f32.mrf.mxu0 }
 0x15f   :  { %v2540_v28 = vpop.f32.mrf.mxu1  ;;  %v2528_v43 = vadd.f32 %v2527_v26, %v2515_v42 }
 0x161   :  { %v2541_v45 = vadd.f32 %v2540_v28, %v2528_v43 }
 0x166   :  { %v2553_v30 = vpop.f32.mrf.mxu2  ;;  %v2529_v33 = vpop.f32.mrf.mxu0 }
 0x167   :  { %v2566_v32 = vpop.f32.mrf.mxu3  ;;  %v2542_v35 = vpop.f32.mrf.mxu1  ;;  %v2554_v47 = vadd.f32 %v2553_v30, %v2541_v45 }
 0x169   :  { %v2567_v49 = vadd.f32 %v2566_v32, %v2554_v47 }
 0x16e   :  { %v2555_v39 = vpop.f32.mrf.mxu2 }
 0x16f   :  { %v2568_v40 = vpop.f32.mrf.mxu3 }
 0x17e   :  { %v2579_v50 = vpop.f32.mrf.mxu0 }
 0x17f   :  { %v2592_v51 = vpop.f32.mrf.mxu1  ;;  %v2580_v52 = vadd.f32 %v2579_v50, %v2567_v49 }
 0x181   :  { %v2593_v54 = vadd.f32 %v2592_v51, %v2580_v52 }
 0x186   :  { %v2605_v55 = vpop.f32.mrf.mxu2  ;;  %v2581_v58 = vpop.f32.mrf.mxu0 }
 0x187   :  { %v2618_v56 = vpop.f32.mrf.mxu3  ;;  %v2606_v57 = vadd.f32 %v2605_v55, %v2593_v54  ;;  %v2594_v59 = vpop.f32.mrf.mxu1 }
 0x189   :  { %v2619_v60 = vadd.f32 %v2618_v56, %v2606_v57 }
 0x18b   :  { %v2622_v61 = vmax.f32 %v2619_v60, 0.0 }
 0x18d   :  { %v2640_v62 = vpack.c.bf16 %v2622_v61, %v2622_v61 }
 0x18e   :  { %v2607_v63 = vpop.f32.mrf.mxu2 }
 0x18f   :  { %v2620_v0 = vpop.f32.mrf.mxu3  ;;  %2700 = vmatmul.bf16.vlgmr.msra.gmra.mxu0 %v2640_v62 }
 0x20c   :  { %v2701_v4 = vpop.f32.mrf.mxu0 }
 0x20d   :  { %v2702_v5 = vadd.f32 %v4154_v3, %v2701_v4 }
 0x20f   :  { %v2705_v6 = vmax.f32 %v2702_v5, 0.0 }
 0x211   :  { %v2723_v7 = vpack.c.bf16 %v2705_v6, %v2705_v6 }
 0x213   :  { %2783 = vmatmul.bf16.vlgmr.msra.gmra.mxu1 %v2723_v7 }
 0x214   :  { %v2703_v8 = vpop.f32.mrf.mxu0 }
 0x290   :  { %v2784_v10 = vpop.f32.mrf.mxu1 }
 0x291   :  { %v2785_v11 = vadd.f32 %v4155_v9, %v2784_v10 }
 0x293   :  { %2788 = vst [vmem:[%s5085_s7] sm:$0xff] %v2785_v11 }
 0x298   :  { %v2786_v12 = vpop.f32.mrf.mxu1 }

// kernel: a_call__.11
= control target key start
LH: loop header
LB: loop body
LE: loop exit
PB: predicated region body
PF: predicated region fallthrough
CT: control target
= control target key end

     0   :  { %s1927_s1 = inlined_call_operand.vmem [shape: bf16[640,128], index: 1, kind: input, shape index: {}]   ;;  %s1928_s0 = inlined_call_operand.vmem [shape: bf16[128,640], index: 0, kind: input, shape index: {}]   ;;  %s1929_s2 = inlined_call_operand.vmem [shape: f32[1,128], index: 2, kind: input, shape index: {}]   ;;  %s1930_s3 = inlined_call_operand.vmem [shape: bf16[128,128], index: 3, kind: output, shape index: {}]  }
   0x1   :  { %v1361_v0 = vld [vmem:[%s1927_s1 + $0x38] sm:$0xff]  ;;  %v1360_v1 = vld [vmem:[%s1927_s1 + $0x30] sm:$0xff]  ;;  %v1359_v2 = vld [vmem:[%s1927_s1 + $0x28] sm:$0xff] }
   0x2   :  { %1441 = vmatpush.bf16.msra.mxu1 %v1361_v0  ;;  %1442 = vmatpush.bf16.msra.mxu2 %v1361_v0  ;;  %v1358_v3 = vld [vmem:[%s1927_s1 + $0x20] sm:$0xff]  ;;  %v1357_v4 = vld [vmem:[%s1927_s1 + $0x18] sm:$0xff]  ;;  %v1356_v5 = vld [vmem:[%s1927_s1 + $0x10] sm:$0xff] }
   0x3   :  { %1443 = vmatpush.bf16.msra.mxu3 %v1361_v0  ;;  %626 = vmatpush.bf16.msra.mxu0 %v1361_v0  ;;  %v1355_v6 = vld [vmem:[%s1927_s1 + $0x8] sm:$0xff]  ;;  %v1354_v7 = vld [vmem:[%s1927_s1] sm:$0xff]  ;;  %v1036_v8 = vld [vmem:[%s1928_s0 + $0x50] sm:$0xf] }
   0x4   :  { %v1326_v9 = vld [vmem:[%s1928_s0 + $0x60] sm:$0xf0]  ;;  %v1076_v10 = vld [vmem:[%s1928_s0 + $0xa0] sm:$0xf]  ;;  %v1336_v11 = vld [vmem:[%s1928_s0 + $0xb0] sm:$0xf0] }
   0x5   :  { %v1116_v12 = vld [vmem:[%s1928_s0 + $0xf0] sm:$0xf]  ;;  %v1346_v13 = vld [vmem:[%s1928_s0 + $0x100] sm:$0xf0]  ;;  %v996_v14 = vld [vmem:[%s1928_s0] sm:$0xf]  ;;  %v1037_v18 = vor.u32 %v1326_v9, %v1036_v8  ;;  %v1077_v19 = vor.u32 %v1336_v11, %v1076_v10 }
   0x6   :  { %1444 = vmatpush.bf16.msra.mxu1 %v1360_v1  ;;  %1445 = vmatpush.bf16.msra.mxu2 %v1360_v1  ;;  %v1316_v15 = vld [vmem:[%s1928_s0 + $0x10] sm:$0xf0]  ;;  %v1377_v16 = vld [vmem:[%s1927_s1 + $0xb8] sm:$0xff]  ;;  %v1117_v20 = vor.u32 %v1346_v13, %v1116_v12  ;;  %v1375_v28 = vld [vmem:[%s1927_s1 + $0xa8] sm:$0xff] }
   0x7   :  { %1446 = vmatpush.bf16.msra.mxu3 %v1360_v1  ;;  %627 = vmatpush.bf16.msra.mxu0 %v1360_v1  ;;  %v1369_v17 = vld [vmem:[%s1927_s1 + $0x78] sm:$0xff]  ;;  %v997_v21 = vor.u32 %v1316_v15, %v996_v14  ;;  %v1376_v24 = vld [vmem:[%s1927_s1 + $0xb0] sm:$0xff]  ;;  %v1367_v29 = vld [vmem:[%s1927_s1 + $0x68] sm:$0xff] }
   0x8   :  { %v1385_v22 = vld [vmem:[%s1927_s1 + $0xf8] sm:$0xff]  ;;  %v1368_v25 = vld [vmem:[%s1927_s1 + $0x70] sm:$0xff]  ;;  %v1383_v30 = vld [vmem:[%s1927_s1 + $0xe8] sm:$0xff] }
   0x9   :  { %v1393_v23 = vld [vmem:[%s1927_s1 + $0x138] sm:$0xff]  ;;  %v1384_v26 = vld [vmem:[%s1927_s1 + $0xf0] sm:$0xff]  ;;  %v1391_v31 = vld [vmem:[%s1927_s1 + $0x128] sm:$0xff] }
   0xa   :  { %1447 = vmatpush.bf16.msra.mxu1 %v1359_v2  ;;  %1448 = vmatpush.bf16.msra.mxu2 %v1359_v2  ;;  %v1392_v27 = vld [vmem:[%s1927_s1 + $0x130] sm:$0xff]  ;;  %v1374_v32 = vld [vmem:[%s1927_s1 + $0xa0] sm:$0xff]  ;;  %v1056_v36 = vld [vmem:[%s1928_s0 + $0x78] sm:$0xf] }
   0xb   :  { %1449 = vmatpush.bf16.msra.mxu3 %v1359_v2  ;;  %628 = vmatpush.bf16.msra.mxu0 %v1359_v2  ;;  %v1366_v33 = vld [vmem:[%s1927_s1 + $0x60] sm:$0xff]  ;;  %v1331_v37 = vld [vmem:[%s1928_s0 + $0x88] sm:$0xf0]  ;;  %v1096_v38 = vld [vmem:[%s1928_s0 + $0xc8] sm:$0xf] }
   0xc   :  { %v1382_v34 = vld [vmem:[%s1927_s1 + $0xe0] sm:$0xff]  ;;  %v1341_v39 = vld [vmem:[%s1928_s0 + $0xd8] sm:$0xf0]  ;;  %v1136_v40 = vld [vmem:[%s1928_s0 + $0x118] sm:$0xf]  ;;  %v1057_v46 = vor.u32 %v1331_v37, %v1056_v36 }
   0xd   :  { %v1390_v35 = vld [vmem:[%s1927_s1 + $0x120] sm:$0xff]  ;;  %v1351_v41 = vld [vmem:[%s1928_s0 + $0x128] sm:$0xf0]  ;;  %v1016_v42 = vld [vmem:[%s1928_s0 + $0x28] sm:$0xf]  ;;  %v1097_v47 = vor.u32 %v1341_v39, %v1096_v38 }
   0xe   :  { %1450 = vmatpush.bf16.msra.mxu1 %v1358_v3  ;;  %1451 = vmatpush.bf16.msra.mxu2 %v1358_v3  ;;  %v1321_v43 = vld [vmem:[%s1928_s0 + $0x38] sm:$0xf0]  ;;  %v1137_v48 = vor.u32 %v1351_v41, %v1136_v40  ;;  %v1372_v52 = vld [vmem:[%s1927_s1 + $0x90] sm:$0xff]  ;;  %v1371_v56 = vld [vmem:[%s1927_s1 + $0x88] sm:$0xff] }
   0xf   :  { %1452 = vmatpush.bf16.msra.mxu3 %v1358_v3  ;;  %629 = vmatpush.bf16.msra.mxu0 %v1358_v3  ;;  %v1373_v44 = vld [vmem:[%s1927_s1 + $0x98] sm:$0xff]  ;;  %v1017_v49 = vor.u32 %v1321_v43, %v1016_v42  ;;  %v1364_v53 = vld [vmem:[%s1927_s1 + $0x50] sm:$0xff]  ;;  %v1363_v57 = vld [vmem:[%s1927_s1 + $0x48] sm:$0xff] }
  0x10   :  { %v1365_v45 = vld [vmem:[%s1927_s1 + $0x58] sm:$0xff]  ;;  %v1380_v54 = vld [vmem:[%s1927_s1 + $0xd0] sm:$0xff]  ;;  %v1379_v58 = vld [vmem:[%s1927_s1 + $0xc8] sm:$0xff] }
  0x11   :  { %v1381_v50 = vld [vmem:[%s1927_s1 + $0xd8] sm:$0xff]  ;;  %v1388_v55 = vld [vmem:[%s1927_s1 + $0x110] sm:$0xff]  ;;  %v1387_v59 = vld [vmem:[%s1927_s1 + $0x108] sm:$0xff] }
  0x12   :  { %1453 = vmatpush.bf16.msra.mxu1 %v1357_v4  ;;  %1454 = vmatpush.bf16.msra.mxu2 %v1357_v4  ;;  %v1389_v51 = vld [vmem:[%s1927_s1 + $0x118] sm:$0xff]  ;;  %v1370_v60 = vld [vmem:[%s1927_s1 + $0x80] sm:$0xff]  ;;  %v1004_v2 = vld [vmem:[%s1928_s0 + $0x8] sm:$0xf] }
  0x13   :  { %1455 = vmatpush.bf16.msra.mxu3 %v1357_v4  ;;  %630 = vmatpush.bf16.msra.mxu0 %v1357_v4  ;;  %v1362_v61 = vld [vmem:[%s1927_s1 + $0x40] sm:$0xff]  ;;  %v998_v1 = vld [vmem:[%s1928_s0 + $0x14] sm:$0xf0]  ;;  %v1317_v3 = vld [vmem:[%s1928_s0 + $0x18] sm:$0xf0] }
  0x14   :  { %v1378_v62 = vld [vmem:[%s1927_s1 + $0xc0] sm:$0xff]  ;;  %v1315_v4 = vld [vmem:[%s1928_s0 + $0xc] sm:$0xf]  ;;  %v1005_v9 = vor.u32 %v1317_v3, %v1004_v2  ;;  %v1024_v14 = vld [vmem:[%s1928_s0 + $0x30] sm:$0xf] }
  0x15   :  { %v1386_v63 = vld [vmem:[%s1927_s1 + $0x100] sm:$0xff]  ;;  %v1319_v12 = vld [vmem:[%s1928_s0 + $0x2c] sm:$0xf]  ;;  %v1329_v36 = vld [vmem:[%s1928_s0 + $0x7c] sm:$0xf] }
  0x16   :  { %1456 = vmatpush.bf16.msra.mxu1 %v1356_v5  ;;  %1457 = vmatpush.bf16.msra.mxu2 %v1356_v5  ;;  %v1314_v0 = vld [vmem:[%s1928_s0 + $0x4] sm:$0xf]  ;;  %v1018_v13 = vld [vmem:[%s1928_s0 + $0x3c] sm:$0xf0]  ;;  %v1058_v37 = vld [vmem:[%s1928_s0 + $0x8c] sm:$0xf0] }
  0x17   :  { %1458 = vmatpush.bf16.msra.mxu3 %v1356_v5  ;;  %631 = vmatpush.bf16.msra.mxu0 %v1356_v5  ;;  %v1006_v5 = vld [vmem:[%s1928_s0 + $0x1c] sm:$0xf0]  ;;  %v1001_v8 = vor.u32 %v1314_v0, %v998_v1  ;;  %v1322_v15 = vld [vmem:[%s1928_s0 + $0x40] sm:$0xf0]  ;;  %v1332_v39 = vld [vmem:[%s1928_s0 + $0x90] sm:$0xf0] }
  0x18   :  { %v1009_v10 = vor.u32 %v1315_v4, %v1006_v5  ;;  %v1064_v38 = vld [vmem:[%s1928_s0 + $0x80] sm:$0xf]  ;;  %v1330_v40 = vld [vmem:[%s1928_s0 + $0x84] sm:$0xf]  ;;  %v1066_v41 = vld [vmem:[%s1928_s0 + $0x94] sm:$0xf0] }
  0x19   :  { %v1072_v42 = vld [vmem:[%s1928_s0 + $0x88] sm:$0xf]  ;;  %v1333_v43 = vld [vmem:[%s1928_s0 + $0x98] sm:$0xf0]  ;;  %v1340_v0 = vld [vmem:[%s1928_s0 + $0xd4] sm:$0xf] }
  0x1a   :  { %1459 = vmatpush.bf16.msra.mxu1 %v1355_v6  ;;  %1460 = vmatpush.bf16.msra.mxu2 %v1355_v6  ;;  %v1106_v1 = vld [vmem:[%s1928_s0 + $0xe4] sm:$0xf0]  ;;  %v1112_v2 = vld [vmem:[%s1928_s0 + $0xd8] sm:$0xf]  ;;  %v1343_v3 = vld [vmem:[%s1928_s0 + $0xe8] sm:$0xf0] }
  0x1b   :  { %1461 = vmatpush.bf16.msra.mxu3 %v1355_v6  ;;  %632 = vmatpush.bf16.msra.mxu0 %v1355_v6  ;;  %v1012_v6 = vld [vmem:[%s1928_s0 + $0x10] sm:$0xf] }
  0x1e   :  { %1462 = vmatpush.bf16.msra.mxu1 %v1354_v7  ;;  %1463 = vmatpush.bf16.msra.mxu2 %v1354_v7 }
  0x1f   :  { %1464 = vmatpush.bf16.msra.mxu3 %v1354_v7  ;;  %633 = vmatpush.bf16.msra.mxu0 %v1354_v7  ;;  %v1318_v7 = vld [vmem:[%s1928_s0 + $0x20] sm:$0xf0] }
  0x20   :  { %v1013_v11 = vor.u32 %v1318_v7, %v1012_v6  ;;  %v1109_v6 = vor.u32 %v1340_v0, %v1106_v1  ;;  %v1113_v7 = vor.u32 %v1343_v3, %v1112_v2 }
  0x21   :  { %644 = vmatmul.bf16.vlgmr.msra.gmra.mxu1 %v1037_v18  ;;  %654 = vmatmul.bf16.vlgmr.msra.gmra.mxu2 %v1077_v19  ;;  %v1032_v18 = vld [vmem:[%s1928_s0 + $0x38] sm:$0xf]  ;;  %v1323_v19 = vld [vmem:[%s1928_s0 + $0x48] sm:$0xf0] }
  0x22   :  { %724 = vmatpush.bf16.msrb.mxu2 %v1377_v16  ;;  %675 = vmatpush.bf16.msrb.mxu1 %v1369_v17  ;;  %v1320_v16 = vld [vmem:[%s1928_s0 + $0x34] sm:$0xf]  ;;  %v1026_v17 = vld [vmem:[%s1928_s0 + $0x44] sm:$0xf0] }
  0x23   :  { %664 = vmatmul.bf16.vlgmr.msra.gmra.mxu3 %v1117_v20  ;;  %634 = vmatmul.bf16.vlgmr.msra.gmra.mxu0 %v997_v21  ;;  %v1021_v20 = vor.u32 %v1319_v12, %v1018_v13  ;;  %v1025_v21 = vor.u32 %v1322_v15, %v1024_v14  ;;  %v1345_v12 = vld [vmem:[%s1928_s0 + $0xfc] sm:$0xf]  ;;  %v1126_v13 = vld [vmem:[%s1928_s0 + $0x10c] sm:$0xf0]  ;;  %v1132_v14 = vld [vmem:[%s1928_s0 + $0x100] sm:$0xf] }
  0x24   :  { %773 = vmatpush.bf16.msrb.mxu3 %v1385_v22  ;;  %822 = vmatpush.bf16.msrb.mxu0 %v1393_v23  ;;  %v1029_v22 = vor.u32 %v1320_v16, %v1026_v17  ;;  %v1033_v23 = vor.u32 %v1323_v19, %v1032_v18  ;;  %v1348_v15 = vld [vmem:[%s1928_s0 + $0x110] sm:$0xf0]  ;;  %v1129_v19 = vor.u32 %v1345_v12, %v1126_v13 }
  0x26   :  { %725 = vmatpush.bf16.msrb.mxu2 %v1376_v24  ;;  %676 = vmatpush.bf16.msrb.mxu1 %v1368_v25  ;;  %v1324_v24 = vld [vmem:[%s1928_s0 + $0x54] sm:$0xf]  ;;  %v1038_v25 = vld [vmem:[%s1928_s0 + $0x64] sm:$0xf0] }
  0x28   :  { %774 = vmatpush.bf16.msrb.mxu3 %v1384_v26  ;;  %823 = vmatpush.bf16.msrb.mxu0 %v1392_v27  ;;  %v1044_v26 = vld [vmem:[%s1928_s0 + $0x58] sm:$0xf]  ;;  %v1327_v27 = vld [vmem:[%s1928_s0 + $0x68] sm:$0xf0] }
  0x2a   :  { %726 = vmatpush.bf16.msrb.mxu2 %v1375_v28  ;;  %677 = vmatpush.bf16.msrb.mxu1 %v1367_v29  ;;  %v1325_v28 = vld [vmem:[%s1928_s0 + $0x5c] sm:$0xf]  ;;  %v1046_v29 = vld [vmem:[%s1928_s0 + $0x6c] sm:$0xf0] }
  0x2c   :  { %775 = vmatpush.bf16.msrb.mxu3 %v1383_v30  ;;  %824 = vmatpush.bf16.msrb.mxu0 %v1391_v31  ;;  %v1052_v30 = vld [vmem:[%s1928_s0 + $0x60] sm:$0xf]  ;;  %v1328_v31 = vld [vmem:[%s1928_s0 + $0x70] sm:$0xf0] }
  0x2e   :  { %727 = vmatpush.bf16.msrb.mxu2 %v1374_v32  ;;  %678 = vmatpush.bf16.msrb.mxu1 %v1366_v33  ;;  %v1041_v32 = vor.u32 %v1324_v24, %v1038_v25  ;;  %v1045_v33 = vor.u32 %v1327_v27, %v1044_v26  ;;  %v1349_v26 = vld [vmem:[%s1928_s0 + $0x11c] sm:$0xf]  ;;  %v1138_v27 = vld [vmem:[%s1928_s0 + $0x12c] sm:$0xf0] }
  0x30   :  { %776 = vmatpush.bf16.msrb.mxu3 %v1382_v34  ;;  %825 = vmatpush.bf16.msrb.mxu0 %v1390_v35  ;;  %v1049_v34 = vor.u32 %v1325_v28, %v1046_v29  ;;  %v1053_v35 = vor.u32 %v1328_v31, %v1052_v30  ;;  %v1144_v28 = vld [vmem:[%s1928_s0 + $0x120] sm:$0xf]  ;;  %v1352_v29 = vld [vmem:[%s1928_s0 + $0x130] sm:$0xf0]  ;;  %v1350_v30 = vld [vmem:[%s1928_s0 + $0x124] sm:$0xf] }
  0x31   :  { %649 = vmatmul.bf16.gmra.mxu1 %v1057_v46  ;;  %659 = vmatmul.bf16.gmra.mxu2 %v1097_v47  ;;  %v1069_v46 = vor.u32 %v1330_v40, %v1066_v41  ;;  %v1073_v47 = vor.u32 %v1333_v43, %v1072_v42  ;;  %v1146_v31 = vld [vmem:[%s1928_s0 + $0x134] sm:$0xf0] }
  0x32   :  { %728 = vmatpush.bf16.msrb.mxu2 %v1373_v44  ;;  %679 = vmatpush.bf16.msrb.mxu1 %v1365_v45  ;;  %v1061_v44 = vor.u32 %v1329_v36, %v1058_v37  ;;  %v1065_v45 = vor.u32 %v1332_v39, %v1064_v38  ;;  %v1141_v36 = vor.u32 %v1349_v26, %v1138_v27 }
  0x33   :  { %669 = vmatmul.bf16.gmra.mxu3 %v1137_v48  ;;  %639 = vmatmul.bf16.gmra.mxu0 %v1017_v49  ;;  %v1334_v48 = vld [vmem:[%s1928_s0 + $0xa4] sm:$0xf]  ;;  %v1078_v49 = vld [vmem:[%s1928_s0 + $0xb4] sm:$0xf0]  ;;  %v1145_v37 = vor.u32 %v1352_v29, %v1144_v28  ;;  %v1149_v39 = vor.u32 %v1350_v30, %v1146_v31 }
  0x34   :  { %777 = vmatpush.bf16.msrb.mxu3 %v1381_v50  ;;  %826 = vmatpush.bf16.msrb.mxu0 %v1389_v51  ;;  %v1084_v50 = vld [vmem:[%s1928_s0 + $0xa8] sm:$0xf]  ;;  %v1337_v51 = vld [vmem:[%s1928_s0 + $0xb8] sm:$0xf0] }
  0x36   :  { %729 = vmatpush.bf16.msrb.mxu2 %v1372_v52  ;;  %680 = vmatpush.bf16.msrb.mxu1 %v1364_v53  ;;  %v1335_v52 = vld [vmem:[%s1928_s0 + $0xac] sm:$0xf]  ;;  %v1086_v53 = vld [vmem:[%s1928_s0 + $0xbc] sm:$0xf0] }
  0x38   :  { %778 = vmatpush.bf16.msrb.mxu3 %v1380_v54  ;;  %827 = vmatpush.bf16.msrb.mxu0 %v1388_v55  ;;  %v1092_v54 = vld [vmem:[%s1928_s0 + $0xb0] sm:$0xf]  ;;  %v1338_v55 = vld [vmem:[%s1928_s0 + $0xc0] sm:$0xf0] }
  0x3a   :  { %730 = vmatpush.bf16.msrb.mxu2 %v1371_v56  ;;  %681 = vmatpush.bf16.msrb.mxu1 %v1363_v57  ;;  %v1081_v56 = vor.u32 %v1334_v48, %v1078_v49  ;;  %v1085_v57 = vor.u32 %v1337_v51, %v1084_v50 }
  0x3c   :  { %779 = vmatpush.bf16.msrb.mxu3 %v1379_v58  ;;  %828 = vmatpush.bf16.msrb.mxu0 %v1387_v59  ;;  %v1089_v58 = vor.u32 %v1335_v52, %v1086_v53  ;;  %v1093_v59 = vor.u32 %v1338_v55, %v1092_v54 }
  0x3e   :  { %731 = vmatpush.bf16.msrb.mxu2 %v1370_v60  ;;  %682 = vmatpush.bf16.msrb.mxu1 %v1362_v61  ;;  %v1339_v60 = vld [vmem:[%s1928_s0 + $0xcc] sm:$0xf]  ;;  %v1098_v61 = vld [vmem:[%s1928_s0 + $0xdc] sm:$0xf0] }
  0x3f   :  { %v1101_v4 = vor.u32 %v1339_v60, %v1098_v61  ;;  %v1873_v60 = vld [vmem:[%s1929_s2] ss:$0 sm:$0xff] }
  0x40   :  { %780 = vmatpush.bf16.msrb.mxu3 %v1378_v62  ;;  %829 = vmatpush.bf16.msrb.mxu0 %v1386_v63  ;;  %v1104_v62 = vld [vmem:[%s1928_s0 + $0xd0] sm:$0xf]  ;;  %v1342_v63 = vld [vmem:[%s1928_s0 + $0xe0] sm:$0xf0] }
  0x41   :  { %683 = vmatmul.bf16.vlgmr.msrb.gmra.mxu1 %v1001_v8  ;;  %732 = vmatmul.bf16.vlgmr.msrb.gmra.mxu2 %v1005_v9  ;;  %v1105_v5 = vor.u32 %v1342_v63, %v1104_v62  ;;  %v1344_v8 = vld [vmem:[%s1928_s0 + $0xf4] sm:$0xf]  ;;  %v1118_v9 = vld [vmem:[%s1928_s0 + $0x104] sm:$0xf0] }
  0x42   :  { %v1121_v16 = vor.u32 %v1344_v8, %v1118_v9 }
  0x43   :  { %781 = vmatmul.bf16.vlgmr.msrb.gmra.mxu3 %v1009_v10  ;;  %830 = vmatmul.bf16.vlgmr.msrb.gmra.mxu0 %v1013_v11  ;;  %v1124_v10 = vld [vmem:[%s1928_s0 + $0xf8] sm:$0xf]  ;;  %v1347_v11 = vld [vmem:[%s1928_s0 + $0x108] sm:$0xf0] }
  0x44   :  { %v1125_v17 = vor.u32 %v1347_v11, %v1124_v10 }
  0x51   :  { %688 = vmatmul.bf16.gmra.mxu1 %v1021_v20  ;;  %737 = vmatmul.bf16.gmra.mxu2 %v1025_v21  ;;  %v1133_v20 = vor.u32 %v1348_v15, %v1132_v14 }
  0x53   :  { %786 = vmatmul.bf16.gmra.mxu3 %v1029_v22  ;;  %835 = vmatmul.bf16.gmra.mxu0 %v1033_v23 }
  0x61   :  { %693 = vmatmul.bf16.gmra.mxu1 %v1041_v32  ;;  %742 = vmatmul.bf16.gmra.mxu2 %v1045_v33  ;;  %v1152_v32 = vld [vmem:[%s1928_s0 + $0x128] sm:$0xf]  ;;  %v1353_v33 = vld [vmem:[%s1928_s0 + $0x138] sm:$0xf0] }
  0x62   :  { %v1153_v40 = vor.u32 %v1353_v33, %v1152_v32 }
  0x63   :  { %791 = vmatmul.bf16.gmra.mxu3 %v1049_v34  ;;  %840 = vmatmul.bf16.gmra.mxu0 %v1053_v35 }
  0x71   :  { %698 = vmatmul.bf16.gmra.mxu1 %v1061_v44  ;;  %747 = vmatmul.bf16.gmra.mxu2 %v1065_v45 }
  0x73   :  { %796 = vmatmul.bf16.gmra.mxu3 %v1069_v46  ;;  %845 = vmatmul.bf16.gmra.mxu0 %v1073_v47 }
  0x81   :  { %703 = vmatmul.bf16.gmra.mxu1 %v1081_v56  ;;  %752 = vmatmul.bf16.gmra.mxu2 %v1085_v57 }
  0x83   :  { %801 = vmatmul.bf16.gmra.mxu3 %v1089_v58  ;;  %850 = vmatmul.bf16.gmra.mxu0 %v1093_v59 }
  0x91   :  { %708 = vmatmul.bf16.gmra.mxu1 %v1101_v4  ;;  %757 = vmatmul.bf16.gmra.mxu2 %v1105_v5 }
  0x93   :  { %806 = vmatmul.bf16.gmra.mxu3 %v1109_v6  ;;  %855 = vmatmul.bf16.gmra.mxu0 %v1113_v7 }
  0x9e   :  { %v1822_v18 = vpop.f32.mrf.mxu1 }
  0xa0   :  { %v635_v21 = vpop.f32.mrf.mxu0 }
  0xa1   :  { %713 = vmatmul.bf16.gmra.mxu1 %v1121_v16  ;;  %762 = vmatmul.bf16.gmra.mxu2 %v1125_v17 }
  0xa3   :  { %811 = vmatmul.bf16.gmra.mxu3 %v1129_v19  ;;  %860 = vmatmul.bf16.gmra.mxu0 %v1133_v20 }
  0xa4   :  { %v1824_v22 = vpop.f32.mrf.mxu2 }
  0xa6   :  { %v1826_v23 = vpop.f32.mrf.mxu3  ;;  %v1828_v24 = vpop.f32.mrf.mxu1 }
  0xa8   :  { %v637_v25 = vpop.f32.mrf.mxu0 }
  0xac   :  { %v1854_v34 = vpop.f32.mrf.mxu2 }
  0xae   :  { %v1856_v35 = vpop.f32.mrf.mxu3  ;;  %v1858_v38 = vpop.f32.mrf.mxu1 }
  0xb0   :  { %v640_v41 = vpop.f32.mrf.mxu0 }
  0xb1   :  { %718 = vmatmul.bf16.gmra.mxu1 %v1141_v36  ;;  %767 = vmatmul.bf16.gmra.mxu2 %v1145_v37 }
  0xb3   :  { %816 = vmatmul.bf16.gmra.mxu3 %v1149_v39  ;;  %865 = vmatmul.bf16.gmra.mxu0 %v1153_v40 }
  0xb4   :  { %v1860_v42 = vpop.f32.mrf.mxu2 }
  0xb6   :  { %v1862_v43 = vpop.f32.mrf.mxu3  ;;  %v1864_v44 = vpop.f32.mrf.mxu1 }
  0xb8   :  { %v642_v45 = vpop.f32.mrf.mxu0 }
  0xbc   :  { %v1866_v46 = vpop.f32.mrf.mxu2 }
  0xbe   :  { %v1868_v47 = vpop.f32.mrf.mxu3  ;;  %v684_v48 = vpop.f32.mrf.mxu1 }
  0xbf   :  { %v685_v50 = vadd.f32 %v684_v48, %v635_v21 }
  0xc0   :  { %v831_v49 = vpop.f32.mrf.mxu0 }
  0xc4   :  { %v733_v51 = vpop.f32.mrf.mxu2 }
  0xc5   :  { %v734_v52 = vadd.f32 %v733_v51, %v685_v50 }
  0xc6   :  { %v782_v53 = vpop.f32.mrf.mxu3  ;;  %v686_v54 = vpop.f32.mrf.mxu1 }
  0xc7   :  { %v783_v56 = vadd.f32 %v782_v53, %v734_v52  ;;  %v687_v57 = vadd.f32 %v686_v54, %v637_v25 }
  0xc8   :  { %v833_v55 = vpop.f32.mrf.mxu0 }
  0xc9   :  { %v832_v59 = vadd.f32 %v831_v49, %v783_v56 }
  0xcb   :  { %v926_v2 = vadd.f32 %v1873_v60, %v832_v59 }
  0xcc   :  { %v735_v58 = vpop.f32.mrf.mxu2 }
  0xcd   :  { %v736_v61 = vadd.f32 %v735_v58, %v687_v57  ;;  %v942_v7 = vmax.f32 %v926_v2, 0.0 }
  0xce   :  { %v784_v62 = vpop.f32.mrf.mxu3  ;;  %v689_v63 = vpop.f32.mrf.mxu1 }
  0xcf   :  { %v785_v0 = vadd.f32 %v784_v62, %v736_v61  ;;  %v690_v5 = vadd.f32 %v689_v63, %v640_v41 }
  0xd0   :  { %v836_v1 = vpop.f32.mrf.mxu0 }
  0xd1   :  { %v834_v3 = vadd.f32 %v833_v55, %v785_v0 }
  0xd3   :  { %v927_v4 = vadd.f32 %v1873_v60, %v834_v3 }
  0xd4   :  { %v738_v6 = vpop.f32.mrf.mxu2 }
  0xd5   :  { %v943_v8 = vmax.f32 %v927_v4, 0.0  ;;  %v739_v9 = vadd.f32 %v738_v6, %v690_v5 }
  0xd6   :  { %v787_v10 = vpop.f32.mrf.mxu3  ;;  %v691_v11 = vpop.f32.mrf.mxu1 }
  0xd7   :  { %v1397_v12 = vpack.c.bf16 %v943_v8, %v942_v7  ;;  %v788_v14 = vadd.f32 %v787_v10, %v739_v9  ;;  %v692_v15 = vadd.f32 %v691_v11, %v642_v45 }
  0xd8   :  { %v838_v13 = vpop.f32.mrf.mxu0 }
  0xd9   :  { %1398 = vst [vmem:[%s1930_s3] sm:$0xff] %v1397_v12   ;;  %v837_v17 = vadd.f32 %v836_v1, %v788_v14 }
  0xdb   :  { %v928_v27 = vadd.f32 %v1873_v60, %v837_v17 }
  0xdc   :  { %v740_v16 = vpop.f32.mrf.mxu2 }
  0xdd   :  { %v741_v19 = vadd.f32 %v740_v16, %v692_v15  ;;  %v944_v32 = vmax.f32 %v928_v27, 0.0 }
  0xde   :  { %v789_v20 = vpop.f32.mrf.mxu3  ;;  %v694_v21 = vpop.f32.mrf.mxu1 }
  0xdf   :  { %v790_v25 = vadd.f32 %v789_v20, %v741_v19  ;;  %v695_v30 = vadd.f32 %v694_v21, %v1822_v18 }
  0xe0   :  { %v841_v26 = vpop.f32.mrf.mxu0 }
  0xe1   :  { %v839_v28 = vadd.f32 %v838_v13, %v790_v25 }
  0xe3   :  { %v929_v29 = vadd.f32 %v1873_v60, %v839_v28 }
  0xe4   :  { %v743_v31 = vpop.f32.mrf.mxu2 }
  0xe5   :  { %v945_v33 = vmax.f32 %v929_v29, 0.0  ;;  %v744_v36 = vadd.f32 %v743_v31, %v695_v30 }
  0xe6   :  { %v792_v37 = vpop.f32.mrf.mxu3  ;;  %v696_v39 = vpop.f32.mrf.mxu1 }
  0xe7   :  { %v1402_v40 = vpack.c.bf16 %v945_v33, %v944_v32  ;;  %v793_v45 = vadd.f32 %v792_v37, %v744_v36  ;;  %v697_v48 = vadd.f32 %v696_v39, %v1828_v24 }
  0xe8   :  { %v843_v41 = vpop.f32.mrf.mxu0 }
  0xe9   :  { %1434 = vst [vmem:[%s1930_s3 + $0x8] sm:$0xff] %v1402_v40   ;;  %v842_v50 = vadd.f32 %v841_v26, %v793_v45 }
  0xeb   :  { %v930_v55 = vadd.f32 %v1873_v60, %v842_v50 }
  0xec   :  { %v745_v49 = vpop.f32.mrf.mxu2 }
  0xed   :  { %v746_v51 = vadd.f32 %v745_v49, %v697_v48  ;;  %v946_v61 = vmax.f32 %v930_v55, 0.0 }
  0xee   :  { %v794_v52 = vpop.f32.mrf.mxu3  ;;  %v699_v18 = vpop.f32.mrf.mxu1 }
  0xef   :  { %v795_v53 = vadd.f32 %v794_v52, %v746_v51  ;;  %v700_v58 = vadd.f32 %v699_v18, %v1858_v38 }
  0xf0   :  { %v846_v54 = vpop.f32.mrf.mxu0 }
  0xf1   :  { %v844_v56 = vadd.f32 %v843_v41, %v795_v53 }
  0xf3   :  { %v931_v57 = vadd.f32 %v1873_v60, %v844_v56 }
  0xf4   :  { %v748_v59 = vpop.f32.mrf.mxu2 }
  0xf5   :  { %v947_v62 = vmax.f32 %v931_v57, 0.0  ;;  %v749_v63 = vadd.f32 %v748_v59, %v700_v58 }
  0xf6   :  { %v797_v0 = vpop.f32.mrf.mxu3  ;;  %v701_v24 = vpop.f32.mrf.mxu1 }
  0xf7   :  { %v1407_v1 = vpack.c.bf16 %v947_v62, %v946_v61  ;;  %v798_v3 = vadd.f32 %v797_v0, %v749_v63  ;;  %v702_v4 = vadd.f32 %v701_v24, %v1864_v44 }
  0xf8   :  { %v848_v2 = vpop.f32.mrf.mxu0 }
  0xf9   :  { %1435 = vst [vmem:[%s1930_s3 + $0x10] sm:$0xff] %v1407_v1   ;;  %v847_v6 = vadd.f32 %v846_v54, %v798_v3 }
  0xfb   :  { %v932_v11 = vadd.f32 %v1873_v60, %v847_v6 }
  0xfc   :  { %v750_v5 = vpop.f32.mrf.mxu2 }
  0xfd   :  { %v751_v7 = vadd.f32 %v750_v5, %v702_v4  ;;  %v948_v16 = vmax.f32 %v932_v11, 0.0 }
  0xfe   :  { %v799_v8 = vpop.f32.mrf.mxu3  ;;  %v704_v38 = vpop.f32.mrf.mxu1 }
  0xff   :  { %v800_v9 = vadd.f32 %v799_v8, %v751_v7  ;;  %v705_v14 = vadd.f32 %v704_v38, %v1824_v22 }
 0x100   :  { %v851_v10 = vpop.f32.mrf.mxu0 }
 0x101   :  { %v849_v12 = vadd.f32 %v848_v2, %v800_v9 }
 0x103   :  { %v933_v13 = vadd.f32 %v1873_v60, %v849_v12 }
 0x104   :  { %v753_v15 = vpop.f32.mrf.mxu2 }
 0x105   :  { %v949_v17 = vmax.f32 %v933_v13, 0.0  ;;  %v754_v19 = vadd.f32 %v753_v15, %v705_v14 }
 0x106   :  { %v802_v20 = vpop.f32.mrf.mxu3  ;;  %v706_v44 = vpop.f32.mrf.mxu1 }
 0x107   :  { %v1412_v21 = vpack.c.bf16 %v949_v17, %v948_v16  ;;  %v803_v26 = vadd.f32 %v802_v20, %v754_v19  ;;  %v707_v27 = vadd.f32 %v706_v44, %v1854_v34 }
 0x108   :  { %v853_v25 = vpop.f32.mrf.mxu0 }
 0x109   :  { %1436 = vst [vmem:[%s1930_s3 + $0x18] sm:$0xff] %v1412_v21   ;;  %v852_v29 = vadd.f32 %v851_v10, %v803_v26 }
 0x10b   :  { %v934_v36 = vadd.f32 %v1873_v60, %v852_v29 }
 0x10c   :  { %v755_v28 = vpop.f32.mrf.mxu2 }
 0x10d   :  { %v756_v30 = vadd.f32 %v755_v28, %v707_v27  ;;  %v950_v45 = vmax.f32 %v934_v36, 0.0 }
 0x10e   :  { %v804_v31 = vpop.f32.mrf.mxu3  ;;  %v709_v22 = vpop.f32.mrf.mxu1 }
 0x10f   :  { %v805_v32 = vadd.f32 %v804_v31, %v756_v30  ;;  %v710_v40 = vadd.f32 %v709_v22, %v1860_v42 }
 0x110   :  { %v856_v33 = vpop.f32.mrf.mxu0 }
 0x111   :  { %v854_v37 = vadd.f32 %v853_v25, %v805_v32 }
 0x113   :  { %v935_v39 = vadd.f32 %v1873_v60, %v854_v37 }
 0x114   :  { %v758_v41 = vpop.f32.mrf.mxu2 }
 0x115   :  { %v951_v48 = vmax.f32 %v935_v39, 0.0  ;;  %v759_v49 = vadd.f32 %v758_v41, %v710_v40 }
 0x116   :  { %v807_v50 = vpop.f32.mrf.mxu3  ;;  %v711_v34 = vpop.f32.mrf.mxu1 }
 0x117   :  { %v1417_v51 = vpack.c.bf16 %v951_v48, %v950_v45  ;;  %v808_v18 = vadd.f32 %v807_v50, %v759_v49  ;;  %v712_v53 = vadd.f32 %v711_v34, %v1866_v46 }
 0x118   :  { %v858_v52 = vpop.f32.mrf.mxu0 }
 0x119   :  { %1437 = vst [vmem:[%s1930_s3 + $0x20] sm:$0xff] %v1417_v51   ;;  %v857_v55 = vadd.f32 %v856_v33, %v808_v18 }
 0x11b   :  { %v936_v59 = vadd.f32 %v1873_v60, %v857_v55 }
 0x11c   :  { %v760_v54 = vpop.f32.mrf.mxu2 }
 0x11d   :  { %v761_v56 = vadd.f32 %v760_v54, %v712_v53  ;;  %v952_v1 = vmax.f32 %v936_v59, 0.0 }
 0x11e   :  { %v809_v57 = vpop.f32.mrf.mxu3  ;;  %v714_v42 = vpop.f32.mrf.mxu1 }
 0x11f   :  { %v810_v58 = vadd.f32 %v809_v57, %v761_v56  ;;  %v715_v0 = vadd.f32 %v714_v42, %v1826_v23 }
 0x120   :  { %v861_v62 = vpop.f32.mrf.mxu0 }
 0x121   :  { %v859_v61 = vadd.f32 %v858_v52, %v810_v58 }
 0x123   :  { %v937_v63 = vadd.f32 %v1873_v60, %v859_v61 }
 0x124   :  { %v763_v24 = vpop.f32.mrf.mxu2 }
 0x125   :  { %v953_v2 = vmax.f32 %v937_v63, 0.0  ;;  %v764_v3 = vadd.f32 %v763_v24, %v715_v0 }
 0x126   :  { %v812_v4 = vpop.f32.mrf.mxu3  ;;  %v716_v46 = vpop.f32.mrf.mxu1 }
 0x127   :  { %v1422_v5 = vpack.c.bf16 %v953_v2, %v952_v1  ;;  %v813_v6 = vadd.f32 %v812_v4, %v764_v3  ;;  %v717_v7 = vadd.f32 %v716_v46, %v1856_v35 }
 0x128   :  { %v863_v8 = vpop.f32.mrf.mxu0 }
 0x129   :  { %1438 = vst [vmem:[%s1930_s3 + $0x28] sm:$0xff] %v1422_v5   ;;  %v862_v9 = vadd.f32 %v861_v62, %v813_v6 }
 0x12b   :  { %v938_v13 = vadd.f32 %v1873_v60, %v862_v9 }
 0x12c   :  { %v765_v38 = vpop.f32.mrf.mxu2 }
 0x12d   :  { %v766_v10 = vadd.f32 %v765_v38, %v717_v7  ;;  %v954_v19 = vmax.f32 %v938_v13, 0.0 }
 0x12e   :  { %v814_v11 = vpop.f32.mrf.mxu3  ;;  %v719_v23 = vpop.f32.mrf.mxu1 }
 0x12f   :  { %v815_v12 = vadd.f32 %v814_v11, %v766_v10  ;;  %v720_v16 = vadd.f32 %v719_v23, %v1862_v43 }
 0x130   :  { %v866_v35 = vpop.f32.mrf.mxu0 }
 0x131   :  { %v864_v14 = vadd.f32 %v863_v8, %v815_v12 }
 0x133   :  { %v939_v15 = vadd.f32 %v1873_v60, %v864_v14 }
 0x134   :  { %v768_v17 = vpop.f32.mrf.mxu2 }
 0x135   :  { %v955_v20 = vmax.f32 %v939_v15, 0.0  ;;  %v769_v44 = vadd.f32 %v768_v17, %v720_v16 }
 0x136   :  { %v817_v21 = vpop.f32.mrf.mxu3  ;;  %v721_v26 = vpop.f32.mrf.mxu1 }
 0x137   :  { %v1427_v25 = vpack.c.bf16 %v955_v20, %v954_v19  ;;  %v818_v27 = vadd.f32 %v817_v21, %v769_v44  ;;  %v722_v28 = vadd.f32 %v721_v26, %v1868_v47 }
 0x138   :  { %v868_v32 = vpop.f32.mrf.mxu0 }
 0x139   :  { %1439 = vst [vmem:[%s1930_s3 + $0x30] sm:$0xff] %v1427_v25   ;;  %v867_v30 = vadd.f32 %v866_v35, %v818_v27 }
 0x13b   :  { %v940_v33 = vadd.f32 %v1873_v60, %v867_v30 }
 0x13c   :  { %v770_v29 = vpop.f32.mrf.mxu2 }
 0x13d   :  { %v771_v31 = vadd.f32 %v770_v29, %v722_v28  ;;  %v956_v39 = vmax.f32 %v940_v33, 0.0 }
 0x13e   :  { %v819_v22 = vpop.f32.mrf.mxu3 }
 0x13f   :  { %v820_v43 = vadd.f32 %v819_v22, %v771_v31 }
 0x141   :  { %v869_v36 = vadd.f32 %v868_v32, %v820_v43 }
 0x143   :  { %v941_v37 = vadd.f32 %v1873_v60, %v869_v36 }
 0x145   :  { %v957_v40 = vmax.f32 %v941_v37, 0.0 }
 0x147   :  { %v1432_v41 = vpack.c.bf16 %v957_v40, %v956_v39 }
 0x149   :  { %1440 = vst [vmem:[%s1930_s3 + $0x38] sm:$0xff] %v1432_v41  }

// kernel: a_call__.12
= control target key start
LH: loop header
LB: loop body
LE: loop exit
PB: predicated region body
PF: predicated region fallthrough
CT: control target
= control target key end

     0   :  { %s597_s1 = inlined_call_operand.vmem [shape: bf16[128,128], index: 1, kind: input, shape index: {}]   ;;  %s598_s2 = inlined_call_operand.vmem [shape: f32[1,128], index: 2, kind: input, shape index: {}]   ;;  %s599_s0 = inlined_call_operand.vmem [shape: bf16[128,128], index: 0, kind: input, shape index: {}]   ;;  %s600_s3 = inlined_call_operand.vmem [shape: bf16[128,128], index: 3, kind: output, shape index: {}]  }
   0x1   :  { %v429_v0 = vld [vmem:[%s597_s1 + $0x38] sm:$0xff]  ;;  %v428_v1 = vld [vmem:[%s597_s1 + $0x30] sm:$0xff]  ;;  %v427_v2 = vld [vmem:[%s597_s1 + $0x28] sm:$0xff] }
   0x2   :  { %178 = vmatpush.bf16.msra.mxu0 %v429_v0  ;;  %477 = vmatpush.bf16.msra.mxu1 %v429_v0  ;;  %v426_v3 = vld [vmem:[%s597_s1 + $0x20] sm:$0xff]  ;;  %v425_v4 = vld [vmem:[%s597_s1 + $0x18] sm:$0xff]  ;;  %v424_v5 = vld [vmem:[%s597_s1 + $0x10] sm:$0xff] }
   0x3   :  { %478 = vmatpush.bf16.msra.mxu2 %v429_v0  ;;  %479 = vmatpush.bf16.msra.mxu3 %v429_v0  ;;  %v423_v6 = vld [vmem:[%s597_s1 + $0x8] sm:$0xff]  ;;  %v422_v7 = vld [vmem:[%s597_s1] sm:$0xff]  ;;  %v416_v9 = vld [vmem:[%s599_s0 + $0x10] sm:$0xff] }
   0x4   :  { %v414_v8 = vld [vmem:[%s599_s0] sm:$0xff]  ;;  %v420_v11 = vld [vmem:[%s599_s0 + $0x30] sm:$0xff]  ;;  %v415_v12 = vld [vmem:[%s599_s0 + $0x8] sm:$0xff] }
   0x5   :  { %v418_v10 = vld [vmem:[%s599_s0 + $0x20] sm:$0xff]  ;;  %v417_v13 = vld [vmem:[%s599_s0 + $0x18] sm:$0xff]  ;;  %v419_v14 = vld [vmem:[%s599_s0 + $0x28] sm:$0xff] }
   0x6   :  { %179 = vmatpush.bf16.msra.mxu0 %v428_v1  ;;  %480 = vmatpush.bf16.msra.mxu1 %v428_v1  ;;  %v421_v15 = vld [vmem:[%s599_s0 + $0x38] sm:$0xff]  ;;  %v501_v18 = vld [vmem:[%s598_s2] ss:$0 sm:$0xff] }
   0x7   :  { %481 = vmatpush.bf16.msra.mxu2 %v428_v1  ;;  %482 = vmatpush.bf16.msra.mxu3 %v428_v1 }
   0xa   :  { %180 = vmatpush.bf16.msra.mxu0 %v427_v2  ;;  %483 = vmatpush.bf16.msra.mxu1 %v427_v2 }
   0xb   :  { %484 = vmatpush.bf16.msra.mxu2 %v427_v2  ;;  %485 = vmatpush.bf16.msra.mxu3 %v427_v2 }
   0xe   :  { %181 = vmatpush.bf16.msra.mxu0 %v426_v3  ;;  %486 = vmatpush.bf16.msra.mxu1 %v426_v3 }
   0xf   :  { %487 = vmatpush.bf16.msra.mxu2 %v426_v3  ;;  %488 = vmatpush.bf16.msra.mxu3 %v426_v3 }
  0x12   :  { %182 = vmatpush.bf16.msra.mxu0 %v425_v4  ;;  %489 = vmatpush.bf16.msra.mxu1 %v425_v4 }
  0x13   :  { %490 = vmatpush.bf16.msra.mxu2 %v425_v4  ;;  %491 = vmatpush.bf16.msra.mxu3 %v425_v4 }
  0x16   :  { %183 = vmatpush.bf16.msra.mxu0 %v424_v5  ;;  %492 = vmatpush.bf16.msra.mxu1 %v424_v5 }
  0x17   :  { %493 = vmatpush.bf16.msra.mxu2 %v424_v5  ;;  %494 = vmatpush.bf16.msra.mxu3 %v424_v5 }
  0x1a   :  { %184 = vmatpush.bf16.msra.mxu0 %v423_v6  ;;  %495 = vmatpush.bf16.msra.mxu1 %v423_v6 }
  0x1b   :  { %496 = vmatpush.bf16.msra.mxu2 %v423_v6  ;;  %497 = vmatpush.bf16.msra.mxu3 %v423_v6 }
  0x1e   :  { %185 = vmatpush.bf16.msra.mxu0 %v422_v7  ;;  %498 = vmatpush.bf16.msra.mxu1 %v422_v7 }
  0x1f   :  { %499 = vmatpush.bf16.msra.mxu2 %v422_v7  ;;  %500 = vmatpush.bf16.msra.mxu3 %v422_v7 }
  0x21   :  { %186 = vmatmul.bf16.vlgmr.msra.gmra.mxu0 %v414_v8  ;;  %196 = vmatmul.bf16.vlgmr.msra.gmra.mxu1 %v416_v9 }
  0x22   :  { %206 = vmatmul.bf16.vlgmr.msra.gmra.mxu2 %v418_v10  ;;  %216 = vmatmul.bf16.vlgmr.msra.gmra.mxu3 %v420_v11 }
  0x31   :  { %191 = vmatmul.bf16.gmra.mxu0 %v415_v12  ;;  %201 = vmatmul.bf16.gmra.mxu1 %v417_v13 }
  0x32   :  { %211 = vmatmul.bf16.gmra.mxu2 %v419_v14  ;;  %221 = vmatmul.bf16.gmra.mxu3 %v421_v15 }
  0x9e   :  { %v187_v16 = vpop.f32.mrf.mxu0  ;;  %v197_v17 = vpop.f32.mrf.mxu1 }
  0x9f   :  { %v282_v19 = vadd.f32 %v501_v18, %v187_v16  ;;  %v286_v20 = vadd.f32 %v501_v18, %v197_v17 }
  0xa1   :  { %v298_v27 = vmax.f32 %v282_v19, 0.0  ;;  %v302_v28 = vmax.f32 %v286_v20, 0.0 }
  0xa5   :  { %v207_v21 = vpop.f32.mrf.mxu2  ;;  %v217_v22 = vpop.f32.mrf.mxu3 }
  0xa6   :  { %v189_v23 = vpop.f32.mrf.mxu0  ;;  %v199_v24 = vpop.f32.mrf.mxu1  ;;  %v290_v33 = vadd.f32 %v501_v18, %v207_v21  ;;  %v294_v34 = vadd.f32 %v501_v18, %v217_v22 }
  0xa7   :  { %v283_v25 = vadd.f32 %v501_v18, %v189_v23  ;;  %v287_v26 = vadd.f32 %v501_v18, %v199_v24 }
  0xa8   :  { %v306_v41 = vmax.f32 %v290_v33, 0.0  ;;  %v310_v42 = vmax.f32 %v294_v34, 0.0 }
  0xa9   :  { %v299_v29 = vmax.f32 %v283_v25, 0.0  ;;  %v303_v30 = vmax.f32 %v287_v26, 0.0 }
  0xab   :  { %v433_v31 = vpack.c.bf16 %v299_v29, %v298_v27  ;;  %v443_v32 = vpack.c.bf16 %v303_v30, %v302_v28 }
  0xad   :  { %434 = vst [vmem:[%s600_s3] sm:$0xff] %v433_v31   ;;  %v209_v35 = vpop.f32.mrf.mxu2  ;;  %v219_v36 = vpop.f32.mrf.mxu3 }
  0xae   :  { %471 = vst [vmem:[%s600_s3 + $0x10] sm:$0xff] %v443_v32   ;;  %v291_v37 = vadd.f32 %v501_v18, %v209_v35  ;;  %v295_v38 = vadd.f32 %v501_v18, %v219_v36  ;;  %v192_v39 = vpop.f32.mrf.mxu0  ;;  %v202_v40 = vpop.f32.mrf.mxu1 }
  0xaf   :  { %v284_v47 = vadd.f32 %v501_v18, %v192_v39  ;;  %v288_v48 = vadd.f32 %v501_v18, %v202_v40 }
  0xb0   :  { %v307_v43 = vmax.f32 %v291_v37, 0.0  ;;  %v311_v44 = vmax.f32 %v295_v38, 0.0 }
  0xb1   :  { %v300_v55 = vmax.f32 %v284_v47, 0.0  ;;  %v304_v56 = vmax.f32 %v288_v48, 0.0 }
  0xb2   :  { %v453_v45 = vpack.c.bf16 %v307_v43, %v306_v41  ;;  %v463_v46 = vpack.c.bf16 %v311_v44, %v310_v42 }
  0xb4   :  { %473 = vst [vmem:[%s600_s3 + $0x20] sm:$0xff] %v453_v45  }
  0xb5   :  { %475 = vst [vmem:[%s600_s3 + $0x30] sm:$0xff] %v463_v46   ;;  %v212_v49 = vpop.f32.mrf.mxu2  ;;  %v222_v50 = vpop.f32.mrf.mxu3 }
  0xb6   :  { %v194_v51 = vpop.f32.mrf.mxu0  ;;  %v204_v52 = vpop.f32.mrf.mxu1  ;;  %v292_v61 = vadd.f32 %v501_v18, %v212_v49  ;;  %v296_v62 = vadd.f32 %v501_v18, %v222_v50 }
  0xb7   :  { %v285_v53 = vadd.f32 %v501_v18, %v194_v51  ;;  %v289_v54 = vadd.f32 %v501_v18, %v204_v52 }
  0xb8   :  { %v308_v3 = vmax.f32 %v292_v61, 0.0  ;;  %v312_v4 = vmax.f32 %v296_v62, 0.0 }
  0xb9   :  { %v301_v57 = vmax.f32 %v285_v53, 0.0  ;;  %v305_v58 = vmax.f32 %v289_v54, 0.0 }
  0xbb   :  { %v438_v59 = vpack.c.bf16 %v301_v57, %v300_v55  ;;  %v448_v60 = vpack.c.bf16 %v305_v58, %v304_v56 }
  0xbd   :  { %470 = vst [vmem:[%s600_s3 + $0x8] sm:$0xff] %v438_v59   ;;  %v214_v63 = vpop.f32.mrf.mxu2  ;;  %v224_v0 = vpop.f32.mrf.mxu3 }
  0xbe   :  { %472 = vst [vmem:[%s600_s3 + $0x18] sm:$0xff] %v448_v60   ;;  %v293_v1 = vadd.f32 %v501_v18, %v214_v63  ;;  %v297_v2 = vadd.f32 %v501_v18, %v224_v0 }
  0xc0   :  { %v309_v5 = vmax.f32 %v293_v1, 0.0  ;;  %v313_v6 = vmax.f32 %v297_v2, 0.0 }
  0xc2   :  { %v458_v7 = vpack.c.bf16 %v309_v5, %v308_v3  ;;  %v468_v8 = vpack.c.bf16 %v313_v6, %v312_v4 }
  0xc4   :  { %474 = vst [vmem:[%s600_s3 + $0x28] sm:$0xff] %v458_v7  }
  0xc5   :  { %476 = vst [vmem:[%s600_s3 + $0x38] sm:$0xff] %v468_v8  }

// kernel: a_call__.13
= control target key start
LH: loop header
LB: loop body
LE: loop exit
PB: predicated region body
PF: predicated region fallthrough
CT: control target
= control target key end

     0   :  { %s1454_s12 = smov 0   ;;  %s1456_s13 = smov 0   ;;  %s1682_s0 = inlined_call_operand.vmem [shape: bf16[512,256], index: 0, kind: input, shape index: {}]   ;;  %s1683_s1 = inlined_call_operand.vmem [shape: bf16[256,128], index: 1, kind: input, shape index: {}]   ;;  %s1684_s2 = inlined_call_operand.vmem [shape: f32[1,128], index: 2, kind: input, shape index: {}]   ;;  %s1685_s3 = inlined_call_operand.vmem [shape: f32[512,128], index: 3, kind: output, shape index: {}]  }
   0x1   :  { %s1458_s14 = smov 0  }
   0x2 LB: > { %s32_s15 = sadd.s32 1, %s1428_s13  ;;  %p1120_p0 = scmp.ge.s32.totalorder %s1432_s14, 1  ;;  %s1432_s14 = sphi %s1458_s14, %s13_s14   ;;  %s1428_s13 = sphi %s1456_s13, %s1687_s13   ;;  %s1424_s12 = sphi %s1454_s12, %s1686_s12  }
   0x3   : > { %p34_p1 = scmp.ge.s32.totalorder %s32_s15, 2  ;;  %p191_p2 = scmp.lt.s32.totalorder %s1432_s14, 3 }
   0x5   : > { %s1689_s15 = smov (%p34_p1, %s32_s15), 0  ;;  %p192_p3 = pnand %p1120_p0, %p191_p2 }
   0x6   : > { %s1121_s28 = sshll.u32 (!%p192_p3), %s1424_s12, 5 }
   0x7   : > { %195 = sbr.rel (%p192_p3) target bundleno = 302 (0x12e), region = 32  ;;  %p236_p4 = scmp.lt.s32.totalorder (!%p192_p3), %s1121_s28, 63 }
   0xc   : > { %v1360_v0 = vld [vmem:[%s1683_s1 + $0x38] sm:$0xff]  ;;  %v1359_v2 = vld [vmem:[%s1683_s1 + $0x30] sm:$0xff]  ;;  %v1358_v4 = vld [vmem:[%s1683_s1 + $0x28] sm:$0xff]  ;;  %s1691_s28 = smov (!%p236_p4, %s1121_s28), 63 }
   0xd   : > { %v1368_v1 = vld [vmem:[%s1683_s1 + $0x78] sm:$0xff]  ;;  %655 = vmatpush.bf16.msra.mxu0 %v1360_v0  ;;  %1369 = vmatpush.bf16.msra.mxu2 %v1360_v0  ;;  %v1367_v3 = vld [vmem:[%s1683_s1 + $0x70] sm:$0xff]  ;;  %v1366_v5 = vld [vmem:[%s1683_s1 + $0x68] sm:$0xff]  ;;  %s1320_s17 = sshll.u32 %s1691_s28, 3 }
   0xe   : > { %744 = vmatpush.bf16.msra.mxu1 %v1368_v1  ;;  %1377 = vmatpush.bf16.msra.mxu3 %v1368_v1  ;;  %v1357_v6 = vld [vmem:[%s1683_s1 + $0x20] sm:$0xff]  ;;  %v1356_v8 = vld [vmem:[%s1683_s1 + $0x18] sm:$0xff]  ;;  %v1355_v10 = vld [vmem:[%s1683_s1 + $0x10] sm:$0xff]  ;;  %s1522_s22 = scalar_lea.vmem %s1682_s0, %s1320_s17  ;;  %s1607_s7 = scalar_lea.vmem %s1685_s3, %s1320_s17 }
   0xf   : > { %v1365_v7 = vld [vmem:[%s1683_s1 + $0x60] sm:$0xff]  ;;  %v1364_v9 = vld [vmem:[%s1683_s1 + $0x58] sm:$0xff]  ;;  %v1363_v11 = vld [vmem:[%s1683_s1 + $0x50] sm:$0xff] }
  0x10   : > { %v1354_v12 = vld [vmem:[%s1683_s1 + $0x8] sm:$0xff]  ;;  %v1353_v14 = vld [vmem:[%s1683_s1] sm:$0xff]  ;;  %v1136_v28 = vld [vmem:[%s1522_s22 + $0x10] sm:$0xf] }
  0x11   : > { %656 = vmatpush.bf16.msra.mxu0 %v1359_v2  ;;  %1370 = vmatpush.bf16.msra.mxu2 %v1359_v2  ;;  %v1362_v13 = vld [vmem:[%s1683_s1 + $0x48] sm:$0xff]  ;;  %v1361_v15 = vld [vmem:[%s1683_s1 + $0x40] sm:$0xff]  ;;  %v1324_v29 = vld [vmem:[%s1522_s22 + $0x14] sm:$0xf0] }
  0x12   : > { %745 = vmatpush.bf16.msra.mxu1 %v1367_v3  ;;  %1378 = vmatpush.bf16.msra.mxu3 %v1367_v3  ;;  %v1128_v16 = vld [vmem:[%s1522_s22] sm:$0xf]  ;;  %v1322_v17 = vld [vmem:[%s1522_s22 + $0x4] sm:$0xf0]  ;;  %v1321_v20 = vld [vmem:[%s1522_s22 + $0x4] sm:$0xf]  ;;  %v1137_v36 = vor.u32 %v1324_v29, %v1136_v28 }
  0x13   : > { %v1192_v18 = vld [vmem:[%s1522_s22 + $0x80] sm:$0xf]  ;;  %v1338_v19 = vld [vmem:[%s1522_s22 + $0x84] sm:$0xf0]  ;;  %v1130_v21 = vld [vmem:[%s1522_s22 + $0x8] sm:$0xf0]  ;;  %v1129_v24 = vor.u32 %v1322_v17, %v1128_v16 }
  0x14   : > { %v1337_v22 = vld [vmem:[%s1522_s22 + $0x84] sm:$0xf]  ;;  %v1194_v23 = vld [vmem:[%s1522_s22 + $0x88] sm:$0xf0]  ;;  %v1193_v25 = vor.u32 %v1338_v19, %v1192_v18  ;;  %v1133_v26 = vor.u32 %v1321_v20, %v1130_v21  ;;  %v1200_v30 = vld [vmem:[%s1522_s22 + $0x90] sm:$0xf] }
  0x15   : > { %657 = vmatpush.bf16.msra.mxu0 %v1358_v4  ;;  %1371 = vmatpush.bf16.msra.mxu2 %v1358_v4  ;;  %v1197_v27 = vor.u32 %v1337_v22, %v1194_v23  ;;  %v1340_v31 = vld [vmem:[%s1522_s22 + $0x94] sm:$0xf0]  ;;  %v1323_v32 = vld [vmem:[%s1522_s22 + $0x14] sm:$0xf]  ;;  %v1138_v33 = vld [vmem:[%s1522_s22 + $0x18] sm:$0xf0] }
  0x16   : > { %746 = vmatpush.bf16.msra.mxu1 %v1366_v5  ;;  %1379 = vmatpush.bf16.msra.mxu3 %v1366_v5  ;;  %v1339_v34 = vld [vmem:[%s1522_s22 + $0x94] sm:$0xf]  ;;  %v1202_v35 = vld [vmem:[%s1522_s22 + $0x98] sm:$0xf0]  ;;  %v1201_v37 = vor.u32 %v1340_v31, %v1200_v30  ;;  %v1141_v38 = vor.u32 %v1323_v32, %v1138_v33  ;;  %v1144_v40 = vld [vmem:[%s1522_s22 + $0x20] sm:$0xf] }
  0x17   : > { %v1205_v39 = vor.u32 %v1339_v34, %v1202_v35  ;;  %v1326_v41 = vld [vmem:[%s1522_s22 + $0x24] sm:$0xf0]  ;;  %v1208_v42 = vld [vmem:[%s1522_s22 + $0xa0] sm:$0xf]  ;;  %v1325_v44 = vld [vmem:[%s1522_s22 + $0x24] sm:$0xf] }
  0x18   : > { %v1342_v43 = vld [vmem:[%s1522_s22 + $0xa4] sm:$0xf0]  ;;  %v1146_v45 = vld [vmem:[%s1522_s22 + $0x28] sm:$0xf0]  ;;  %v1341_v46 = vld [vmem:[%s1522_s22 + $0xa4] sm:$0xf]  ;;  %v1145_v48 = vor.u32 %v1326_v41, %v1144_v40 }
  0x19   : > { %658 = vmatpush.bf16.msra.mxu0 %v1357_v6  ;;  %1372 = vmatpush.bf16.msra.mxu2 %v1357_v6  ;;  %v1210_v47 = vld [vmem:[%s1522_s22 + $0xa8] sm:$0xf0]  ;;  %v1209_v49 = vor.u32 %v1342_v43, %v1208_v42  ;;  %v1149_v50 = vor.u32 %v1325_v44, %v1146_v45  ;;  %v1152_v52 = vld [vmem:[%s1522_s22 + $0x30] sm:$0xf]  ;;  %v1328_v53 = vld [vmem:[%s1522_s22 + $0x34] sm:$0xf0] }
  0x1a   : > { %747 = vmatpush.bf16.msra.mxu1 %v1365_v7  ;;  %1380 = vmatpush.bf16.msra.mxu3 %v1365_v7  ;;  %v1213_v51 = vor.u32 %v1341_v46, %v1210_v47  ;;  %v1216_v54 = vld [vmem:[%s1522_s22 + $0xb0] sm:$0xf]  ;;  %v1344_v55 = vld [vmem:[%s1522_s22 + $0xb4] sm:$0xf0]  ;;  %v1327_v56 = vld [vmem:[%s1522_s22 + $0x34] sm:$0xf]  ;;  %v1153_v60 = vor.u32 %v1328_v53, %v1152_v52 }
  0x1b   : > { %v1154_v57 = vld [vmem:[%s1522_s22 + $0x38] sm:$0xf0]  ;;  %v1343_v58 = vld [vmem:[%s1522_s22 + $0xb4] sm:$0xf]  ;;  %v1217_v61 = vor.u32 %v1344_v55, %v1216_v54  ;;  %v1160_v0 = vld [vmem:[%s1522_s22 + $0x40] sm:$0xf] }
  0x1c   : > { %v1218_v59 = vld [vmem:[%s1522_s22 + $0xb8] sm:$0xf0]  ;;  %v1157_v62 = vor.u32 %v1327_v56, %v1154_v57  ;;  %v1330_v1 = vld [vmem:[%s1522_s22 + $0x44] sm:$0xf0]  ;;  %v1224_v2 = vld [vmem:[%s1522_s22 + $0xc0] sm:$0xf] }
  0x1d   : > { %659 = vmatpush.bf16.msra.mxu0 %v1356_v8  ;;  %1373 = vmatpush.bf16.msra.mxu2 %v1356_v8  ;;  %v1221_v63 = vor.u32 %v1343_v58, %v1218_v59  ;;  %v1346_v3 = vld [vmem:[%s1522_s22 + $0xc4] sm:$0xf0]  ;;  %v1329_v4 = vld [vmem:[%s1522_s22 + $0x44] sm:$0xf]  ;;  %v1162_v5 = vld [vmem:[%s1522_s22 + $0x48] sm:$0xf0]  ;;  %v1161_v8 = vor.u32 %v1330_v1, %v1160_v0 }
  0x1e   : > { %748 = vmatpush.bf16.msra.mxu1 %v1364_v9  ;;  %1381 = vmatpush.bf16.msra.mxu3 %v1364_v9  ;;  %v1345_v6 = vld [vmem:[%s1522_s22 + $0xc4] sm:$0xf]  ;;  %v1226_v7 = vld [vmem:[%s1522_s22 + $0xc8] sm:$0xf0]  ;;  %v1225_v9 = vor.u32 %v1346_v3, %v1224_v2  ;;  %v1331_v16 = vld [vmem:[%s1522_s22 + $0x54] sm:$0xf] }
  0x1f   : > { %v1170_v17 = vld [vmem:[%s1522_s22 + $0x58] sm:$0xf0]  ;;  %v1347_v18 = vld [vmem:[%s1522_s22 + $0xd4] sm:$0xf]  ;;  %v1333_v28 = vld [vmem:[%s1522_s22 + $0x64] sm:$0xf] }
  0x20   : > { %v1234_v19 = vld [vmem:[%s1522_s22 + $0xd8] sm:$0xf0]  ;;  %v1173_v22 = vor.u32 %v1331_v16, %v1170_v17  ;;  %v1178_v29 = vld [vmem:[%s1522_s22 + $0x68] sm:$0xf0]  ;;  %v1349_v30 = vld [vmem:[%s1522_s22 + $0xe4] sm:$0xf] }
  0x21   : > { %660 = vmatpush.bf16.msra.mxu0 %v1355_v10  ;;  %1374 = vmatpush.bf16.msra.mxu2 %v1355_v10  ;;  %v1165_v10 = vor.u32 %v1329_v4, %v1162_v5  ;;  %v1237_v23 = vor.u32 %v1347_v18, %v1234_v19  ;;  %v1242_v31 = vld [vmem:[%s1522_s22 + $0xe8] sm:$0xf0]  ;;  %v1181_v34 = vor.u32 %v1333_v28, %v1178_v29  ;;  %v1335_v40 = vld [vmem:[%s1522_s22 + $0x74] sm:$0xf]  ;;  %v1186_v41 = vld [vmem:[%s1522_s22 + $0x78] sm:$0xf0] }
  0x22   : > { %749 = vmatpush.bf16.msra.mxu1 %v1363_v11  ;;  %1382 = vmatpush.bf16.msra.mxu3 %v1363_v11  ;;  %v1229_v11 = vor.u32 %v1345_v6, %v1226_v7  ;;  %v1245_v35 = vor.u32 %v1349_v30, %v1242_v31  ;;  %v1351_v42 = vld [vmem:[%s1522_s22 + $0xf4] sm:$0xf]  ;;  %v1250_v43 = vld [vmem:[%s1522_s22 + $0xf8] sm:$0xf0]  ;;  %v1189_v46 = vor.u32 %v1335_v40, %v1186_v41 }
  0x23   : > { %v1253_v47 = vor.u32 %v1351_v42, %v1250_v43 }
  0x25   : > { %661 = vmatpush.bf16.msra.mxu0 %v1354_v12  ;;  %1375 = vmatpush.bf16.msra.mxu2 %v1354_v12  ;;  %v1168_v12 = vld [vmem:[%s1522_s22 + $0x50] sm:$0xf] }
  0x26   : > { %750 = vmatpush.bf16.msra.mxu1 %v1362_v13  ;;  %1383 = vmatpush.bf16.msra.mxu3 %v1362_v13  ;;  %v1332_v13 = vld [vmem:[%s1522_s22 + $0x54] sm:$0xf0] }
  0x27   : > { %v1169_v20 = vor.u32 %v1332_v13, %v1168_v12 }
  0x29   : > { %662 = vmatpush.bf16.msra.mxu0 %v1353_v14  ;;  %1376 = vmatpush.bf16.msra.mxu2 %v1353_v14  ;;  %v1232_v14 = vld [vmem:[%s1522_s22 + $0xd0] sm:$0xf] }
  0x2a   : > { %751 = vmatpush.bf16.msra.mxu1 %v1361_v15  ;;  %1384 = vmatpush.bf16.msra.mxu3 %v1361_v15  ;;  %v1348_v15 = vld [vmem:[%s1522_s22 + $0xd4] sm:$0xf0] }
  0x2b   : > { %v1233_v21 = vor.u32 %v1348_v15, %v1232_v14 }
  0x2c   : > { %663 = vmatmul.bf16.vlgmr.msra.gmra.mxu0 %v1129_v24  ;;  %703 = vmatmul.bf16.vlgmr.msra.gmra.mxu2 %v1193_v25  ;;  %v1176_v24 = vld [vmem:[%s1522_s22 + $0x60] sm:$0xf]  ;;  %v1334_v25 = vld [vmem:[%s1522_s22 + $0x64] sm:$0xf0] }
  0x2d   : > { %752 = vmatmul.bf16.vlgmr.msra.gmra.mxu1 %v1133_v26  ;;  %792 = vmatmul.bf16.vlgmr.msra.gmra.mxu3 %v1197_v27  ;;  %v1240_v26 = vld [vmem:[%s1522_s22 + $0xe0] sm:$0xf]  ;;  %v1350_v27 = vld [vmem:[%s1522_s22 + $0xe4] sm:$0xf0]  ;;  %v1177_v32 = vor.u32 %v1334_v25, %v1176_v24 }
  0x2e   : > { %v1241_v33 = vor.u32 %v1350_v27, %v1240_v26 }
  0x3c   : > { %668 = vmatmul.bf16.gmra.mxu0 %v1137_v36  ;;  %708 = vmatmul.bf16.gmra.mxu2 %v1201_v37  ;;  %v1184_v36 = vld [vmem:[%s1522_s22 + $0x70] sm:$0xf]  ;;  %v1336_v37 = vld [vmem:[%s1522_s22 + $0x74] sm:$0xf0] }
  0x3d   : > { %757 = vmatmul.bf16.gmra.mxu1 %v1141_v38  ;;  %797 = vmatmul.bf16.gmra.mxu3 %v1205_v39  ;;  %v1248_v38 = vld [vmem:[%s1522_s22 + $0xf0] sm:$0xf]  ;;  %v1352_v39 = vld [vmem:[%s1522_s22 + $0xf4] sm:$0xf0]  ;;  %v1185_v44 = vor.u32 %v1336_v37, %v1184_v36 }
  0x3e   : > { %v1249_v45 = vor.u32 %v1352_v39, %v1248_v38 }
  0x4c   : > { %673 = vmatmul.bf16.gmra.mxu0 %v1145_v48  ;;  %713 = vmatmul.bf16.gmra.mxu2 %v1209_v49  ;;  %v1600_v49 = vld [vmem:[%s1684_s2] ss:$0 sm:$0xff] }
  0x4d   : > { %762 = vmatmul.bf16.gmra.mxu1 %v1149_v50  ;;  %802 = vmatmul.bf16.gmra.mxu3 %v1213_v51 }
  0x5c   : > { %678 = vmatmul.bf16.gmra.mxu0 %v1153_v60  ;;  %718 = vmatmul.bf16.gmra.mxu2 %v1217_v61 }
  0x5d   : > { %767 = vmatmul.bf16.gmra.mxu1 %v1157_v62  ;;  %807 = vmatmul.bf16.gmra.mxu3 %v1221_v63 }
  0x6c   : > { %683 = vmatmul.bf16.gmra.mxu0 %v1161_v8  ;;  %723 = vmatmul.bf16.gmra.mxu2 %v1225_v9 }
  0x6d   : > { %772 = vmatmul.bf16.gmra.mxu1 %v1165_v10  ;;  %812 = vmatmul.bf16.gmra.mxu3 %v1229_v11 }
  0x7c   : > { %688 = vmatmul.bf16.gmra.mxu0 %v1169_v20  ;;  %728 = vmatmul.bf16.gmra.mxu2 %v1233_v21 }
  0x7d   : > { %777 = vmatmul.bf16.gmra.mxu1 %v1173_v22  ;;  %817 = vmatmul.bf16.gmra.mxu3 %v1237_v23 }
  0x8c   : > { %693 = vmatmul.bf16.gmra.mxu0 %v1177_v32  ;;  %733 = vmatmul.bf16.gmra.mxu2 %v1241_v33 }
  0x8d   : > { %782 = vmatmul.bf16.gmra.mxu1 %v1181_v34  ;;  %822 = vmatmul.bf16.gmra.mxu3 %v1245_v35 }
  0x9c   : > { %698 = vmatmul.bf16.gmra.mxu0 %v1185_v44  ;;  %738 = vmatmul.bf16.gmra.mxu2 %v1249_v45 }
  0x9d   : > { %787 = vmatmul.bf16.gmra.mxu1 %v1189_v46  ;;  %827 = vmatmul.bf16.gmra.mxu3 %v1253_v47 }
  0xa9   : > { %v664_v48 = vpop.f32.mrf.mxu0 }
  0xaa   : > { %v753_v50 = vpop.f32.mrf.mxu1 }
  0xab   : > { %v754_v51 = vadd.f32 %v753_v50, %v664_v48 }
  0xad   : > { %v936_v52 = vadd.f32 %v1600_v49, %v754_v51 }
  0xaf   : > { %968 = vst [vmem:[%s1607_s7] sm:$0xff] %v936_v52  ;;  %v704_v53 = vpop.f32.mrf.mxu2 }
  0xb0   : > { %v793_v54 = vpop.f32.mrf.mxu3 }
  0xb1   : > { %v794_v55 = vadd.f32 %v793_v54, %v704_v53  ;;  %v666_v56 = vpop.f32.mrf.mxu0 }
  0xb2   : > { %v755_v57 = vpop.f32.mrf.mxu1 }
  0xb3   : > { %v952_v58 = vadd.f32 %v1600_v49, %v794_v55  ;;  %v756_v59 = vadd.f32 %v755_v57, %v666_v56 }
  0xb5   : > { %984 = vst [vmem:[%s1607_s7 + $0x80] sm:$0xff] %v952_v58  ;;  %v937_v60 = vadd.f32 %v1600_v49, %v756_v59 }
  0xb7   : > { %969 = vst [vmem:[%s1607_s7 + $0x8] sm:$0xff] %v937_v60  ;;  %v706_v61 = vpop.f32.mrf.mxu2 }
  0xb8   : > { %v795_v62 = vpop.f32.mrf.mxu3 }
  0xb9   : > { %v796_v63 = vadd.f32 %v795_v62, %v706_v61  ;;  %v669_v0 = vpop.f32.mrf.mxu0 }
  0xba   : > { %v758_v1 = vpop.f32.mrf.mxu1 }
  0xbb   : > { %v953_v2 = vadd.f32 %v1600_v49, %v796_v63  ;;  %v759_v3 = vadd.f32 %v758_v1, %v669_v0 }
  0xbd   : > { %985 = vst [vmem:[%s1607_s7 + $0x88] sm:$0xff] %v953_v2  ;;  %v938_v4 = vadd.f32 %v1600_v49, %v759_v3 }
  0xbf   : > { %970 = vst [vmem:[%s1607_s7 + $0x10] sm:$0xff] %v938_v4  ;;  %v709_v5 = vpop.f32.mrf.mxu2 }
  0xc0   : > { %v798_v6 = vpop.f32.mrf.mxu3 }
  0xc1   : > { %v799_v7 = vadd.f32 %v798_v6, %v709_v5  ;;  %v671_v8 = vpop.f32.mrf.mxu0 }
  0xc2   : > { %v760_v9 = vpop.f32.mrf.mxu1 }
  0xc3   : > { %v954_v10 = vadd.f32 %v1600_v49, %v799_v7  ;;  %v761_v11 = vadd.f32 %v760_v9, %v671_v8 }
  0xc5   : > { %986 = vst [vmem:[%s1607_s7 + $0x90] sm:$0xff] %v954_v10  ;;  %v939_v12 = vadd.f32 %v1600_v49, %v761_v11 }
  0xc7   : > { %971 = vst [vmem:[%s1607_s7 + $0x18] sm:$0xff] %v939_v12  ;;  %v711_v13 = vpop.f32.mrf.mxu2 }
  0xc8   : > { %v800_v14 = vpop.f32.mrf.mxu3 }
  0xc9   : > { %v801_v15 = vadd.f32 %v800_v14, %v711_v13  ;;  %v674_v16 = vpop.f32.mrf.mxu0 }
  0xca   : > { %v763_v17 = vpop.f32.mrf.mxu1 }
  0xcb   : > { %v955_v18 = vadd.f32 %v1600_v49, %v801_v15  ;;  %v764_v19 = vadd.f32 %v763_v17, %v674_v16 }
  0xcd   : > { %987 = vst [vmem:[%s1607_s7 + $0x98] sm:$0xff] %v955_v18  ;;  %v940_v20 = vadd.f32 %v1600_v49, %v764_v19 }
  0xcf   : > { %972 = vst [vmem:[%s1607_s7 + $0x20] sm:$0xff] %v940_v20  ;;  %v714_v21 = vpop.f32.mrf.mxu2 }
  0xd0   : > { %v803_v22 = vpop.f32.mrf.mxu3 }
  0xd1   : > { %v804_v23 = vadd.f32 %v803_v22, %v714_v21  ;;  %v676_v24 = vpop.f32.mrf.mxu0 }
  0xd2   : > { %v765_v25 = vpop.f32.mrf.mxu1 }
  0xd3   : > { %v956_v26 = vadd.f32 %v1600_v49, %v804_v23  ;;  %v766_v27 = vadd.f32 %v765_v25, %v676_v24 }
  0xd5   : > { %988 = vst [vmem:[%s1607_s7 + $0xa0] sm:$0xff] %v956_v26  ;;  %v941_v28 = vadd.f32 %v1600_v49, %v766_v27 }
  0xd7   : > { %973 = vst [vmem:[%s1607_s7 + $0x28] sm:$0xff] %v941_v28  ;;  %v716_v29 = vpop.f32.mrf.mxu2 }
  0xd8   : > { %v805_v30 = vpop.f32.mrf.mxu3 }
  0xd9   : > { %v806_v31 = vadd.f32 %v805_v30, %v716_v29  ;;  %v679_v32 = vpop.f32.mrf.mxu0 }
  0xda   : > { %v768_v33 = vpop.f32.mrf.mxu1 }
  0xdb   : > { %v957_v34 = vadd.f32 %v1600_v49, %v806_v31  ;;  %v769_v35 = vadd.f32 %v768_v33, %v679_v32 }
  0xdd   : > { %989 = vst [vmem:[%s1607_s7 + $0xa8] sm:$0xff] %v957_v34  ;;  %v942_v36 = vadd.f32 %v1600_v49, %v769_v35 }
  0xdf   : > { %974 = vst [vmem:[%s1607_s7 + $0x30] sm:$0xff] %v942_v36  ;;  %v719_v37 = vpop.f32.mrf.mxu2 }
  0xe0   : > { %v808_v38 = vpop.f32.mrf.mxu3 }
  0xe1   : > { %v809_v39 = vadd.f32 %v808_v38, %v719_v37  ;;  %v681_v40 = vpop.f32.mrf.mxu0 }
  0xe2   : > { %v770_v41 = vpop.f32.mrf.mxu1 }
  0xe3   : > { %v958_v42 = vadd.f32 %v1600_v49, %v809_v39  ;;  %v771_v43 = vadd.f32 %v770_v41, %v681_v40 }
  0xe5   : > { %990 = vst [vmem:[%s1607_s7 + $0xb0] sm:$0xff] %v958_v42  ;;  %v943_v44 = vadd.f32 %v1600_v49, %v771_v43 }
  0xe7   : > { %975 = vst [vmem:[%s1607_s7 + $0x38] sm:$0xff] %v943_v44  ;;  %v721_v45 = vpop.f32.mrf.mxu2 }
  0xe8   : > { %v810_v46 = vpop.f32.mrf.mxu3 }
  0xe9   : > { %v811_v47 = vadd.f32 %v810_v46, %v721_v45  ;;  %v684_v48 = vpop.f32.mrf.mxu0 }
  0xea   : > { %v773_v50 = vpop.f32.mrf.mxu1 }
  0xeb   : > { %v959_v51 = vadd.f32 %v1600_v49, %v811_v47  ;;  %v774_v52 = vadd.f32 %v773_v50, %v684_v48 }
  0xed   : > { %991 = vst [vmem:[%s1607_s7 + $0xb8] sm:$0xff] %v959_v51  ;;  %v944_v53 = vadd.f32 %v1600_v49, %v774_v52 }
  0xef   : > { %976 = vst [vmem:[%s1607_s7 + $0x40] sm:$0xff] %v944_v53  ;;  %v724_v54 = vpop.f32.mrf.mxu2 }
  0xf0   : > { %v813_v55 = vpop.f32.mrf.mxu3 }
  0xf1   : > { %v814_v56 = vadd.f32 %v813_v55, %v724_v54  ;;  %v686_v57 = vpop.f32.mrf.mxu0 }
  0xf2   : > { %v775_v58 = vpop.f32.mrf.mxu1 }
  0xf3   : > { %v960_v59 = vadd.f32 %v1600_v49, %v814_v56  ;;  %v776_v60 = vadd.f32 %v775_v58, %v686_v57 }
  0xf5   : > { %992 = vst [vmem:[%s1607_s7 + $0xc0] sm:$0xff] %v960_v59  ;;  %v945_v61 = vadd.f32 %v1600_v49, %v776_v60 }
  0xf7   : > { %977 = vst [vmem:[%s1607_s7 + $0x48] sm:$0xff] %v945_v61  ;;  %v726_v62 = vpop.f32.mrf.mxu2 }
  0xf8   : > { %v815_v63 = vpop.f32.mrf.mxu3 }
  0xf9   : > { %v816_v0 = vadd.f32 %v815_v63, %v726_v62  ;;  %v689_v1 = vpop.f32.mrf.mxu0 }
  0xfa   : > { %v778_v2 = vpop.f32.mrf.mxu1 }
  0xfb   : > { %v961_v3 = vadd.f32 %v1600_v49, %v816_v0  ;;  %v779_v4 = vadd.f32 %v778_v2, %v689_v1 }
  0xfd   : > { %993 = vst [vmem:[%s1607_s7 + $0xc8] sm:$0xff] %v961_v3  ;;  %v946_v5 = vadd.f32 %v1600_v49, %v779_v4 }
  0xff   : > { %978 = vst [vmem:[%s1607_s7 + $0x50] sm:$0xff] %v946_v5  ;;  %v729_v6 = vpop.f32.mrf.mxu2 }
 0x100   : > { %v818_v7 = vpop.f32.mrf.mxu3 }
 0x101   : > { %v819_v8 = vadd.f32 %v818_v7, %v729_v6  ;;  %v691_v9 = vpop.f32.mrf.mxu0 }
 0x102   : > { %v780_v10 = vpop.f32.mrf.mxu1 }
 0x103   : > { %v962_v11 = vadd.f32 %v1600_v49, %v819_v8  ;;  %v781_v12 = vadd.f32 %v780_v10, %v691_v9 }
 0x105   : > { %994 = vst [vmem:[%s1607_s7 + $0xd0] sm:$0xff] %v962_v11  ;;  %v947_v13 = vadd.f32 %v1600_v49, %v781_v12 }
 0x107   : > { %979 = vst [vmem:[%s1607_s7 + $0x58] sm:$0xff] %v947_v13  ;;  %v731_v14 = vpop.f32.mrf.mxu2 }
 0x108   : > { %v820_v15 = vpop.f32.mrf.mxu3 }
 0x109   : > { %v821_v16 = vadd.f32 %v820_v15, %v731_v14  ;;  %v694_v17 = vpop.f32.mrf.mxu0 }
 0x10a   : > { %v783_v18 = vpop.f32.mrf.mxu1 }
 0x10b   : > { %v963_v19 = vadd.f32 %v1600_v49, %v821_v16  ;;  %v784_v20 = vadd.f32 %v783_v18, %v694_v17 }
 0x10d   : > { %995 = vst [vmem:[%s1607_s7 + $0xd8] sm:$0xff] %v963_v19  ;;  %v948_v21 = vadd.f32 %v1600_v49, %v784_v20 }
 0x10f   : > { %980 = vst [vmem:[%s1607_s7 + $0x60] sm:$0xff] %v948_v21  ;;  %v734_v22 = vpop.f32.mrf.mxu2 }
 0x110   : > { %v823_v23 = vpop.f32.mrf.mxu3 }
 0x111   : > { %v824_v24 = vadd.f32 %v823_v23, %v734_v22  ;;  %v696_v25 = vpop.f32.mrf.mxu0 }
 0x112   : > { %v785_v26 = vpop.f32.mrf.mxu1 }
 0x113   : > { %v964_v27 = vadd.f32 %v1600_v49, %v824_v24  ;;  %v786_v28 = vadd.f32 %v785_v26, %v696_v25 }
 0x115   : > { %996 = vst [vmem:[%s1607_s7 + $0xe0] sm:$0xff] %v964_v27  ;;  %v949_v29 = vadd.f32 %v1600_v49, %v786_v28 }
 0x117   : > { %981 = vst [vmem:[%s1607_s7 + $0x68] sm:$0xff] %v949_v29  ;;  %v736_v30 = vpop.f32.mrf.mxu2 }
 0x118   : > { %v825_v31 = vpop.f32.mrf.mxu3 }
 0x119   : > { %v826_v32 = vadd.f32 %v825_v31, %v736_v30  ;;  %v699_v33 = vpop.f32.mrf.mxu0 }
 0x11a   : > { %v788_v34 = vpop.f32.mrf.mxu1 }
 0x11b   : > { %v965_v35 = vadd.f32 %v1600_v49, %v826_v32  ;;  %v789_v36 = vadd.f32 %v788_v34, %v699_v33 }
 0x11d   : > { %997 = vst [vmem:[%s1607_s7 + $0xe8] sm:$0xff] %v965_v35  ;;  %v950_v37 = vadd.f32 %v1600_v49, %v789_v36 }
 0x11f   : > { %982 = vst [vmem:[%s1607_s7 + $0x70] sm:$0xff] %v950_v37  ;;  %v739_v38 = vpop.f32.mrf.mxu2 }
 0x120   : > { %v828_v39 = vpop.f32.mrf.mxu3 }
 0x121   : > { %v829_v40 = vadd.f32 %v828_v39, %v739_v38  ;;  %v701_v41 = vpop.f32.mrf.mxu0 }
 0x122   : > { %v790_v42 = vpop.f32.mrf.mxu1 }
 0x123   : > { %v966_v43 = vadd.f32 %v1600_v49, %v829_v40  ;;  %v791_v44 = vadd.f32 %v790_v42, %v701_v41 }
 0x125   : > { %998 = vst [vmem:[%s1607_s7 + $0xf0] sm:$0xff] %v966_v43  ;;  %v951_v45 = vadd.f32 %v1600_v49, %v791_v44 }
 0x127   : > { %983 = vst [vmem:[%s1607_s7 + $0x78] sm:$0xff] %v951_v45  ;;  %v741_v46 = vpop.f32.mrf.mxu2 }
 0x128   : > { %v830_v47 = vpop.f32.mrf.mxu3 }
 0x129   : > { %v831_v48 = vadd.f32 %v830_v47, %v741_v46 }
 0x12b   : > { %v967_v50 = vadd.f32 %v1600_v49, %v831_v48 }
 0x12d   : > { %999 = vst [vmem:[%s1607_s7 + $0xf8] sm:$0xff] %v967_v50 }
 0x12e PF: > { %s13_s14 = sadd.s32 1, %s1432_s14   ;;  %s1686_s12 = smov %s1428_s13 }
 0x12f   : > { %p10_p5 = scmp.ge.s32.totalorder %s13_s14, 4   ;;  %s1687_s13 = smov %s1689_s15 }
 0x131   :  { %12 = sbr.rel (!%p10_p5) target bundleno = 2 (0x2), region = 76 }

</bundles_post_ra>
